<compile_context>
chip_gen: v5e
topology: v5e:2x2
jax: 0.10.0
libtpu: 0.0.40
codegen_flags: <defaults>
</compile_context>

<pallas_src>
import functools

import jax
import jax.numpy as jnp
from jax import lax
from jax.experimental import pallas as pl
from jax.experimental.pallas import tpu as pltpu

# Small demo sizes (module defaults are sent_hidden_size=256, num_layers=2).
SENT_REP_SIZE = 32
SENT_HIDDEN_SIZE = 32
SENT_NUM_LAYERS = 2
BATCH = 2
SEQ = 8


# ----------------------------------------------------------------------------
# Pallas kernel: both bidirectional LSTM layers fused
# ----------------------------------------------------------------------------
def _fused_bilstm2_kernel(xbig0_ref, wih0_ref, whh0_ref, b0_ref,
                          wih1_ref, whh1_ref, b1_ref, mask_ref,
                          out_ref, gx_ref, xb1_ref, *,
                          hidden: int, seq_len: int, bp: int, unroll):
    """Fused 2-layer bidirectional LSTM.

    xbig0_ref: (T*2Bp, Din)  step-s row block = [x(s) (Bp rows) ; x(T-1-s) (Bp rows)]
    wih*_ref : (Din_l, 8H)   gate columns interleaved [i_f i_b f_f f_b g_f g_b o_f o_b]
    whh*_ref : (2H, 8H)      block-diagonal recurrent weights (fwd rows -> fwd cols, ...)
    b*_ref   : (1, 8H)       b_ih + b_hh, interleaved like wih
    mask_ref : (T, Bp, 1)
    out_ref  : (T, Bp, 2H)   fwd hidden in lanes [0:H], bwd in [H:2H]
    gx_ref   : (T*2Bp, 8H)   VMEM scratch: hoisted input projection (reused per layer)
    xb1_ref  : (T*2Bp, 2H)   VMEM scratch: layer-0 output in layer-1 stacked-input layout
    """
    H, T, Bp = hidden, seq_len, bp
    R = 2 * Bp                                   # stacked rows per step (fwd | bwd)

    def run_layer(whh_ref, store_fn):
        def step_fn(s, carry):
            h, c = carry                         # (R, 2H) each: lanes [0:H]=fwd, [H:2H]=bwd
            row = pl.multiple_of(s * R, R)
            # Single fused MXU matmul on the serial h->h path (block-diagonal Whh),
            # plus one lane-dense read of the hoisted input projection.
            gates = gx_ref[pl.ds(row, R), :] + jnp.dot(
                h, whh_ref[...], preferred_element_type=jnp.float32)   # (R, 8H)
            # One pass of gate math covers both directions (interleaved layout).
            i = jax.nn.sigmoid(gates[:, 0:2 * H])
            f = jax.nn.sigmoid(gates[:, 2 * H:4 * H])
            g = jnp.tanh(gates[:, 4 * H:6 * H])
            o = jax.nn.sigmoid(gates[:, 6 * H:8 * H])
            c = f * c + i * g
            h = o * jnp.tanh(c)
            store_fn(s, h)
            return (h, c)

        z = jnp.zeros((R, 2 * H), jnp.float32)
        lax.fori_loop(0, T, step_fn, (z, z), unroll=unroll)

    # ---- Layer 0: hoisted input projection (one big MXU matmul, bias folded in) ----
    gx_ref[...] = (jnp.dot(xbig0_ref[...], wih0_ref[...],
                           preferred_element_type=jnp.float32) + b0_ref[...])

    def store_l0(s, h):
        # h[0:Bp, 0:H]    = layer-0 fwd hidden at time s
        # h[Bp:2Bp, H:2H] = layer-0 bwd hidden at time T-1-s
        sr = (T - 1) - s
        row_s = pl.multiple_of(s * R, R)
        row_r = pl.multiple_of(sr * R, R)
        hf = h[0:Bp, 0:H]
        hb = h[Bp:R, H:2 * H]
        # Write directly into layer-1's stacked input layout:
        #   xb1[step block s] = [y0(s) (Bp rows) ; y0(T-1-s) (Bp rows)],  y0(t)=[fwd(t)|bwd(t)]
        xb1_ref[pl.ds(row_s, Bp), 0:H] = hf
        xb1_ref[pl.ds(pl.multiple_of(row_r + Bp, Bp), Bp), 0:H] = hf
        xb1_ref[pl.ds(row_r, Bp), H:2 * H] = hb
        xb1_ref[pl.ds(pl.multiple_of(row_s + Bp, Bp), Bp), H:2 * H] = hb

    run_layer(whh0_ref, store_l0)

    # ---- Layer 1: hoisted input projection (reuses the same gx scratch) ----
    gx_ref[...] = (jnp.dot(xb1_ref[...], wih1_ref[...],
                           preferred_element_type=jnp.float32) + b1_ref[...])

    def store_l1(s, h):
        sr = (T - 1) - s
        out_ref[s, :, 0:H] = h[0:Bp, 0:H]          # fwd hidden at time s
        out_ref[sr, :, H:2 * H] = h[Bp:R, H:2 * H]  # bwd hidden at time T-1-s

    run_layer(whh1_ref, store_l1)

    # ---- Mask applied once, off the recurrent critical path; bulk lane-dense store ----
    out_ref[...] = out_ref[...] * mask_ref[...]


# ----------------------------------------------------------------------------
# Kernel-layout parameter packing (done once in the XLA wrapper)
# ----------------------------------------------------------------------------
def _interleave_cols(wf, wb, H):
    """(Din,4H) x 2 -> (Din,8H), columns ordered [i_f i_b f_f f_b g_f g_b o_f o_b]."""
    din = wf.shape[0]
    return jnp.concatenate(
        [wf.reshape(din, 4, 1, H), wb.reshape(din, 4, 1, H)], axis=2).reshape(din, 8 * H)


def _interleave_bias(bf, bb, H):
    """(4H,) x 2 -> (1,8H), interleaved like the weights."""
    return jnp.concatenate(
        [bf.reshape(4, 1, H), bb.reshape(4, 1, H)], axis=1).reshape(1, 8 * H)


def _block_diag_whh(whh_f, whh_b, H):
    """(H,4H) x 2 -> (2H,8H) block-diagonal, interleaved gate columns."""
    z = jnp.zeros((H, 4, 1, H), jnp.float32)
    top = jnp.concatenate([whh_f.reshape(H, 4, 1, H), z], axis=2).reshape(H, 8 * H)
    bot = jnp.concatenate([z, whh_b.reshape(H, 4, 1, H)], axis=2).reshape(H, 8 * H)
    return jnp.concatenate([top, bot], axis=0)


# ----------------------------------------------------------------------------
# Wrapper
# ----------------------------------------------------------------------------
def sent_encoder_forward(params, sent_reps, sent_masks, *, hidden, num_layers):
    """sent_reps: (B, T, rep_size) f32; sent_masks: (B, T) f32 -> (B, T, 2H)."""
    assert num_layers == 2, "kernel is fused for the module's 2-layer BiLSTM"
    B, T, din = sent_reps.shape
    H = hidden
    Bp = ((B + 7) // 8) * 8                        # pad batch to full sublane tiles
    pad = Bp - B

    # Time-major once at entry; batch padded to Bp.
    x_tm = jnp.transpose(sent_reps, (1, 0, 2))                       # (T, B, Din)
    x_tm = jnp.pad(x_tm, ((0, 0), (0, pad), (0, 0)))                 # (T, Bp, Din)
    # Stacked layout: step-s row block = [x(s) (fwd) ; x(T-1-s) (bwd)]
    xbig0 = jnp.concatenate([x_tm, x_tm[::-1]], axis=1).reshape(T * 2 * Bp, din)

    mask_tm = jnp.transpose(sent_masks, (1, 0))                      # (T, B)
    mask_tm = jnp.pad(mask_tm, ((0, 0), (0, pad)))[:, :, None]       # (T, Bp, 1), pad rows = 0

    # Kernel-layout weights: interleaved gate columns + block-diagonal Whh.
    wih, whh, bias = [], [], []
    for layer in range(num_layers):
        p = params[layer]
        wih.append(_interleave_cols(p["wih_f"], p["wih_b"], H))
        whh.append(_block_diag_whh(p["whh_f"], p["whh_b"], H))
        bias.append(_interleave_bias(p["b_f"], p["b_b"], H))

    unroll = True if T <= 16 else 8
    kernel = functools.partial(_fused_bilstm2_kernel,
                               hidden=H, seq_len=T, bp=Bp, unroll=unroll)
    vmem_spec = pl.BlockSpec(memory_space=pltpu.MemorySpace.VMEM)

    out = pl.pallas_call(
        kernel,
        out_shape=jax.ShapeDtypeStruct((T, Bp, 2 * H), jnp.float32),
        in_specs=[vmem_spec] * 8,
        out_specs=vmem_spec,
        scratch_shapes=[
            pltpu.VMEM((T * 2 * Bp, 8 * H), jnp.float32),   # hoisted gate projection (shared by both layers)
            pltpu.VMEM((T * 2 * Bp, 2 * H), jnp.float32),   # layer-0 output in layer-1 stacked-input layout
        ],
        # TODO(synk): for production sizes (H=256, long T) set
        # pltpu.CompilerParams(vmem_limit_bytes=...) and chunk the hoisted
        # projection over time; demo shapes fit the default scoped VMEM easily.
    )(xbig0, wih[0], whh[0], bias[0], wih[1], whh[1], bias[1], mask_tm)

    out = out[:, :B, :]                            # drop batch padding
    return jnp.transpose(out, (1, 0, 2))           # back to batch-first (B, T, 2H); dropout = identity (eval)


# ----------------------------------------------------------------------------
# Parameter init (PyTorch-LSTM-like) and pure-JAX reference
# ----------------------------------------------------------------------------
def init_params(key, rep_size, hidden, num_layers):
    """U(-1/sqrt(H), 1/sqrt(H)) init; stored transposed: wih (Din,4H), whh (H,4H),
    b = b_ih + b_hh (4H,); PyTorch gate order i,f,g,o; '_f' = forward, '_b' = backward."""
    params = []
    bound = float(1.0 / (hidden ** 0.5))
    for layer in range(num_layers):
        in_dim = rep_size if layer == 0 else 2 * hidden
        layer_p = {}
        for tag in ("f", "b"):
            key, k1, k2, k3, k4 = jax.random.split(key, 5)
            layer_p[f"wih_{tag}"] = jax.random.uniform(
                k1, (in_dim, 4 * hidden), jnp.float32, -bound, bound)
            layer_p[f"whh_{tag}"] = jax.random.uniform(
                k2, (hidden, 4 * hidden), jnp.float32, -bound, bound)
            b_ih = jax.random.uniform(k3, (4 * hidden,), jnp.float32, -bound, bound)
            b_hh = jax.random.uniform(k4, (4 * hidden,), jnp.float32, -bound, bound)
            layer_p[f"b_{tag}"] = b_ih + b_hh
        params.append(layer_p)
    return params


def _ref_lstm_dir(x_tm, wih, whh, b, hidden, reverse):
    B = x_tm.shape[1]
    xs = x_tm[::-1] if reverse else x_tm

    def step(carry, xt):
        h, c = carry
        gates = xt @ wih + h @ whh + b
        i = jax.nn.sigmoid(gates[:, :hidden])
        f = jax.nn.sigmoid(gates[:, hidden:2 * hidden])
        g = jnp.tanh(gates[:, 2 * hidden:3 * hidden])
        o = jax.nn.sigmoid(gates[:, 3 * hidden:])
        c = f * c + i * g
        h = o * jnp.tanh(c)
        return (h, c), h

    init = (jnp.zeros((B, hidden), jnp.float32), jnp.zeros((B, hidden), jnp.float32))
    _, ys = lax.scan(step, init, xs)
    return ys[::-1] if reverse else ys


def ref_forward(params, sent_reps, sent_masks, *, hidden, num_layers):
    x = sent_reps
    for layer in range(num_layers):
        p = params[layer]
        x_tm = jnp.transpose(x, (1, 0, 2))
        h_f = _ref_lstm_dir(x_tm, p["wih_f"], p["whh_f"], p["b_f"], hidden, False)
        h_b = _ref_lstm_dir(x_tm, p["wih_b"], p["whh_b"], p["b_b"], hidden, True)
        x = jnp.transpose(jnp.concatenate([h_f, h_b], axis=-1), (1, 0, 2))
    return x * sent_masks[:, :, None]


if __name__ == "__main__":
    key = jax.random.PRNGKey(0)
    k_params, k_reps = jax.random.split(key)

    params = init_params(k_params, SENT_REP_SIZE, SENT_HIDDEN_SIZE, SENT_NUM_LAYERS)
    sent_reps = jax.random.normal(k_reps, (BATCH, SEQ, SENT_REP_SIZE), jnp.float32)
    # variable-length mask: first batch element uses 6 sentences, second uses 8
    lengths = jnp.array([6, 8], dtype=jnp.int32)
    sent_masks = (jnp.arange(SEQ)[None, :] < lengths[:, None]).astype(jnp.float32)

    fwd = jax.jit(functools.partial(sent_encoder_forward,
                                    hidden=SENT_HIDDEN_SIZE,
                                    num_layers=SENT_NUM_LAYERS))
    out = jax.block_until_ready(fwd(params, sent_reps, sent_masks))

    ref = ref_forward(params, sent_reps, sent_masks,
                      hidden=SENT_HIDDEN_SIZE, num_layers=SENT_NUM_LAYERS)

    assert out.shape == (BATCH, SEQ, 2 * SENT_HIDDEN_SIZE), out.shape
    err = float(jnp.max(jnp.abs(out - ref)))
    assert jnp.allclose(out, ref, atol=5e-4, rtol=5e-4), err
    print("KERNEL_OK")
</pallas_src>

<mosaic_0001>
module attributes {stable_mosaic.version = 11 : i64} {
  func.func @_fused_bilstm2_kernel(%arg0: memref<128x32xf32, #tpu.memory_space<vmem>>, %arg1: memref<32x256xf32, #tpu.memory_space<vmem>>, %arg2: memref<64x256xf32, #tpu.memory_space<vmem>>, %arg3: memref<1x256xf32, #tpu.memory_space<vmem>>, %arg4: memref<64x256xf32, #tpu.memory_space<vmem>>, %arg5: memref<64x256xf32, #tpu.memory_space<vmem>>, %arg6: memref<1x256xf32, #tpu.memory_space<vmem>>, %arg7: memref<8x8x1xf32, #tpu.memory_space<vmem>>, %arg8: memref<8x8x64xf32, #tpu.memory_space<vmem>>, %arg9: memref<128x256xf32, #tpu.memory_space<vmem>>, %arg10: memref<128x64xf32, #tpu.memory_space<vmem>>) attributes {dimension_semantics = [], scalar_prefetch = 0 : i64, scratch_operands = 2 : i64, tpu.core_type = #tpu.core_type<tc>} {
    %c0 = arith.constant 0 : index
    %c0_0 = arith.constant 0 : index
    %0 = vector.load %arg0[%c0, %c0_0] : memref<128x32xf32, #tpu.memory_space<vmem>>, vector<128x32xf32>
    %c0_1 = arith.constant 0 : index
    %c0_2 = arith.constant 0 : index
    %1 = vector.load %arg1[%c0_1, %c0_2] : memref<32x256xf32, #tpu.memory_space<vmem>>, vector<32x256xf32>
    %cst = arith.constant dense<0.000000e+00> : vector<128x256xf32>
    %2 = tpu.matmul %0, %1, %cst {dimension_numbers = #tpu.dot_dimension_numbers<[1], [0], [0], [1], [0, 0, 1, 1], [], []>} : vector<128x32xf32>, vector<32x256xf32>, vector<128x256xf32> -> vector<128x256xf32>
    %c0_3 = arith.constant 0 : index
    %c0_4 = arith.constant 0 : index
    %3 = vector.load %arg3[%c0_3, %c0_4] : memref<1x256xf32, #tpu.memory_space<vmem>>, vector<1x256xf32>
    %4 = vector.broadcast %3 : vector<1x256xf32> to vector<128x256xf32>
    %5 = arith.addf %2, %4 : vector<128x256xf32>
    %c0_5 = arith.constant 0 : index
    %c0_6 = arith.constant 0 : index
    %6 = vector.load %arg9[%c0_5, %c0_6] : memref<128x256xf32, #tpu.memory_space<vmem>>, vector<128x256xf32>
    tpu.vector_store %arg9[%c0_5, %c0_6], %5 {strides = array<i32>} : memref<128x256xf32, #tpu.memory_space<vmem>>, vector<128x256xf32>,
    %cst_7 = arith.constant 0.000000e+00 : f32
    %7 = vector.broadcast %cst_7 : f32 to vector<16x64xf32>
    %c0_i32 = arith.constant 0 : i32
    %c16_i32 = arith.constant 16 : i32
    %8 = arith.muli %c0_i32, %c16_i32 : i32
    %9 = tpu.assume_multiple %8, 16 : i32
    %10 = arith.index_cast %9 : i32 to index
    %c0_8 = arith.constant 0 : index
    %11 = vector.load %arg9[%10, %c0_8] : memref<128x256xf32, #tpu.memory_space<vmem>>, vector<16x256xf32>
    %c0_9 = arith.constant 0 : index
    %c0_10 = arith.constant 0 : index
    %12 = vector.load %arg2[%c0_9, %c0_10] : memref<64x256xf32, #tpu.memory_space<vmem>>, vector<64x256xf32>
    %cst_11 = arith.constant dense<0.000000e+00> : vector<16x256xf32>
    %13 = tpu.matmul %7, %12, %cst_11 {dimension_numbers = #tpu.dot_dimension_numbers<[1], [0], [0], [1], [0, 0, 1, 1], [], []>} : vector<16x64xf32>, vector<64x256xf32>, vector<16x256xf32> -> vector<16x256xf32>
    %14 = arith.addf %11, %13 : vector<16x256xf32>
    %15 = vector.extract_strided_slice %14 {offsets = [0, 0], sizes = [16, 64], strides = [1, 1]} : vector<16x256xf32> to vector<16x64xf32>
    %16 = arith.negf %15 : vector<16x64xf32>
    %17 = math.exp %16 : vector<16x64xf32>
    %cst_12 = arith.constant 1.000000e+00 : f32
    %18 = vector.broadcast %cst_12 : f32 to vector<16x64xf32>
    %19 = arith.addf %18, %17 : vector<16x64xf32>
    %20 = arith.divf %18, %19 : vector<16x64xf32>
    %21 = vector.extract_strided_slice %14 {offsets = [0, 64], sizes = [16, 64], strides = [1, 1]} : vector<16x256xf32> to vector<16x64xf32>
    %22 = arith.negf %21 : vector<16x64xf32>
    %23 = math.exp %22 : vector<16x64xf32>
    %cst_13 = arith.constant 1.000000e+00 : f32
    %24 = vector.broadcast %cst_13 : f32 to vector<16x64xf32>
    %25 = arith.addf %24, %23 : vector<16x64xf32>
    %26 = arith.divf %24, %25 : vector<16x64xf32>
    %27 = vector.extract_strided_slice %14 {offsets = [0, 128], sizes = [16, 64], strides = [1, 1]} : vector<16x256xf32> to vector<16x64xf32>
    %28 = math.tanh %27 : vector<16x64xf32>
    %29 = vector.extract_strided_slice %14 {offsets = [0, 192], sizes = [16, 64], strides = [1, 1]} : vector<16x256xf32> to vector<16x64xf32>
    %30 = arith.negf %29 : vector<16x64xf32>
    %31 = math.exp %30 : vector<16x64xf32>
    %cst_14 = arith.constant 1.000000e+00 : f32
    %32 = vector.broadcast %cst_14 : f32 to vector<16x64xf32>
    %33 = arith.addf %32, %31 : vector<16x64xf32>
    %34 = arith.divf %32, %33 : vector<16x64xf32>
    %35 = arith.mulf %26, %7 : vector<16x64xf32>
    %36 = arith.mulf %20, %28 : vector<16x64xf32>
    %37 = arith.addf %35, %36 : vector<16x64xf32>
    %38 = math.tanh %37 : vector<16x64xf32>
    %39 = arith.mulf %34, %38 : vector<16x64xf32>
    %c7_i32 = arith.constant 7 : i32
    %40 = arith.subi %c7_i32, %c0_i32 : i32
    %c16_i32_15 = arith.constant 16 : i32
    %41 = arith.muli %c0_i32, %c16_i32_15 : i32
    %42 = tpu.assume_multiple %41, 16 : i32
    %c16_i32_16 = arith.constant 16 : i32
    %43 = arith.muli %40, %c16_i32_16 : i32
    %44 = tpu.assume_multiple %43, 16 : i32
    %45 = vector.extract_strided_slice %39 {offsets = [0, 0], sizes = [8, 32], strides = [1, 1]} : vector<16x64xf32> to vector<8x32xf32>
    %46 = vector.extract_strided_slice %39 {offsets = [8, 32], sizes = [8, 32], strides = [1, 1]} : vector<16x64xf32> to vector<8x32xf32>
    %47 = arith.index_cast %42 : i32 to index
    %c0_17 = arith.constant 0 : index
    %48 = vector.load %arg10[%47, %c0_17] : memref<128x64xf32, #tpu.memory_space<vmem>>, vector<8x32xf32>
    tpu.vector_store %arg10[%47, %c0_17], %45 {strides = array<i32>} : memref<128x64xf32, #tpu.memory_space<vmem>>, vector<8x32xf32>,
    %c8_i32 = arith.constant 8 : i32
    %49 = arith.addi %44, %c8_i32 : i32
    %50 = tpu.assume_multiple %49, 8 : i32
    %51 = arith.index_cast %50 : i32 to index
    %c0_18 = arith.constant 0 : index
    %52 = vector.load %arg10[%51, %c0_18] : memref<128x64xf32, #tpu.memory_space<vmem>>, vector<8x32xf32>
    tpu.vector_store %arg10[%51, %c0_18], %45 {strides = array<i32>} : memref<128x64xf32, #tpu.memory_space<vmem>>, vector<8x32xf32>,
    %53 = arith.index_cast %44 : i32 to index
    %c32 = arith.constant 32 : index
    %54 = vector.load %arg10[%53, %c32] : memref<128x64xf32, #tpu.memory_space<vmem>>, vector<8x32xf32>
    tpu.vector_store %arg10[%53, %c32], %46 {strides = array<i32>} : memref<128x64xf32, #tpu.memory_space<vmem>>, vector<8x32xf32>,
    %c8_i32_19 = arith.constant 8 : i32
    %55 = arith.addi %42, %c8_i32_19 : i32
    %56 = tpu.assume_multiple %55, 8 : i32
    %57 = arith.index_cast %56 : i32 to index
    %c32_20 = arith.constant 32 : index
    %58 = vector.load %arg10[%57, %c32_20] : memref<128x64xf32, #tpu.memory_space<vmem>>, vector<8x32xf32>
    tpu.vector_store %arg10[%57, %c32_20], %46 {strides = array<i32>} : memref<128x64xf32, #tpu.memory_space<vmem>>, vector<8x32xf32>,
    %c1_i32 = arith.constant 1 : i32
    %c16_i32_21 = arith.constant 16 : i32
    %59 = arith.muli %c1_i32, %c16_i32_21 : i32
    %60 = tpu.assume_multiple %59, 16 : i32
    %61 = arith.index_cast %60 : i32 to index
    %c0_22 = arith.constant 0 : index
    %62 = vector.load %arg9[%61, %c0_22] : memref<128x256xf32, #tpu.memory_space<vmem>>, vector<16x256xf32>
    %c0_23 = arith.constant 0 : index
    %c0_24 = arith.constant 0 : index
    %63 = vector.load %arg2[%c0_23, %c0_24] : memref<64x256xf32, #tpu.memory_space<vmem>>, vector<64x256xf32>
    %cst_25 = arith.constant dense<0.000000e+00> : vector<16x256xf32>
    %64 = tpu.matmul %39, %63, %cst_25 {dimension_numbers = #tpu.dot_dimension_numbers<[1], [0], [0], [1], [0, 0, 1, 1], [], []>} : vector<16x64xf32>, vector<64x256xf32>, vector<16x256xf32> -> vector<16x256xf32>
    %65 = arith.addf %62, %64 : vector<16x256xf32>
    %66 = vector.extract_strided_slice %65 {offsets = [0, 0], sizes = [16, 64], strides = [1, 1]} : vector<16x256xf32> to vector<16x64xf32>
    %67 = arith.negf %66 : vector<16x64xf32>
    %68 = math.exp %67 : vector<16x64xf32>
    %cst_26 = arith.constant 1.000000e+00 : f32
    %69 = vector.broadcast %cst_26 : f32 to vector<16x64xf32>
    %70 = arith.addf %69, %68 : vector<16x64xf32>
    %71 = arith.divf %69, %70 : vector<16x64xf32>
    %72 = vector.extract_strided_slice %65 {offsets = [0, 64], sizes = [16, 64], strides = [1, 1]} : vector<16x256xf32> to vector<16x64xf32>
    %73 = arith.negf %72 : vector<16x64xf32>
    %74 = math.exp %73 : vector<16x64xf32>
    %cst_27 = arith.constant 1.000000e+00 : f32
    %75 = vector.broadcast %cst_27 : f32 to vector<16x64xf32>
    %76 = arith.addf %75, %74 : vector<16x64xf32>
    %77 = arith.divf %75, %76 : vector<16x64xf32>
    %78 = vector.extract_strided_slice %65 {offsets = [0, 128], sizes = [16, 64], strides = [1, 1]} : vector<16x256xf32> to vector<16x64xf32>
    %79 = math.tanh %78 : vector<16x64xf32>
    %80 = vector.extract_strided_slice %65 {offsets = [0, 192], sizes = [16, 64], strides = [1, 1]} : vector<16x256xf32> to vector<16x64xf32>
    %81 = arith.negf %80 : vector<16x64xf32>
    %82 = math.exp %81 : vector<16x64xf32>
    %cst_28 = arith.constant 1.000000e+00 : f32
    %83 = vector.broadcast %cst_28 : f32 to vector<16x64xf32>
    %84 = arith.addf %83, %82 : vector<16x64xf32>
    %85 = arith.divf %83, %84 : vector<16x64xf32>
    %86 = arith.mulf %77, %37 : vector<16x64xf32>
    %87 = arith.mulf %71, %79 : vector<16x64xf32>
    %88 = arith.addf %86, %87 : vector<16x64xf32>
    %89 = math.tanh %88 : vector<16x64xf32>
    %90 = arith.mulf %85, %89 : vector<16x64xf32>
    %c7_i32_29 = arith.constant 7 : i32
    %91 = arith.subi %c7_i32_29, %c1_i32 : i32
    %c16_i32_30 = arith.constant 16 : i32
    %92 = arith.muli %c1_i32, %c16_i32_30 : i32
    %93 = tpu.assume_multiple %92, 16 : i32
    %c16_i32_31 = arith.constant 16 : i32
    %94 = arith.muli %91, %c16_i32_31 : i32
    %95 = tpu.assume_multiple %94, 16 : i32
    %96 = vector.extract_strided_slice %90 {offsets = [0, 0], sizes = [8, 32], strides = [1, 1]} : vector<16x64xf32> to vector<8x32xf32>
    %97 = vector.extract_strided_slice %90 {offsets = [8, 32], sizes = [8, 32], strides = [1, 1]} : vector<16x64xf32> to vector<8x32xf32>
    %98 = arith.index_cast %93 : i32 to index
    %c0_32 = arith.constant 0 : index
    %99 = vector.load %arg10[%98, %c0_32] : memref<128x64xf32, #tpu.memory_space<vmem>>, vector<8x32xf32>
    tpu.vector_store %arg10[%98, %c0_32], %96 {strides = array<i32>} : memref<128x64xf32, #tpu.memory_space<vmem>>, vector<8x32xf32>,
    %c8_i32_33 = arith.constant 8 : i32
    %100 = arith.addi %95, %c8_i32_33 : i32
    %101 = tpu.assume_multiple %100, 8 : i32
    %102 = arith.index_cast %101 : i32 to index
    %c0_34 = arith.constant 0 : index
    %103 = vector.load %arg10[%102, %c0_34] : memref<128x64xf32, #tpu.memory_space<vmem>>, vector<8x32xf32>
    tpu.vector_store %arg10[%102, %c0_34], %96 {strides = array<i32>} : memref<128x64xf32, #tpu.memory_space<vmem>>, vector<8x32xf32>,
    %104 = arith.index_cast %95 : i32 to index
    %c32_35 = arith.constant 32 : index
    %105 = vector.load %arg10[%104, %c32_35] : memref<128x64xf32, #tpu.memory_space<vmem>>, vector<8x32xf32>
    tpu.vector_store %arg10[%104, %c32_35], %97 {strides = array<i32>} : memref<128x64xf32, #tpu.memory_space<vmem>>, vector<8x32xf32>,
    %c8_i32_36 = arith.constant 8 : i32
    %106 = arith.addi %93, %c8_i32_36 : i32
    %107 = tpu.assume_multiple %106, 8 : i32
    %108 = arith.index_cast %107 : i32 to index
    %c32_37 = arith.constant 32 : index
    %109 = vector.load %arg10[%108, %c32_37] : memref<128x64xf32, #tpu.memory_space<vmem>>, vector<8x32xf32>
    tpu.vector_store %arg10[%108, %c32_37], %97 {strides = array<i32>} : memref<128x64xf32, #tpu.memory_space<vmem>>, vector<8x32xf32>,
    %c2_i32 = arith.constant 2 : i32
    %c16_i32_38 = arith.constant 16 : i32
    %110 = arith.muli %c2_i32, %c16_i32_38 : i32
    %111 = tpu.assume_multiple %110, 16 : i32
    %112 = arith.index_cast %111 : i32 to index
    %c0_39 = arith.constant 0 : index
    %113 = vector.load %arg9[%112, %c0_39] : memref<128x256xf32, #tpu.memory_space<vmem>>, vector<16x256xf32>
    %c0_40 = arith.constant 0 : index
    %c0_41 = arith.constant 0 : index
    %114 = vector.load %arg2[%c0_40, %c0_41] : memref<64x256xf32, #tpu.memory_space<vmem>>, vector<64x256xf32>
    %cst_42 = arith.constant dense<0.000000e+00> : vector<16x256xf32>
    %115 = tpu.matmul %90, %114, %cst_42 {dimension_numbers = #tpu.dot_dimension_numbers<[1], [0], [0], [1], [0, 0, 1, 1], [], []>} : vector<16x64xf32>, vector<64x256xf32>, vector<16x256xf32> -> vector<16x256xf32>
    %116 = arith.addf %113, %115 : vector<16x256xf32>
    %117 = vector.extract_strided_slice %116 {offsets = [0, 0], sizes = [16, 64], strides = [1, 1]} : vector<16x256xf32> to vector<16x64xf32>
    %118 = arith.negf %117 : vector<16x64xf32>
    %119 = math.exp %118 : vector<16x64xf32>
    %cst_43 = arith.constant 1.000000e+00 : f32
    %120 = vector.broadcast %cst_43 : f32 to vector<16x64xf32>
    %121 = arith.addf %120, %119 : vector<16x64xf32>
    %122 = arith.divf %120, %121 : vector<16x64xf32>
    %123 = vector.extract_strided_slice %116 {offsets = [0, 64], sizes = [16, 64], strides = [1, 1]} : vector<16x256xf32> to vector<16x64xf32>
    %124 = arith.negf %123 : vector<16x64xf32>
    %125 = math.exp %124 : vector<16x64xf32>
    %cst_44 = arith.constant 1.000000e+00 : f32
    %126 = vector.broadcast %cst_44 : f32 to vector<16x64xf32>
    %127 = arith.addf %126, %125 : vector<16x64xf32>
    %128 = arith.divf %126, %127 : vector<16x64xf32>
    %129 = vector.extract_strided_slice %116 {offsets = [0, 128], sizes = [16, 64], strides = [1, 1]} : vector<16x256xf32> to vector<16x64xf32>
    %130 = math.tanh %129 : vector<16x64xf32>
    %131 = vector.extract_strided_slice %116 {offsets = [0, 192], sizes = [16, 64], strides = [1, 1]} : vector<16x256xf32> to vector<16x64xf32>
    %132 = arith.negf %131 : vector<16x64xf32>
    %133 = math.exp %132 : vector<16x64xf32>
    %cst_45 = arith.constant 1.000000e+00 : f32
    %134 = vector.broadcast %cst_45 : f32 to vector<16x64xf32>
    %135 = arith.addf %134, %133 : vector<16x64xf32>
    %136 = arith.divf %134, %135 : vector<16x64xf32>
    %137 = arith.mulf %128, %88 : vector<16x64xf32>
    %138 = arith.mulf %122, %130 : vector<16x64xf32>
    %139 = arith.addf %137, %138 : vector<16x64xf32>
    %140 = math.tanh %139 : vector<16x64xf32>
    %141 = arith.mulf %136, %140 : vector<16x64xf32>
    %c7_i32_46 = arith.constant 7 : i32
    %142 = arith.subi %c7_i32_46, %c2_i32 : i32
    %c16_i32_47 = arith.constant 16 : i32
    %143 = arith.muli %c2_i32, %c16_i32_47 : i32
    %144 = tpu.assume_multiple %143, 16 : i32
    %c16_i32_48 = arith.constant 16 : i32
    %145 = arith.muli %142, %c16_i32_48 : i32
    %146 = tpu.assume_multiple %145, 16 : i32
    %147 = vector.extract_strided_slice %141 {offsets = [0, 0], sizes = [8, 32], strides = [1, 1]} : vector<16x64xf32> to vector<8x32xf32>
    %148 = vector.extract_strided_slice %141 {offsets = [8, 32], sizes = [8, 32], strides = [1, 1]} : vector<16x64xf32> to vector<8x32xf32>
    %149 = arith.index_cast %144 : i32 to index
    %c0_49 = arith.constant 0 : index
    %150 = vector.load %arg10[%149, %c0_49] : memref<128x64xf32, #tpu.memory_space<vmem>>, vector<8x32xf32>
    tpu.vector_store %arg10[%149, %c0_49], %147 {strides = array<i32>} : memref<128x64xf32, #tpu.memory_space<vmem>>, vector<8x32xf32>,
    %c8_i32_50 = arith.constant 8 : i32
    %151 = arith.addi %146, %c8_i32_50 : i32
    %152 = tpu.assume_multiple %151, 8 : i32
    %153 = arith.index_cast %152 : i32 to index
    %c0_51 = arith.constant 0 : index
    %154 = vector.load %arg10[%153, %c0_51] : memref<128x64xf32, #tpu.memory_space<vmem>>, vector<8x32xf32>
    tpu.vector_store %arg10[%153, %c0_51], %147 {strides = array<i32>} : memref<128x64xf32, #tpu.memory_space<vmem>>, vector<8x32xf32>,
    %155 = arith.index_cast %146 : i32 to index
    %c32_52 = arith.constant 32 : index
    %156 = vector.load %arg10[%155, %c32_52] : memref<128x64xf32, #tpu.memory_space<vmem>>, vector<8x32xf32>
    tpu.vector_store %arg10[%155, %c32_52], %148 {strides = array<i32>} : memref<128x64xf32, #tpu.memory_space<vmem>>, vector<8x32xf32>,
    %c8_i32_53 = arith.constant 8 : i32
    %157 = arith.addi %144, %c8_i32_53 : i32
    %158 = tpu.assume_multiple %157, 8 : i32
    %159 = arith.index_cast %158 : i32 to index
    %c32_54 = arith.constant 32 : index
    %160 = vector.load %arg10[%159, %c32_54] : memref<128x64xf32, #tpu.memory_space<vmem>>, vector<8x32xf32>
    tpu.vector_store %arg10[%159, %c32_54], %148 {strides = array<i32>} : memref<128x64xf32, #tpu.memory_space<vmem>>, vector<8x32xf32>,
    %c3_i32 = arith.constant 3 : i32
    %c16_i32_55 = arith.constant 16 : i32
    %161 = arith.muli %c3_i32, %c16_i32_55 : i32
    %162 = tpu.assume_multiple %161, 16 : i32
    %163 = arith.index_cast %162 : i32 to index
    %c0_56 = arith.constant 0 : index
    %164 = vector.load %arg9[%163, %c0_56] : memref<128x256xf32, #tpu.memory_space<vmem>>, vector<16x256xf32>
    %c0_57 = arith.constant 0 : index
    %c0_58 = arith.constant 0 : index
    %165 = vector.load %arg2[%c0_57, %c0_58] : memref<64x256xf32, #tpu.memory_space<vmem>>, vector<64x256xf32>
    %cst_59 = arith.constant dense<0.000000e+00> : vector<16x256xf32>
    %166 = tpu.matmul %141, %165, %cst_59 {dimension_numbers = #tpu.dot_dimension_numbers<[1], [0], [0], [1], [0, 0, 1, 1], [], []>} : vector<16x64xf32>, vector<64x256xf32>, vector<16x256xf32> -> vector<16x256xf32>
    %167 = arith.addf %164, %166 : vector<16x256xf32>
    %168 = vector.extract_strided_slice %167 {offsets = [0, 0], sizes = [16, 64], strides = [1, 1]} : vector<16x256xf32> to vector<16x64xf32>
    %169 = arith.negf %168 : vector<16x64xf32>
    %170 = math.exp %169 : vector<16x64xf32>
    %cst_60 = arith.constant 1.000000e+00 : f32
    %171 = vector.broadcast %cst_60 : f32 to vector<16x64xf32>
    %172 = arith.addf %171, %170 : vector<16x64xf32>
    %173 = arith.divf %171, %172 : vector<16x64xf32>
    %174 = vector.extract_strided_slice %167 {offsets = [0, 64], sizes = [16, 64], strides = [1, 1]} : vector<16x256xf32> to vector<16x64xf32>
    %175 = arith.negf %174 : vector<16x64xf32>
    %176 = math.exp %175 : vector<16x64xf32>
    %cst_61 = arith.constant 1.000000e+00 : f32
    %177 = vector.broadcast %cst_61 : f32 to vector<16x64xf32>
    %178 = arith.addf %177, %176 : vector<16x64xf32>
    %179 = arith.divf %177, %178 : vector<16x64xf32>
    %180 = vector.extract_strided_slice %167 {offsets = [0, 128], sizes = [16, 64], strides = [1, 1]} : vector<16x256xf32> to vector<16x64xf32>
    %181 = math.tanh %180 : vector<16x64xf32>
    %182 = vector.extract_strided_slice %167 {offsets = [0, 192], sizes = [16, 64], strides = [1, 1]} : vector<16x256xf32> to vector<16x64xf32>
    %183 = arith.negf %182 : vector<16x64xf32>
    %184 = math.exp %183 : vector<16x64xf32>
    %cst_62 = arith.constant 1.000000e+00 : f32
    %185 = vector.broadcast %cst_62 : f32 to vector<16x64xf32>
    %186 = arith.addf %185, %184 : vector<16x64xf32>
    %187 = arith.divf %185, %186 : vector<16x64xf32>
    %188 = arith.mulf %179, %139 : vector<16x64xf32>
    %189 = arith.mulf %173, %181 : vector<16x64xf32>
    %190 = arith.addf %188, %189 : vector<16x64xf32>
    %191 = math.tanh %190 : vector<16x64xf32>
    %192 = arith.mulf %187, %191 : vector<16x64xf32>
    %c7_i32_63 = arith.constant 7 : i32
    %193 = arith.subi %c7_i32_63, %c3_i32 : i32
    %c16_i32_64 = arith.constant 16 : i32
    %194 = arith.muli %c3_i32, %c16_i32_64 : i32
    %195 = tpu.assume_multiple %194, 16 : i32
    %c16_i32_65 = arith.constant 16 : i32
    %196 = arith.muli %193, %c16_i32_65 : i32
    %197 = tpu.assume_multiple %196, 16 : i32
    %198 = vector.extract_strided_slice %192 {offsets = [0, 0], sizes = [8, 32], strides = [1, 1]} : vector<16x64xf32> to vector<8x32xf32>
    %199 = vector.extract_strided_slice %192 {offsets = [8, 32], sizes = [8, 32], strides = [1, 1]} : vector<16x64xf32> to vector<8x32xf32>
    %200 = arith.index_cast %195 : i32 to index
    %c0_66 = arith.constant 0 : index
    %201 = vector.load %arg10[%200, %c0_66] : memref<128x64xf32, #tpu.memory_space<vmem>>, vector<8x32xf32>
    tpu.vector_store %arg10[%200, %c0_66], %198 {strides = array<i32>} : memref<128x64xf32, #tpu.memory_space<vmem>>, vector<8x32xf32>,
    %c8_i32_67 = arith.constant 8 : i32
    %202 = arith.addi %197, %c8_i32_67 : i32
    %203 = tpu.assume_multiple %202, 8 : i32
    %204 = arith.index_cast %203 : i32 to index
    %c0_68 = arith.constant 0 : index
    %205 = vector.load %arg10[%204, %c0_68] : memref<128x64xf32, #tpu.memory_space<vmem>>, vector<8x32xf32>
    tpu.vector_store %arg10[%204, %c0_68], %198 {strides = array<i32>} : memref<128x64xf32, #tpu.memory_space<vmem>>, vector<8x32xf32>,
    %206 = arith.index_cast %197 : i32 to index
    %c32_69 = arith.constant 32 : index
    %207 = vector.load %arg10[%206, %c32_69] : memref<128x64xf32, #tpu.memory_space<vmem>>, vector<8x32xf32>
    tpu.vector_store %arg10[%206, %c32_69], %199 {strides = array<i32>} : memref<128x64xf32, #tpu.memory_space<vmem>>, vector<8x32xf32>,
    %c8_i32_70 = arith.constant 8 : i32
    %208 = arith.addi %195, %c8_i32_70 : i32
    %209 = tpu.assume_multiple %208, 8 : i32
    %210 = arith.index_cast %209 : i32 to index
    %c32_71 = arith.constant 32 : index
    %211 = vector.load %arg10[%210, %c32_71] : memref<128x64xf32, #tpu.memory_space<vmem>>, vector<8x32xf32>
    tpu.vector_store %arg10[%210, %c32_71], %199 {strides = array<i32>} : memref<128x64xf32, #tpu.memory_space<vmem>>, vector<8x32xf32>,
    %c4_i32 = arith.constant 4 : i32
    %c16_i32_72 = arith.constant 16 : i32
    %212 = arith.muli %c4_i32, %c16_i32_72 : i32
    %213 = tpu.assume_multiple %212, 16 : i32
    %214 = arith.index_cast %213 : i32 to index
    %c0_73 = arith.constant 0 : index
    %215 = vector.load %arg9[%214, %c0_73] : memref<128x256xf32, #tpu.memory_space<vmem>>, vector<16x256xf32>
    %c0_74 = arith.constant 0 : index
    %c0_75 = arith.constant 0 : index
    %216 = vector.load %arg2[%c0_74, %c0_75] : memref<64x256xf32, #tpu.memory_space<vmem>>, vector<64x256xf32>
    %cst_76 = arith.constant dense<0.000000e+00> : vector<16x256xf32>
    %217 = tpu.matmul %192, %216, %cst_76 {dimension_numbers = #tpu.dot_dimension_numbers<[1], [0], [0], [1], [0, 0, 1, 1], [], []>} : vector<16x64xf32>, vector<64x256xf32>, vector<16x256xf32> -> vector<16x256xf32>
    %218 = arith.addf %215, %217 : vector<16x256xf32>
    %219 = vector.extract_strided_slice %218 {offsets = [0, 0], sizes = [16, 64], strides = [1, 1]} : vector<16x256xf32> to vector<16x64xf32>
    %220 = arith.negf %219 : vector<16x64xf32>
    %221 = math.exp %220 : vector<16x64xf32>
    %cst_77 = arith.constant 1.000000e+00 : f32
    %222 = vector.broadcast %cst_77 : f32 to vector<16x64xf32>
    %223 = arith.addf %222, %221 : vector<16x64xf32>
    %224 = arith.divf %222, %223 : vector<16x64xf32>
    %225 = vector.extract_strided_slice %218 {offsets = [0, 64], sizes = [16, 64], strides = [1, 1]} : vector<16x256xf32> to vector<16x64xf32>
    %226 = arith.negf %225 : vector<16x64xf32>
    %227 = math.exp %226 : vector<16x64xf32>
    %cst_78 = arith.constant 1.000000e+00 : f32
    %228 = vector.broadcast %cst_78 : f32 to vector<16x64xf32>
    %229 = arith.addf %228, %227 : vector<16x64xf32>
    %230 = arith.divf %228, %229 : vector<16x64xf32>
    %231 = vector.extract_strided_slice %218 {offsets = [0, 128], sizes = [16, 64], strides = [1, 1]} : vector<16x256xf32> to vector<16x64xf32>
    %232 = math.tanh %231 : vector<16x64xf32>
    %233 = vector.extract_strided_slice %218 {offsets = [0, 192], sizes = [16, 64], strides = [1, 1]} : vector<16x256xf32> to vector<16x64xf32>
    %234 = arith.negf %233 : vector<16x64xf32>
    %235 = math.exp %234 : vector<16x64xf32>
    %cst_79 = arith.constant 1.000000e+00 : f32
    %236 = vector.broadcast %cst_79 : f32 to vector<16x64xf32>
    %237 = arith.addf %236, %235 : vector<16x64xf32>
    %238 = arith.divf %236, %237 : vector<16x64xf32>
    %239 = arith.mulf %230, %190 : vector<16x64xf32>
    %240 = arith.mulf %224, %232 : vector<16x64xf32>
    %241 = arith.addf %239, %240 : vector<16x64xf32>
    %242 = math.tanh %241 : vector<16x64xf32>
    %243 = arith.mulf %238, %242 : vector<16x64xf32>
    %c7_i32_80 = arith.constant 7 : i32
    %244 = arith.subi %c7_i32_80, %c4_i32 : i32
    %c16_i32_81 = arith.constant 16 : i32
    %245 = arith.muli %c4_i32, %c16_i32_81 : i32
    %246 = tpu.assume_multiple %245, 16 : i32
    %c16_i32_82 = arith.constant 16 : i32
    %247 = arith.muli %244, %c16_i32_82 : i32
    %248 = tpu.assume_multiple %247, 16 : i32
    %249 = vector.extract_strided_slice %243 {offsets = [0, 0], sizes = [8, 32], strides = [1, 1]} : vector<16x64xf32> to vector<8x32xf32>
    %250 = vector.extract_strided_slice %243 {offsets = [8, 32], sizes = [8, 32], strides = [1, 1]} : vector<16x64xf32> to vector<8x32xf32>
    %251 = arith.index_cast %246 : i32 to index
    %c0_83 = arith.constant 0 : index
    %252 = vector.load %arg10[%251, %c0_83] : memref<128x64xf32, #tpu.memory_space<vmem>>, vector<8x32xf32>
    tpu.vector_store %arg10[%251, %c0_83], %249 {strides = array<i32>} : memref<128x64xf32, #tpu.memory_space<vmem>>, vector<8x32xf32>,
    %c8_i32_84 = arith.constant 8 : i32
    %253 = arith.addi %248, %c8_i32_84 : i32
    %254 = tpu.assume_multiple %253, 8 : i32
    %255 = arith.index_cast %254 : i32 to index
    %c0_85 = arith.constant 0 : index
    %256 = vector.load %arg10[%255, %c0_85] : memref<128x64xf32, #tpu.memory_space<vmem>>, vector<8x32xf32>
    tpu.vector_store %arg10[%255, %c0_85], %249 {strides = array<i32>} : memref<128x64xf32, #tpu.memory_space<vmem>>, vector<8x32xf32>,
    %257 = arith.index_cast %248 : i32 to index
    %c32_86 = arith.constant 32 : index
    %258 = vector.load %arg10[%257, %c32_86] : memref<128x64xf32, #tpu.memory_space<vmem>>, vector<8x32xf32>
    tpu.vector_store %arg10[%257, %c32_86], %250 {strides = array<i32>} : memref<128x64xf32, #tpu.memory_space<vmem>>, vector<8x32xf32>,
    %c8_i32_87 = arith.constant 8 : i32
    %259 = arith.addi %246, %c8_i32_87 : i32
    %260 = tpu.assume_multiple %259, 8 : i32
    %261 = arith.index_cast %260 : i32 to index
    %c32_88 = arith.constant 32 : index
    %262 = vector.load %arg10[%261, %c32_88] : memref<128x64xf32, #tpu.memory_space<vmem>>, vector<8x32xf32>
    tpu.vector_store %arg10[%261, %c32_88], %250 {strides = array<i32>} : memref<128x64xf32, #tpu.memory_space<vmem>>, vector<8x32xf32>,
    %c5_i32 = arith.constant 5 : i32
    %c16_i32_89 = arith.constant 16 : i32
    %263 = arith.muli %c5_i32, %c16_i32_89 : i32
    %264 = tpu.assume_multiple %263, 16 : i32
    %265 = arith.index_cast %264 : i32 to index
    %c0_90 = arith.constant 0 : index
    %266 = vector.load %arg9[%265, %c0_90] : memref<128x256xf32, #tpu.memory_space<vmem>>, vector<16x256xf32>
    %c0_91 = arith.constant 0 : index
    %c0_92 = arith.constant 0 : index
    %267 = vector.load %arg2[%c0_91, %c0_92] : memref<64x256xf32, #tpu.memory_space<vmem>>, vector<64x256xf32>
    %cst_93 = arith.constant dense<0.000000e+00> : vector<16x256xf32>
    %268 = tpu.matmul %243, %267, %cst_93 {dimension_numbers = #tpu.dot_dimension_numbers<[1], [0], [0], [1], [0, 0, 1, 1], [], []>} : vector<16x64xf32>, vector<64x256xf32>, vector<16x256xf32> -> vector<16x256xf32>
    %269 = arith.addf %266, %268 : vector<16x256xf32>
    %270 = vector.extract_strided_slice %269 {offsets = [0, 0], sizes = [16, 64], strides = [1, 1]} : vector<16x256xf32> to vector<16x64xf32>
    %271 = arith.negf %270 : vector<16x64xf32>
    %272 = math.exp %271 : vector<16x64xf32>
    %cst_94 = arith.constant 1.000000e+00 : f32
    %273 = vector.broadcast %cst_94 : f32 to vector<16x64xf32>
    %274 = arith.addf %273, %272 : vector<16x64xf32>
    %275 = arith.divf %273, %274 : vector<16x64xf32>
    %276 = vector.extract_strided_slice %269 {offsets = [0, 64], sizes = [16, 64], strides = [1, 1]} : vector<16x256xf32> to vector<16x64xf32>
    %277 = arith.negf %276 : vector<16x64xf32>
    %278 = math.exp %277 : vector<16x64xf32>
    %cst_95 = arith.constant 1.000000e+00 : f32
    %279 = vector.broadcast %cst_95 : f32 to vector<16x64xf32>
    %280 = arith.addf %279, %278 : vector<16x64xf32>
    %281 = arith.divf %279, %280 : vector<16x64xf32>
    %282 = vector.extract_strided_slice %269 {offsets = [0, 128], sizes = [16, 64], strides = [1, 1]} : vector<16x256xf32> to vector<16x64xf32>
    %283 = math.tanh %282 : vector<16x64xf32>
    %284 = vector.extract_strided_slice %269 {offsets = [0, 192], sizes = [16, 64], strides = [1, 1]} : vector<16x256xf32> to vector<16x64xf32>
    %285 = arith.negf %284 : vector<16x64xf32>
    %286 = math.exp %285 : vector<16x64xf32>
    %cst_96 = arith.constant 1.000000e+00 : f32
    %287 = vector.broadcast %cst_96 : f32 to vector<16x64xf32>
    %288 = arith.addf %287, %286 : vector<16x64xf32>
    %289 = arith.divf %287, %288 : vector<16x64xf32>
    %290 = arith.mulf %281, %241 : vector<16x64xf32>
    %291 = arith.mulf %275, %283 : vector<16x64xf32>
    %292 = arith.addf %290, %291 : vector<16x64xf32>
    %293 = math.tanh %292 : vector<16x64xf32>
    %294 = arith.mulf %289, %293 : vector<16x64xf32>
    %c7_i32_97 = arith.constant 7 : i32
    %295 = arith.subi %c7_i32_97, %c5_i32 : i32
    %c16_i32_98 = arith.constant 16 : i32
    %296 = arith.muli %c5_i32, %c16_i32_98 : i32
    %297 = tpu.assume_multiple %296, 16 : i32
    %c16_i32_99 = arith.constant 16 : i32
    %298 = arith.muli %295, %c16_i32_99 : i32
    %299 = tpu.assume_multiple %298, 16 : i32
    %300 = vector.extract_strided_slice %294 {offsets = [0, 0], sizes = [8, 32], strides = [1, 1]} : vector<16x64xf32> to vector<8x32xf32>
    %301 = vector.extract_strided_slice %294 {offsets = [8, 32], sizes = [8, 32], strides = [1, 1]} : vector<16x64xf32> to vector<8x32xf32>
    %302 = arith.index_cast %297 : i32 to index
    %c0_100 = arith.constant 0 : index
    %303 = vector.load %arg10[%302, %c0_100] : memref<128x64xf32, #tpu.memory_space<vmem>>, vector<8x32xf32>
    tpu.vector_store %arg10[%302, %c0_100], %300 {strides = array<i32>} : memref<128x64xf32, #tpu.memory_space<vmem>>, vector<8x32xf32>,
    %c8_i32_101 = arith.constant 8 : i32
    %304 = arith.addi %299, %c8_i32_101 : i32
    %305 = tpu.assume_multiple %304, 8 : i32
    %306 = arith.index_cast %305 : i32 to index
    %c0_102 = arith.constant 0 : index
    %307 = vector.load %arg10[%306, %c0_102] : memref<128x64xf32, #tpu.memory_space<vmem>>, vector<8x32xf32>
    tpu.vector_store %arg10[%306, %c0_102], %300 {strides = array<i32>} : memref<128x64xf32, #tpu.memory_space<vmem>>, vector<8x32xf32>,
    %308 = arith.index_cast %299 : i32 to index
    %c32_103 = arith.constant 32 : index
    %309 = vector.load %arg10[%308, %c32_103] : memref<128x64xf32, #tpu.memory_space<vmem>>, vector<8x32xf32>
    tpu.vector_store %arg10[%308, %c32_103], %301 {strides = array<i32>} : memref<128x64xf32, #tpu.memory_space<vmem>>, vector<8x32xf32>,
    %c8_i32_104 = arith.constant 8 : i32
    %310 = arith.addi %297, %c8_i32_104 : i32
    %311 = tpu.assume_multiple %310, 8 : i32
    %312 = arith.index_cast %311 : i32 to index
    %c32_105 = arith.constant 32 : index
    %313 = vector.load %arg10[%312, %c32_105] : memref<128x64xf32, #tpu.memory_space<vmem>>, vector<8x32xf32>
    tpu.vector_store %arg10[%312, %c32_105], %301 {strides = array<i32>} : memref<128x64xf32, #tpu.memory_space<vmem>>, vector<8x32xf32>,
    %c6_i32 = arith.constant 6 : i32
    %c16_i32_106 = arith.constant 16 : i32
    %314 = arith.muli %c6_i32, %c16_i32_106 : i32
    %315 = tpu.assume_multiple %314, 16 : i32
    %316 = arith.index_cast %315 : i32 to index
    %c0_107 = arith.constant 0 : index
    %317 = vector.load %arg9[%316, %c0_107] : memref<128x256xf32, #tpu.memory_space<vmem>>, vector<16x256xf32>
    %c0_108 = arith.constant 0 : index
    %c0_109 = arith.constant 0 : index
    %318 = vector.load %arg2[%c0_108, %c0_109] : memref<64x256xf32, #tpu.memory_space<vmem>>, vector<64x256xf32>
    %cst_110 = arith.constant dense<0.000000e+00> : vector<16x256xf32>
    %319 = tpu.matmul %294, %318, %cst_110 {dimension_numbers = #tpu.dot_dimension_numbers<[1], [0], [0], [1], [0, 0, 1, 1], [], []>} : vector<16x64xf32>, vector<64x256xf32>, vector<16x256xf32> -> vector<16x256xf32>
    %320 = arith.addf %317, %319 : vector<16x256xf32>
    %321 = vector.extract_strided_slice %320 {offsets = [0, 0], sizes = [16, 64], strides = [1, 1]} : vector<16x256xf32> to vector<16x64xf32>
    %322 = arith.negf %321 : vector<16x64xf32>
    %323 = math.exp %322 : vector<16x64xf32>
    %cst_111 = arith.constant 1.000000e+00 : f32
    %324 = vector.broadcast %cst_111 : f32 to vector<16x64xf32>
    %325 = arith.addf %324, %323 : vector<16x64xf32>
    %326 = arith.divf %324, %325 : vector<16x64xf32>
    %327 = vector.extract_strided_slice %320 {offsets = [0, 64], sizes = [16, 64], strides = [1, 1]} : vector<16x256xf32> to vector<16x64xf32>
    %328 = arith.negf %327 : vector<16x64xf32>
    %329 = math.exp %328 : vector<16x64xf32>
    %cst_112 = arith.constant 1.000000e+00 : f32
    %330 = vector.broadcast %cst_112 : f32 to vector<16x64xf32>
    %331 = arith.addf %330, %329 : vector<16x64xf32>
    %332 = arith.divf %330, %331 : vector<16x64xf32>
    %333 = vector.extract_strided_slice %320 {offsets = [0, 128], sizes = [16, 64], strides = [1, 1]} : vector<16x256xf32> to vector<16x64xf32>
    %334 = math.tanh %333 : vector<16x64xf32>
    %335 = vector.extract_strided_slice %320 {offsets = [0, 192], sizes = [16, 64], strides = [1, 1]} : vector<16x256xf32> to vector<16x64xf32>
    %336 = arith.negf %335 : vector<16x64xf32>
    %337 = math.exp %336 : vector<16x64xf32>
    %cst_113 = arith.constant 1.000000e+00 : f32
    %338 = vector.broadcast %cst_113 : f32 to vector<16x64xf32>
    %339 = arith.addf %338, %337 : vector<16x64xf32>
    %340 = arith.divf %338, %339 : vector<16x64xf32>
    %341 = arith.mulf %332, %292 : vector<16x64xf32>
    %342 = arith.mulf %326, %334 : vector<16x64xf32>
    %343 = arith.addf %341, %342 : vector<16x64xf32>
    %344 = math.tanh %343 : vector<16x64xf32>
    %345 = arith.mulf %340, %344 : vector<16x64xf32>
    %c7_i32_114 = arith.constant 7 : i32
    %346 = arith.subi %c7_i32_114, %c6_i32 : i32
    %c16_i32_115 = arith.constant 16 : i32
    %347 = arith.muli %c6_i32, %c16_i32_115 : i32
    %348 = tpu.assume_multiple %347, 16 : i32
    %c16_i32_116 = arith.constant 16 : i32
    %349 = arith.muli %346, %c16_i32_116 : i32
    %350 = tpu.assume_multiple %349, 16 : i32
    %351 = vector.extract_strided_slice %345 {offsets = [0, 0], sizes = [8, 32], strides = [1, 1]} : vector<16x64xf32> to vector<8x32xf32>
    %352 = vector.extract_strided_slice %345 {offsets = [8, 32], sizes = [8, 32], strides = [1, 1]} : vector<16x64xf32> to vector<8x32xf32>
    %353 = arith.index_cast %348 : i32 to index
    %c0_117 = arith.constant 0 : index
    %354 = vector.load %arg10[%353, %c0_117] : memref<128x64xf32, #tpu.memory_space<vmem>>, vector<8x32xf32>
    tpu.vector_store %arg10[%353, %c0_117], %351 {strides = array<i32>} : memref<128x64xf32, #tpu.memory_space<vmem>>, vector<8x32xf32>,
    %c8_i32_118 = arith.constant 8 : i32
    %355 = arith.addi %350, %c8_i32_118 : i32
    %356 = tpu.assume_multiple %355, 8 : i32
    %357 = arith.index_cast %356 : i32 to index
    %c0_119 = arith.constant 0 : index
    %358 = vector.load %arg10[%357, %c0_119] : memref<128x64xf32, #tpu.memory_space<vmem>>, vector<8x32xf32>
    tpu.vector_store %arg10[%357, %c0_119], %351 {strides = array<i32>} : memref<128x64xf32, #tpu.memory_space<vmem>>, vector<8x32xf32>,
    %359 = arith.index_cast %350 : i32 to index
    %c32_120 = arith.constant 32 : index
    %360 = vector.load %arg10[%359, %c32_120] : memref<128x64xf32, #tpu.memory_space<vmem>>, vector<8x32xf32>
    tpu.vector_store %arg10[%359, %c32_120], %352 {strides = array<i32>} : memref<128x64xf32, #tpu.memory_space<vmem>>, vector<8x32xf32>,
    %c8_i32_121 = arith.constant 8 : i32
    %361 = arith.addi %348, %c8_i32_121 : i32
    %362 = tpu.assume_multiple %361, 8 : i32
    %363 = arith.index_cast %362 : i32 to index
    %c32_122 = arith.constant 32 : index
    %364 = vector.load %arg10[%363, %c32_122] : memref<128x64xf32, #tpu.memory_space<vmem>>, vector<8x32xf32>
    tpu.vector_store %arg10[%363, %c32_122], %352 {strides = array<i32>} : memref<128x64xf32, #tpu.memory_space<vmem>>, vector<8x32xf32>,
    %c7_i32_123 = arith.constant 7 : i32
    %c16_i32_124 = arith.constant 16 : i32
    %365 = arith.muli %c7_i32_123, %c16_i32_124 : i32
    %366 = tpu.assume_multiple %365, 16 : i32
    %367 = arith.index_cast %366 : i32 to index
    %c0_125 = arith.constant 0 : index
    %368 = vector.load %arg9[%367, %c0_125] : memref<128x256xf32, #tpu.memory_space<vmem>>, vector<16x256xf32>
    %c0_126 = arith.constant 0 : index
    %c0_127 = arith.constant 0 : index
    %369 = vector.load %arg2[%c0_126, %c0_127] : memref<64x256xf32, #tpu.memory_space<vmem>>, vector<64x256xf32>
    %cst_128 = arith.constant dense<0.000000e+00> : vector<16x256xf32>
    %370 = tpu.matmul %345, %369, %cst_128 {dimension_numbers = #tpu.dot_dimension_numbers<[1], [0], [0], [1], [0, 0, 1, 1], [], []>} : vector<16x64xf32>, vector<64x256xf32>, vector<16x256xf32> -> vector<16x256xf32>
    %371 = arith.addf %368, %370 : vector<16x256xf32>
    %372 = vector.extract_strided_slice %371 {offsets = [0, 0], sizes = [16, 64], strides = [1, 1]} : vector<16x256xf32> to vector<16x64xf32>
    %373 = arith.negf %372 : vector<16x64xf32>
    %374 = math.exp %373 : vector<16x64xf32>
    %cst_129 = arith.constant 1.000000e+00 : f32
    %375 = vector.broadcast %cst_129 : f32 to vector<16x64xf32>
    %376 = arith.addf %375, %374 : vector<16x64xf32>
    %377 = arith.divf %375, %376 : vector<16x64xf32>
    %378 = vector.extract_strided_slice %371 {offsets = [0, 64], sizes = [16, 64], strides = [1, 1]} : vector<16x256xf32> to vector<16x64xf32>
    %379 = arith.negf %378 : vector<16x64xf32>
    %380 = math.exp %379 : vector<16x64xf32>
    %cst_130 = arith.constant 1.000000e+00 : f32
    %381 = vector.broadcast %cst_130 : f32 to vector<16x64xf32>
    %382 = arith.addf %381, %380 : vector<16x64xf32>
    %383 = arith.divf %381, %382 : vector<16x64xf32>
    %384 = vector.extract_strided_slice %371 {offsets = [0, 128], sizes = [16, 64], strides = [1, 1]} : vector<16x256xf32> to vector<16x64xf32>
    %385 = math.tanh %384 : vector<16x64xf32>
    %386 = vector.extract_strided_slice %371 {offsets = [0, 192], sizes = [16, 64], strides = [1, 1]} : vector<16x256xf32> to vector<16x64xf32>
    %387 = arith.negf %386 : vector<16x64xf32>
    %388 = math.exp %387 : vector<16x64xf32>
    %cst_131 = arith.constant 1.000000e+00 : f32
    %389 = vector.broadcast %cst_131 : f32 to vector<16x64xf32>
    %390 = arith.addf %389, %388 : vector<16x64xf32>
    %391 = arith.divf %389, %390 : vector<16x64xf32>
    %392 = arith.mulf %383, %343 : vector<16x64xf32>
    %393 = arith.mulf %377, %385 : vector<16x64xf32>
    %394 = arith.addf %392, %393 : vector<16x64xf32>
    %395 = math.tanh %394 : vector<16x64xf32>
    %396 = arith.mulf %391, %395 : vector<16x64xf32>
    %c7_i32_132 = arith.constant 7 : i32
    %397 = arith.subi %c7_i32_132, %c7_i32_123 : i32
    %c16_i32_133 = arith.constant 16 : i32
    %398 = arith.muli %c7_i32_123, %c16_i32_133 : i32
    %399 = tpu.assume_multiple %398, 16 : i32
    %c16_i32_134 = arith.constant 16 : i32
    %400 = arith.muli %397, %c16_i32_134 : i32
    %401 = tpu.assume_multiple %400, 16 : i32
    %402 = vector.extract_strided_slice %396 {offsets = [0, 0], sizes = [8, 32], strides = [1, 1]} : vector<16x64xf32> to vector<8x32xf32>
    %403 = vector.extract_strided_slice %396 {offsets = [8, 32], sizes = [8, 32], strides = [1, 1]} : vector<16x64xf32> to vector<8x32xf32>
    %404 = arith.index_cast %399 : i32 to index
    %c0_135 = arith.constant 0 : index
    %405 = vector.load %arg10[%404, %c0_135] : memref<128x64xf32, #tpu.memory_space<vmem>>, vector<8x32xf32>
    tpu.vector_store %arg10[%404, %c0_135], %402 {strides = array<i32>} : memref<128x64xf32, #tpu.memory_space<vmem>>, vector<8x32xf32>,
    %c8_i32_136 = arith.constant 8 : i32
    %406 = arith.addi %401, %c8_i32_136 : i32
    %407 = tpu.assume_multiple %406, 8 : i32
    %408 = arith.index_cast %407 : i32 to index
    %c0_137 = arith.constant 0 : index
    %409 = vector.load %arg10[%408, %c0_137] : memref<128x64xf32, #tpu.memory_space<vmem>>, vector<8x32xf32>
    tpu.vector_store %arg10[%408, %c0_137], %402 {strides = array<i32>} : memref<128x64xf32, #tpu.memory_space<vmem>>, vector<8x32xf32>,
    %410 = arith.index_cast %401 : i32 to index
    %c32_138 = arith.constant 32 : index
    %411 = vector.load %arg10[%410, %c32_138] : memref<128x64xf32, #tpu.memory_space<vmem>>, vector<8x32xf32>
    tpu.vector_store %arg10[%410, %c32_138], %403 {strides = array<i32>} : memref<128x64xf32, #tpu.memory_space<vmem>>, vector<8x32xf32>,
    %c8_i32_139 = arith.constant 8 : i32
    %412 = arith.addi %399, %c8_i32_139 : i32
    %413 = tpu.assume_multiple %412, 8 : i32
    %414 = arith.index_cast %413 : i32 to index
    %c32_140 = arith.constant 32 : index
    %415 = vector.load %arg10[%414, %c32_140] : memref<128x64xf32, #tpu.memory_space<vmem>>, vector<8x32xf32>
    tpu.vector_store %arg10[%414, %c32_140], %403 {strides = array<i32>} : memref<128x64xf32, #tpu.memory_space<vmem>>, vector<8x32xf32>,
    %c8_i32_141 = arith.constant 8 : i32
    %c0_142 = arith.constant 0 : index
    %c0_143 = arith.constant 0 : index
    %416 = vector.load %arg10[%c0_142, %c0_143] : memref<128x64xf32, #tpu.memory_space<vmem>>, vector<128x64xf32>
    %c0_144 = arith.constant 0 : index
    %c0_145 = arith.constant 0 : index
    %417 = vector.load %arg4[%c0_144, %c0_145] : memref<64x256xf32, #tpu.memory_space<vmem>>, vector<64x256xf32>
    %cst_146 = arith.constant dense<0.000000e+00> : vector<128x256xf32>
    %418 = tpu.matmul %416, %417, %cst_146 {dimension_numbers = #tpu.dot_dimension_numbers<[1], [0], [0], [1], [0, 0, 1, 1], [], []>} : vector<128x64xf32>, vector<64x256xf32>, vector<128x256xf32> -> vector<128x256xf32>
    %c0_147 = arith.constant 0 : index
    %c0_148 = arith.constant 0 : index
    %419 = vector.load %arg6[%c0_147, %c0_148] : memref<1x256xf32, #tpu.memory_space<vmem>>, vector<1x256xf32>
    %420 = vector.broadcast %419 : vector<1x256xf32> to vector<128x256xf32>
    %421 = arith.addf %418, %420 : vector<128x256xf32>
    %c0_149 = arith.constant 0 : index
    %c0_150 = arith.constant 0 : index
    %422 = vector.load %arg9[%c0_149, %c0_150] : memref<128x256xf32, #tpu.memory_space<vmem>>, vector<128x256xf32>
    tpu.vector_store %arg9[%c0_149, %c0_150], %421 {strides = array<i32>} : memref<128x256xf32, #tpu.memory_space<vmem>>, vector<128x256xf32>,
    %cst_151 = arith.constant 0.000000e+00 : f32
    %423 = vector.broadcast %cst_151 : f32 to vector<16x64xf32>
    %c0_i32_152 = arith.constant 0 : i32
    %c16_i32_153 = arith.constant 16 : i32
    %424 = arith.muli %c0_i32_152, %c16_i32_153 : i32
    %425 = tpu.assume_multiple %424, 16 : i32
    %426 = arith.index_cast %425 : i32 to index
    %c0_154 = arith.constant 0 : index
    %427 = vector.load %arg9[%426, %c0_154] : memref<128x256xf32, #tpu.memory_space<vmem>>, vector<16x256xf32>
    %c0_155 = arith.constant 0 : index
    %c0_156 = arith.constant 0 : index
    %428 = vector.load %arg5[%c0_155, %c0_156] : memref<64x256xf32, #tpu.memory_space<vmem>>, vector<64x256xf32>
    %cst_157 = arith.constant dense<0.000000e+00> : vector<16x256xf32>
    %429 = tpu.matmul %423, %428, %cst_157 {dimension_numbers = #tpu.dot_dimension_numbers<[1], [0], [0], [1], [0, 0, 1, 1], [], []>} : vector<16x64xf32>, vector<64x256xf32>, vector<16x256xf32> -> vector<16x256xf32>
    %430 = arith.addf %427, %429 : vector<16x256xf32>
    %431 = vector.extract_strided_slice %430 {offsets = [0, 0], sizes = [16, 64], strides = [1, 1]} : vector<16x256xf32> to vector<16x64xf32>
    %432 = arith.negf %431 : vector<16x64xf32>
    %433 = math.exp %432 : vector<16x64xf32>
    %cst_158 = arith.constant 1.000000e+00 : f32
    %434 = vector.broadcast %cst_158 : f32 to vector<16x64xf32>
    %435 = arith.addf %434, %433 : vector<16x64xf32>
    %436 = arith.divf %434, %435 : vector<16x64xf32>
    %437 = vector.extract_strided_slice %430 {offsets = [0, 64], sizes = [16, 64], strides = [1, 1]} : vector<16x256xf32> to vector<16x64xf32>
    %438 = arith.negf %437 : vector<16x64xf32>
    %439 = math.exp %438 : vector<16x64xf32>
    %cst_159 = arith.constant 1.000000e+00 : f32
    %440 = vector.broadcast %cst_159 : f32 to vector<16x64xf32>
    %441 = arith.addf %440, %439 : vector<16x64xf32>
    %442 = arith.divf %440, %441 : vector<16x64xf32>
    %443 = vector.extract_strided_slice %430 {offsets = [0, 128], sizes = [16, 64], strides = [1, 1]} : vector<16x256xf32> to vector<16x64xf32>
    %444 = math.tanh %443 : vector<16x64xf32>
    %445 = vector.extract_strided_slice %430 {offsets = [0, 192], sizes = [16, 64], strides = [1, 1]} : vector<16x256xf32> to vector<16x64xf32>
    %446 = arith.negf %445 : vector<16x64xf32>
    %447 = math.exp %446 : vector<16x64xf32>
    %cst_160 = arith.constant 1.000000e+00 : f32
    %448 = vector.broadcast %cst_160 : f32 to vector<16x64xf32>
    %449 = arith.addf %448, %447 : vector<16x64xf32>
    %450 = arith.divf %448, %449 : vector<16x64xf32>
    %451 = arith.mulf %442, %423 : vector<16x64xf32>
    %452 = arith.mulf %436, %444 : vector<16x64xf32>
    %453 = arith.addf %451, %452 : vector<16x64xf32>
    %454 = math.tanh %453 : vector<16x64xf32>
    %455 = arith.mulf %450, %454 : vector<16x64xf32>
    %c7_i32_161 = arith.constant 7 : i32
    %456 = arith.subi %c7_i32_161, %c0_i32_152 : i32
    %457 = vector.extract_strided_slice %455 {offsets = [0, 0], sizes = [8, 32], strides = [1, 1]} : vector<16x64xf32> to vector<8x32xf32>
    %458 = arith.index_cast %c0_i32_152 : i32 to index
    %c0_162 = arith.constant 0 : index
    %c0_163 = arith.constant 0 : index
    %459 = vector.load %arg8[%458, %c0_162, %c0_163] : memref<8x8x64xf32, #tpu.memory_space<vmem>>, vector<1x8x32xf32>
    %460 = vector.shape_cast %459 : vector<1x8x32xf32> to vector<8x32xf32>
    %461 = vector.shape_cast %457 : vector<8x32xf32> to vector<1x8x32xf32>
    tpu.vector_store %arg8[%458, %c0_162, %c0_163], %461 {strides = array<i32>} : memref<8x8x64xf32, #tpu.memory_space<vmem>>, vector<1x8x32xf32>,
    %462 = vector.extract_strided_slice %455 {offsets = [8, 32], sizes = [8, 32], strides = [1, 1]} : vector<16x64xf32> to vector<8x32xf32>
    %463 = arith.index_cast %456 : i32 to index
    %c0_164 = arith.constant 0 : index
    %c32_165 = arith.constant 32 : index
    %464 = vector.load %arg8[%463, %c0_164, %c32_165] : memref<8x8x64xf32, #tpu.memory_space<vmem>>, vector<1x8x32xf32>
    %465 = vector.shape_cast %464 : vector<1x8x32xf32> to vector<8x32xf32>
    %466 = vector.shape_cast %462 : vector<8x32xf32> to vector<1x8x32xf32>
    tpu.vector_store %arg8[%463, %c0_164, %c32_165], %466 {strides = array<i32>} : memref<8x8x64xf32, #tpu.memory_space<vmem>>, vector<1x8x32xf32>,
    %c1_i32_166 = arith.constant 1 : i32
    %c16_i32_167 = arith.constant 16 : i32
    %467 = arith.muli %c1_i32_166, %c16_i32_167 : i32
    %468 = tpu.assume_multiple %467, 16 : i32
    %469 = arith.index_cast %468 : i32 to index
    %c0_168 = arith.constant 0 : index
    %470 = vector.load %arg9[%469, %c0_168] : memref<128x256xf32, #tpu.memory_space<vmem>>, vector<16x256xf32>
    %c0_169 = arith.constant 0 : index
    %c0_170 = arith.constant 0 : index
    %471 = vector.load %arg5[%c0_169, %c0_170] : memref<64x256xf32, #tpu.memory_space<vmem>>, vector<64x256xf32>
    %cst_171 = arith.constant dense<0.000000e+00> : vector<16x256xf32>
    %472 = tpu.matmul %455, %471, %cst_171 {dimension_numbers = #tpu.dot_dimension_numbers<[1], [0], [0], [1], [0, 0, 1, 1], [], []>} : vector<16x64xf32>, vector<64x256xf32>, vector<16x256xf32> -> vector<16x256xf32>
    %473 = arith.addf %470, %472 : vector<16x256xf32>
    %474 = vector.extract_strided_slice %473 {offsets = [0, 0], sizes = [16, 64], strides = [1, 1]} : vector<16x256xf32> to vector<16x64xf32>
    %475 = arith.negf %474 : vector<16x64xf32>
    %476 = math.exp %475 : vector<16x64xf32>
    %cst_172 = arith.constant 1.000000e+00 : f32
    %477 = vector.broadcast %cst_172 : f32 to vector<16x64xf32>
    %478 = arith.addf %477, %476 : vector<16x64xf32>
    %479 = arith.divf %477, %478 : vector<16x64xf32>
    %480 = vector.extract_strided_slice %473 {offsets = [0, 64], sizes = [16, 64], strides = [1, 1]} : vector<16x256xf32> to vector<16x64xf32>
    %481 = arith.negf %480 : vector<16x64xf32>
    %482 = math.exp %481 : vector<16x64xf32>
    %cst_173 = arith.constant 1.000000e+00 : f32
    %483 = vector.broadcast %cst_173 : f32 to vector<16x64xf32>
    %484 = arith.addf %483, %482 : vector<16x64xf32>
    %485 = arith.divf %483, %484 : vector<16x64xf32>
    %486 = vector.extract_strided_slice %473 {offsets = [0, 128], sizes = [16, 64], strides = [1, 1]} : vector<16x256xf32> to vector<16x64xf32>
    %487 = math.tanh %486 : vector<16x64xf32>
    %488 = vector.extract_strided_slice %473 {offsets = [0, 192], sizes = [16, 64], strides = [1, 1]} : vector<16x256xf32> to vector<16x64xf32>
    %489 = arith.negf %488 : vector<16x64xf32>
    %490 = math.exp %489 : vector<16x64xf32>
    %cst_174 = arith.constant 1.000000e+00 : f32
    %491 = vector.broadcast %cst_174 : f32 to vector<16x64xf32>
    %492 = arith.addf %491, %490 : vector<16x64xf32>
    %493 = arith.divf %491, %492 : vector<16x64xf32>
    %494 = arith.mulf %485, %453 : vector<16x64xf32>
    %495 = arith.mulf %479, %487 : vector<16x64xf32>
    %496 = arith.addf %494, %495 : vector<16x64xf32>
    %497 = math.tanh %496 : vector<16x64xf32>
    %498 = arith.mulf %493, %497 : vector<16x64xf32>
    %c7_i32_175 = arith.constant 7 : i32
    %499 = arith.subi %c7_i32_175, %c1_i32_166 : i32
    %500 = vector.extract_strided_slice %498 {offsets = [0, 0], sizes = [8, 32], strides = [1, 1]} : vector<16x64xf32> to vector<8x32xf32>
    %501 = arith.index_cast %c1_i32_166 : i32 to index
    %c0_176 = arith.constant 0 : index
    %c0_177 = arith.constant 0 : index
    %502 = vector.load %arg8[%501, %c0_176, %c0_177] : memref<8x8x64xf32, #tpu.memory_space<vmem>>, vector<1x8x32xf32>
    %503 = vector.shape_cast %502 : vector<1x8x32xf32> to vector<8x32xf32>
    %504 = vector.shape_cast %500 : vector<8x32xf32> to vector<1x8x32xf32>
    tpu.vector_store %arg8[%501, %c0_176, %c0_177], %504 {strides = array<i32>} : memref<8x8x64xf32, #tpu.memory_space<vmem>>, vector<1x8x32xf32>,
    %505 = vector.extract_strided_slice %498 {offsets = [8, 32], sizes = [8, 32], strides = [1, 1]} : vector<16x64xf32> to vector<8x32xf32>
    %506 = arith.index_cast %499 : i32 to index
    %c0_178 = arith.constant 0 : index
    %c32_179 = arith.constant 32 : index
    %507 = vector.load %arg8[%506, %c0_178, %c32_179] : memref<8x8x64xf32, #tpu.memory_space<vmem>>, vector<1x8x32xf32>
    %508 = vector.shape_cast %507 : vector<1x8x32xf32> to vector<8x32xf32>
    %509 = vector.shape_cast %505 : vector<8x32xf32> to vector<1x8x32xf32>
    tpu.vector_store %arg8[%506, %c0_178, %c32_179], %509 {strides = array<i32>} : memref<8x8x64xf32, #tpu.memory_space<vmem>>, vector<1x8x32xf32>,
    %c2_i32_180 = arith.constant 2 : i32
    %c16_i32_181 = arith.constant 16 : i32
    %510 = arith.muli %c2_i32_180, %c16_i32_181 : i32
    %511 = tpu.assume_multiple %510, 16 : i32
    %512 = arith.index_cast %511 : i32 to index
    %c0_182 = arith.constant 0 : index
    %513 = vector.load %arg9[%512, %c0_182] : memref<128x256xf32, #tpu.memory_space<vmem>>, vector<16x256xf32>
    %c0_183 = arith.constant 0 : index
    %c0_184 = arith.constant 0 : index
    %514 = vector.load %arg5[%c0_183, %c0_184] : memref<64x256xf32, #tpu.memory_space<vmem>>, vector<64x256xf32>
    %cst_185 = arith.constant dense<0.000000e+00> : vector<16x256xf32>
    %515 = tpu.matmul %498, %514, %cst_185 {dimension_numbers = #tpu.dot_dimension_numbers<[1], [0], [0], [1], [0, 0, 1, 1], [], []>} : vector<16x64xf32>, vector<64x256xf32>, vector<16x256xf32> -> vector<16x256xf32>
    %516 = arith.addf %513, %515 : vector<16x256xf32>
    %517 = vector.extract_strided_slice %516 {offsets = [0, 0], sizes = [16, 64], strides = [1, 1]} : vector<16x256xf32> to vector<16x64xf32>
    %518 = arith.negf %517 : vector<16x64xf32>
    %519 = math.exp %518 : vector<16x64xf32>
    %cst_186 = arith.constant 1.000000e+00 : f32
    %520 = vector.broadcast %cst_186 : f32 to vector<16x64xf32>
    %521 = arith.addf %520, %519 : vector<16x64xf32>
    %522 = arith.divf %520, %521 : vector<16x64xf32>
    %523 = vector.extract_strided_slice %516 {offsets = [0, 64], sizes = [16, 64], strides = [1, 1]} : vector<16x256xf32> to vector<16x64xf32>
    %524 = arith.negf %523 : vector<16x64xf32>
    %525 = math.exp %524 : vector<16x64xf32>
    %cst_187 = arith.constant 1.000000e+00 : f32
    %526 = vector.broadcast %cst_187 : f32 to vector<16x64xf32>
    %527 = arith.addf %526, %525 : vector<16x64xf32>
    %528 = arith.divf %526, %527 : vector<16x64xf32>
    %529 = vector.extract_strided_slice %516 {offsets = [0, 128], sizes = [16, 64], strides = [1, 1]} : vector<16x256xf32> to vector<16x64xf32>
    %530 = math.tanh %529 : vector<16x64xf32>
    %531 = vector.extract_strided_slice %516 {offsets = [0, 192], sizes = [16, 64], strides = [1, 1]} : vector<16x256xf32> to vector<16x64xf32>
    %532 = arith.negf %531 : vector<16x64xf32>
    %533 = math.exp %532 : vector<16x64xf32>
    %cst_188 = arith.constant 1.000000e+00 : f32
    %534 = vector.broadcast %cst_188 : f32 to vector<16x64xf32>
    %535 = arith.addf %534, %533 : vector<16x64xf32>
    %536 = arith.divf %534, %535 : vector<16x64xf32>
    %537 = arith.mulf %528, %496 : vector<16x64xf32>
    %538 = arith.mulf %522, %530 : vector<16x64xf32>
    %539 = arith.addf %537, %538 : vector<16x64xf32>
    %540 = math.tanh %539 : vector<16x64xf32>
    %541 = arith.mulf %536, %540 : vector<16x64xf32>
    %c7_i32_189 = arith.constant 7 : i32
    %542 = arith.subi %c7_i32_189, %c2_i32_180 : i32
    %543 = vector.extract_strided_slice %541 {offsets = [0, 0], sizes = [8, 32], strides = [1, 1]} : vector<16x64xf32> to vector<8x32xf32>
    %544 = arith.index_cast %c2_i32_180 : i32 to index
    %c0_190 = arith.constant 0 : index
    %c0_191 = arith.constant 0 : index
    %545 = vector.load %arg8[%544, %c0_190, %c0_191] : memref<8x8x64xf32, #tpu.memory_space<vmem>>, vector<1x8x32xf32>
    %546 = vector.shape_cast %545 : vector<1x8x32xf32> to vector<8x32xf32>
    %547 = vector.shape_cast %543 : vector<8x32xf32> to vector<1x8x32xf32>
    tpu.vector_store %arg8[%544, %c0_190, %c0_191], %547 {strides = array<i32>} : memref<8x8x64xf32, #tpu.memory_space<vmem>>, vector<1x8x32xf32>,
    %548 = vector.extract_strided_slice %541 {offsets = [8, 32], sizes = [8, 32], strides = [1, 1]} : vector<16x64xf32> to vector<8x32xf32>
    %549 = arith.index_cast %542 : i32 to index
    %c0_192 = arith.constant 0 : index
    %c32_193 = arith.constant 32 : index
    %550 = vector.load %arg8[%549, %c0_192, %c32_193] : memref<8x8x64xf32, #tpu.memory_space<vmem>>, vector<1x8x32xf32>
    %551 = vector.shape_cast %550 : vector<1x8x32xf32> to vector<8x32xf32>
    %552 = vector.shape_cast %548 : vector<8x32xf32> to vector<1x8x32xf32>
    tpu.vector_store %arg8[%549, %c0_192, %c32_193], %552 {strides = array<i32>} : memref<8x8x64xf32, #tpu.memory_space<vmem>>, vector<1x8x32xf32>,
    %c3_i32_194 = arith.constant 3 : i32
    %c16_i32_195 = arith.constant 16 : i32
    %553 = arith.muli %c3_i32_194, %c16_i32_195 : i32
    %554 = tpu.assume_multiple %553, 16 : i32
    %555 = arith.index_cast %554 : i32 to index
    %c0_196 = arith.constant 0 : index
    %556 = vector.load %arg9[%555, %c0_196] : memref<128x256xf32, #tpu.memory_space<vmem>>, vector<16x256xf32>
    %c0_197 = arith.constant 0 : index
    %c0_198 = arith.constant 0 : index
    %557 = vector.load %arg5[%c0_197, %c0_198] : memref<64x256xf32, #tpu.memory_space<vmem>>, vector<64x256xf32>
    %cst_199 = arith.constant dense<0.000000e+00> : vector<16x256xf32>
    %558 = tpu.matmul %541, %557, %cst_199 {dimension_numbers = #tpu.dot_dimension_numbers<[1], [0], [0], [1], [0, 0, 1, 1], [], []>} : vector<16x64xf32>, vector<64x256xf32>, vector<16x256xf32> -> vector<16x256xf32>
    %559 = arith.addf %556, %558 : vector<16x256xf32>
    %560 = vector.extract_strided_slice %559 {offsets = [0, 0], sizes = [16, 64], strides = [1, 1]} : vector<16x256xf32> to vector<16x64xf32>
    %561 = arith.negf %560 : vector<16x64xf32>
    %562 = math.exp %561 : vector<16x64xf32>
    %cst_200 = arith.constant 1.000000e+00 : f32
    %563 = vector.broadcast %cst_200 : f32 to vector<16x64xf32>
    %564 = arith.addf %563, %562 : vector<16x64xf32>
    %565 = arith.divf %563, %564 : vector<16x64xf32>
    %566 = vector.extract_strided_slice %559 {offsets = [0, 64], sizes = [16, 64], strides = [1, 1]} : vector<16x256xf32> to vector<16x64xf32>
    %567 = arith.negf %566 : vector<16x64xf32>
    %568 = math.exp %567 : vector<16x64xf32>
    %cst_201 = arith.constant 1.000000e+00 : f32
    %569 = vector.broadcast %cst_201 : f32 to vector<16x64xf32>
    %570 = arith.addf %569, %568 : vector<16x64xf32>
    %571 = arith.divf %569, %570 : vector<16x64xf32>
    %572 = vector.extract_strided_slice %559 {offsets = [0, 128], sizes = [16, 64], strides = [1, 1]} : vector<16x256xf32> to vector<16x64xf32>
    %573 = math.tanh %572 : vector<16x64xf32>
    %574 = vector.extract_strided_slice %559 {offsets = [0, 192], sizes = [16, 64], strides = [1, 1]} : vector<16x256xf32> to vector<16x64xf32>
    %575 = arith.negf %574 : vector<16x64xf32>
    %576 = math.exp %575 : vector<16x64xf32>
    %cst_202 = arith.constant 1.000000e+00 : f32
    %577 = vector.broadcast %cst_202 : f32 to vector<16x64xf32>
    %578 = arith.addf %577, %576 : vector<16x64xf32>
    %579 = arith.divf %577, %578 : vector<16x64xf32>
    %580 = arith.mulf %571, %539 : vector<16x64xf32>
    %581 = arith.mulf %565, %573 : vector<16x64xf32>
    %582 = arith.addf %580, %581 : vector<16x64xf32>
    %583 = math.tanh %582 : vector<16x64xf32>
    %584 = arith.mulf %579, %583 : vector<16x64xf32>
    %c7_i32_203 = arith.constant 7 : i32
    %585 = arith.subi %c7_i32_203, %c3_i32_194 : i32
    %586 = vector.extract_strided_slice %584 {offsets = [0, 0], sizes = [8, 32], strides = [1, 1]} : vector<16x64xf32> to vector<8x32xf32>
    %587 = arith.index_cast %c3_i32_194 : i32 to index
    %c0_204 = arith.constant 0 : index
    %c0_205 = arith.constant 0 : index
    %588 = vector.load %arg8[%587, %c0_204, %c0_205] : memref<8x8x64xf32, #tpu.memory_space<vmem>>, vector<1x8x32xf32>
    %589 = vector.shape_cast %588 : vector<1x8x32xf32> to vector<8x32xf32>
    %590 = vector.shape_cast %586 : vector<8x32xf32> to vector<1x8x32xf32>
    tpu.vector_store %arg8[%587, %c0_204, %c0_205], %590 {strides = array<i32>} : memref<8x8x64xf32, #tpu.memory_space<vmem>>, vector<1x8x32xf32>,
    %591 = vector.extract_strided_slice %584 {offsets = [8, 32], sizes = [8, 32], strides = [1, 1]} : vector<16x64xf32> to vector<8x32xf32>
    %592 = arith.index_cast %585 : i32 to index
    %c0_206 = arith.constant 0 : index
    %c32_207 = arith.constant 32 : index
    %593 = vector.load %arg8[%592, %c0_206, %c32_207] : memref<8x8x64xf32, #tpu.memory_space<vmem>>, vector<1x8x32xf32>
    %594 = vector.shape_cast %593 : vector<1x8x32xf32> to vector<8x32xf32>
    %595 = vector.shape_cast %591 : vector<8x32xf32> to vector<1x8x32xf32>
    tpu.vector_store %arg8[%592, %c0_206, %c32_207], %595 {strides = array<i32>} : memref<8x8x64xf32, #tpu.memory_space<vmem>>, vector<1x8x32xf32>,
    %c4_i32_208 = arith.constant 4 : i32
    %c16_i32_209 = arith.constant 16 : i32
    %596 = arith.muli %c4_i32_208, %c16_i32_209 : i32
    %597 = tpu.assume_multiple %596, 16 : i32
    %598 = arith.index_cast %597 : i32 to index
    %c0_210 = arith.constant 0 : index
    %599 = vector.load %arg9[%598, %c0_210] : memref<128x256xf32, #tpu.memory_space<vmem>>, vector<16x256xf32>
    %c0_211 = arith.constant 0 : index
    %c0_212 = arith.constant 0 : index
    %600 = vector.load %arg5[%c0_211, %c0_212] : memref<64x256xf32, #tpu.memory_space<vmem>>, vector<64x256xf32>
    %cst_213 = arith.constant dense<0.000000e+00> : vector<16x256xf32>
    %601 = tpu.matmul %584, %600, %cst_213 {dimension_numbers = #tpu.dot_dimension_numbers<[1], [0], [0], [1], [0, 0, 1, 1], [], []>} : vector<16x64xf32>, vector<64x256xf32>, vector<16x256xf32> -> vector<16x256xf32>
    %602 = arith.addf %599, %601 : vector<16x256xf32>
    %603 = vector.extract_strided_slice %602 {offsets = [0, 0], sizes = [16, 64], strides = [1, 1]} : vector<16x256xf32> to vector<16x64xf32>
    %604 = arith.negf %603 : vector<16x64xf32>
    %605 = math.exp %604 : vector<16x64xf32>
    %cst_214 = arith.constant 1.000000e+00 : f32
    %606 = vector.broadcast %cst_214 : f32 to vector<16x64xf32>
    %607 = arith.addf %606, %605 : vector<16x64xf32>
    %608 = arith.divf %606, %607 : vector<16x64xf32>
    %609 = vector.extract_strided_slice %602 {offsets = [0, 64], sizes = [16, 64], strides = [1, 1]} : vector<16x256xf32> to vector<16x64xf32>
    %610 = arith.negf %609 : vector<16x64xf32>
    %611 = math.exp %610 : vector<16x64xf32>
    %cst_215 = arith.constant 1.000000e+00 : f32
    %612 = vector.broadcast %cst_215 : f32 to vector<16x64xf32>
    %613 = arith.addf %612, %611 : vector<16x64xf32>
    %614 = arith.divf %612, %613 : vector<16x64xf32>
    %615 = vector.extract_strided_slice %602 {offsets = [0, 128], sizes = [16, 64], strides = [1, 1]} : vector<16x256xf32> to vector<16x64xf32>
    %616 = math.tanh %615 : vector<16x64xf32>
    %617 = vector.extract_strided_slice %602 {offsets = [0, 192], sizes = [16, 64], strides = [1, 1]} : vector<16x256xf32> to vector<16x64xf32>
    %618 = arith.negf %617 : vector<16x64xf32>
    %619 = math.exp %618 : vector<16x64xf32>
    %cst_216 = arith.constant 1.000000e+00 : f32
    %620 = vector.broadcast %cst_216 : f32 to vector<16x64xf32>
    %621 = arith.addf %620, %619 : vector<16x64xf32>
    %622 = arith.divf %620, %621 : vector<16x64xf32>
    %623 = arith.mulf %614, %582 : vector<16x64xf32>
    %624 = arith.mulf %608, %616 : vector<16x64xf32>
    %625 = arith.addf %623, %624 : vector<16x64xf32>
    %626 = math.tanh %625 : vector<16x64xf32>
    %627 = arith.mulf %622, %626 : vector<16x64xf32>
    %c7_i32_217 = arith.constant 7 : i32
    %628 = arith.subi %c7_i32_217, %c4_i32_208 : i32
    %629 = vector.extract_strided_slice %627 {offsets = [0, 0], sizes = [8, 32], strides = [1, 1]} : vector<16x64xf32> to vector<8x32xf32>
    %630 = arith.index_cast %c4_i32_208 : i32 to index
    %c0_218 = arith.constant 0 : index
    %c0_219 = arith.constant 0 : index
    %631 = vector.load %arg8[%630, %c0_218, %c0_219] : memref<8x8x64xf32, #tpu.memory_space<vmem>>, vector<1x8x32xf32>
    %632 = vector.shape_cast %631 : vector<1x8x32xf32> to vector<8x32xf32>
    %633 = vector.shape_cast %629 : vector<8x32xf32> to vector<1x8x32xf32>
    tpu.vector_store %arg8[%630, %c0_218, %c0_219], %633 {strides = array<i32>} : memref<8x8x64xf32, #tpu.memory_space<vmem>>, vector<1x8x32xf32>,
    %634 = vector.extract_strided_slice %627 {offsets = [8, 32], sizes = [8, 32], strides = [1, 1]} : vector<16x64xf32> to vector<8x32xf32>
    %635 = arith.index_cast %628 : i32 to index
    %c0_220 = arith.constant 0 : index
    %c32_221 = arith.constant 32 : index
    %636 = vector.load %arg8[%635, %c0_220, %c32_221] : memref<8x8x64xf32, #tpu.memory_space<vmem>>, vector<1x8x32xf32>
    %637 = vector.shape_cast %636 : vector<1x8x32xf32> to vector<8x32xf32>
    %638 = vector.shape_cast %634 : vector<8x32xf32> to vector<1x8x32xf32>
    tpu.vector_store %arg8[%635, %c0_220, %c32_221], %638 {strides = array<i32>} : memref<8x8x64xf32, #tpu.memory_space<vmem>>, vector<1x8x32xf32>,
    %c5_i32_222 = arith.constant 5 : i32
    %c16_i32_223 = arith.constant 16 : i32
    %639 = arith.muli %c5_i32_222, %c16_i32_223 : i32
    %640 = tpu.assume_multiple %639, 16 : i32
    %641 = arith.index_cast %640 : i32 to index
    %c0_224 = arith.constant 0 : index
    %642 = vector.load %arg9[%641, %c0_224] : memref<128x256xf32, #tpu.memory_space<vmem>>, vector<16x256xf32>
    %c0_225 = arith.constant 0 : index
    %c0_226 = arith.constant 0 : index
    %643 = vector.load %arg5[%c0_225, %c0_226] : memref<64x256xf32, #tpu.memory_space<vmem>>, vector<64x256xf32>
    %cst_227 = arith.constant dense<0.000000e+00> : vector<16x256xf32>
    %644 = tpu.matmul %627, %643, %cst_227 {dimension_numbers = #tpu.dot_dimension_numbers<[1], [0], [0], [1], [0, 0, 1, 1], [], []>} : vector<16x64xf32>, vector<64x256xf32>, vector<16x256xf32> -> vector<16x256xf32>
    %645 = arith.addf %642, %644 : vector<16x256xf32>
    %646 = vector.extract_strided_slice %645 {offsets = [0, 0], sizes = [16, 64], strides = [1, 1]} : vector<16x256xf32> to vector<16x64xf32>
    %647 = arith.negf %646 : vector<16x64xf32>
    %648 = math.exp %647 : vector<16x64xf32>
    %cst_228 = arith.constant 1.000000e+00 : f32
    %649 = vector.broadcast %cst_228 : f32 to vector<16x64xf32>
    %650 = arith.addf %649, %648 : vector<16x64xf32>
    %651 = arith.divf %649, %650 : vector<16x64xf32>
    %652 = vector.extract_strided_slice %645 {offsets = [0, 64], sizes = [16, 64], strides = [1, 1]} : vector<16x256xf32> to vector<16x64xf32>
    %653 = arith.negf %652 : vector<16x64xf32>
    %654 = math.exp %653 : vector<16x64xf32>
    %cst_229 = arith.constant 1.000000e+00 : f32
    %655 = vector.broadcast %cst_229 : f32 to vector<16x64xf32>
    %656 = arith.addf %655, %654 : vector<16x64xf32>
    %657 = arith.divf %655, %656 : vector<16x64xf32>
    %658 = vector.extract_strided_slice %645 {offsets = [0, 128], sizes = [16, 64], strides = [1, 1]} : vector<16x256xf32> to vector<16x64xf32>
    %659 = math.tanh %658 : vector<16x64xf32>
    %660 = vector.extract_strided_slice %645 {offsets = [0, 192], sizes = [16, 64], strides = [1, 1]} : vector<16x256xf32> to vector<16x64xf32>
    %661 = arith.negf %660 : vector<16x64xf32>
    %662 = math.exp %661 : vector<16x64xf32>
    %cst_230 = arith.constant 1.000000e+00 : f32
    %663 = vector.broadcast %cst_230 : f32 to vector<16x64xf32>
    %664 = arith.addf %663, %662 : vector<16x64xf32>
    %665 = arith.divf %663, %664 : vector<16x64xf32>
    %666 = arith.mulf %657, %625 : vector<16x64xf32>
    %667 = arith.mulf %651, %659 : vector<16x64xf32>
    %668 = arith.addf %666, %667 : vector<16x64xf32>
    %669 = math.tanh %668 : vector<16x64xf32>
    %670 = arith.mulf %665, %669 : vector<16x64xf32>
    %c7_i32_231 = arith.constant 7 : i32
    %671 = arith.subi %c7_i32_231, %c5_i32_222 : i32
    %672 = vector.extract_strided_slice %670 {offsets = [0, 0], sizes = [8, 32], strides = [1, 1]} : vector<16x64xf32> to vector<8x32xf32>
    %673 = arith.index_cast %c5_i32_222 : i32 to index
    %c0_232 = arith.constant 0 : index
    %c0_233 = arith.constant 0 : index
    %674 = vector.load %arg8[%673, %c0_232, %c0_233] : memref<8x8x64xf32, #tpu.memory_space<vmem>>, vector<1x8x32xf32>
    %675 = vector.shape_cast %674 : vector<1x8x32xf32> to vector<8x32xf32>
    %676 = vector.shape_cast %672 : vector<8x32xf32> to vector<1x8x32xf32>
    tpu.vector_store %arg8[%673, %c0_232, %c0_233], %676 {strides = array<i32>} : memref<8x8x64xf32, #tpu.memory_space<vmem>>, vector<1x8x32xf32>,
    %677 = vector.extract_strided_slice %670 {offsets = [8, 32], sizes = [8, 32], strides = [1, 1]} : vector<16x64xf32> to vector<8x32xf32>
    %678 = arith.index_cast %671 : i32 to index
    %c0_234 = arith.constant 0 : index
    %c32_235 = arith.constant 32 : index
    %679 = vector.load %arg8[%678, %c0_234, %c32_235] : memref<8x8x64xf32, #tpu.memory_space<vmem>>, vector<1x8x32xf32>
    %680 = vector.shape_cast %679 : vector<1x8x32xf32> to vector<8x32xf32>
    %681 = vector.shape_cast %677 : vector<8x32xf32> to vector<1x8x32xf32>
    tpu.vector_store %arg8[%678, %c0_234, %c32_235], %681 {strides = array<i32>} : memref<8x8x64xf32, #tpu.memory_space<vmem>>, vector<1x8x32xf32>,
    %c6_i32_236 = arith.constant 6 : i32
    %c16_i32_237 = arith.constant 16 : i32
    %682 = arith.muli %c6_i32_236, %c16_i32_237 : i32
    %683 = tpu.assume_multiple %682, 16 : i32
    %684 = arith.index_cast %683 : i32 to index
    %c0_238 = arith.constant 0 : index
    %685 = vector.load %arg9[%684, %c0_238] : memref<128x256xf32, #tpu.memory_space<vmem>>, vector<16x256xf32>
    %c0_239 = arith.constant 0 : index
    %c0_240 = arith.constant 0 : index
    %686 = vector.load %arg5[%c0_239, %c0_240] : memref<64x256xf32, #tpu.memory_space<vmem>>, vector<64x256xf32>
    %cst_241 = arith.constant dense<0.000000e+00> : vector<16x256xf32>
    %687 = tpu.matmul %670, %686, %cst_241 {dimension_numbers = #tpu.dot_dimension_numbers<[1], [0], [0], [1], [0, 0, 1, 1], [], []>} : vector<16x64xf32>, vector<64x256xf32>, vector<16x256xf32> -> vector<16x256xf32>
    %688 = arith.addf %685, %687 : vector<16x256xf32>
    %689 = vector.extract_strided_slice %688 {offsets = [0, 0], sizes = [16, 64], strides = [1, 1]} : vector<16x256xf32> to vector<16x64xf32>
    %690 = arith.negf %689 : vector<16x64xf32>
    %691 = math.exp %690 : vector<16x64xf32>
    %cst_242 = arith.constant 1.000000e+00 : f32
    %692 = vector.broadcast %cst_242 : f32 to vector<16x64xf32>
    %693 = arith.addf %692, %691 : vector<16x64xf32>
    %694 = arith.divf %692, %693 : vector<16x64xf32>
    %695 = vector.extract_strided_slice %688 {offsets = [0, 64], sizes = [16, 64], strides = [1, 1]} : vector<16x256xf32> to vector<16x64xf32>
    %696 = arith.negf %695 : vector<16x64xf32>
    %697 = math.exp %696 : vector<16x64xf32>
    %cst_243 = arith.constant 1.000000e+00 : f32
    %698 = vector.broadcast %cst_243 : f32 to vector<16x64xf32>
    %699 = arith.addf %698, %697 : vector<16x64xf32>
    %700 = arith.divf %698, %699 : vector<16x64xf32>
    %701 = vector.extract_strided_slice %688 {offsets = [0, 128], sizes = [16, 64], strides = [1, 1]} : vector<16x256xf32> to vector<16x64xf32>
    %702 = math.tanh %701 : vector<16x64xf32>
    %703 = vector.extract_strided_slice %688 {offsets = [0, 192], sizes = [16, 64], strides = [1, 1]} : vector<16x256xf32> to vector<16x64xf32>
    %704 = arith.negf %703 : vector<16x64xf32>
    %705 = math.exp %704 : vector<16x64xf32>
    %cst_244 = arith.constant 1.000000e+00 : f32
    %706 = vector.broadcast %cst_244 : f32 to vector<16x64xf32>
    %707 = arith.addf %706, %705 : vector<16x64xf32>
    %708 = arith.divf %706, %707 : vector<16x64xf32>
    %709 = arith.mulf %700, %668 : vector<16x64xf32>
    %710 = arith.mulf %694, %702 : vector<16x64xf32>
    %711 = arith.addf %709, %710 : vector<16x64xf32>
    %712 = math.tanh %711 : vector<16x64xf32>
    %713 = arith.mulf %708, %712 : vector<16x64xf32>
    %c7_i32_245 = arith.constant 7 : i32
    %714 = arith.subi %c7_i32_245, %c6_i32_236 : i32
    %715 = vector.extract_strided_slice %713 {offsets = [0, 0], sizes = [8, 32], strides = [1, 1]} : vector<16x64xf32> to vector<8x32xf32>
    %716 = arith.index_cast %c6_i32_236 : i32 to index
    %c0_246 = arith.constant 0 : index
    %c0_247 = arith.constant 0 : index
    %717 = vector.load %arg8[%716, %c0_246, %c0_247] : memref<8x8x64xf32, #tpu.memory_space<vmem>>, vector<1x8x32xf32>
    %718 = vector.shape_cast %717 : vector<1x8x32xf32> to vector<8x32xf32>
    %719 = vector.shape_cast %715 : vector<8x32xf32> to vector<1x8x32xf32>
    tpu.vector_store %arg8[%716, %c0_246, %c0_247], %719 {strides = array<i32>} : memref<8x8x64xf32, #tpu.memory_space<vmem>>, vector<1x8x32xf32>,
    %720 = vector.extract_strided_slice %713 {offsets = [8, 32], sizes = [8, 32], strides = [1, 1]} : vector<16x64xf32> to vector<8x32xf32>
    %721 = arith.index_cast %714 : i32 to index
    %c0_248 = arith.constant 0 : index
    %c32_249 = arith.constant 32 : index
    %722 = vector.load %arg8[%721, %c0_248, %c32_249] : memref<8x8x64xf32, #tpu.memory_space<vmem>>, vector<1x8x32xf32>
    %723 = vector.shape_cast %722 : vector<1x8x32xf32> to vector<8x32xf32>
    %724 = vector.shape_cast %720 : vector<8x32xf32> to vector<1x8x32xf32>
    tpu.vector_store %arg8[%721, %c0_248, %c32_249], %724 {strides = array<i32>} : memref<8x8x64xf32, #tpu.memory_space<vmem>>, vector<1x8x32xf32>,
    %c7_i32_250 = arith.constant 7 : i32
    %c16_i32_251 = arith.constant 16 : i32
    %725 = arith.muli %c7_i32_250, %c16_i32_251 : i32
    %726 = tpu.assume_multiple %725, 16 : i32
    %727 = arith.index_cast %726 : i32 to index
    %c0_252 = arith.constant 0 : index
    %728 = vector.load %arg9[%727, %c0_252] : memref<128x256xf32, #tpu.memory_space<vmem>>, vector<16x256xf32>
    %c0_253 = arith.constant 0 : index
    %c0_254 = arith.constant 0 : index
    %729 = vector.load %arg5[%c0_253, %c0_254] : memref<64x256xf32, #tpu.memory_space<vmem>>, vector<64x256xf32>
    %cst_255 = arith.constant dense<0.000000e+00> : vector<16x256xf32>
    %730 = tpu.matmul %713, %729, %cst_255 {dimension_numbers = #tpu.dot_dimension_numbers<[1], [0], [0], [1], [0, 0, 1, 1], [], []>} : vector<16x64xf32>, vector<64x256xf32>, vector<16x256xf32> -> vector<16x256xf32>
    %731 = arith.addf %728, %730 : vector<16x256xf32>
    %732 = vector.extract_strided_slice %731 {offsets = [0, 0], sizes = [16, 64], strides = [1, 1]} : vector<16x256xf32> to vector<16x64xf32>
    %733 = arith.negf %732 : vector<16x64xf32>
    %734 = math.exp %733 : vector<16x64xf32>
    %cst_256 = arith.constant 1.000000e+00 : f32
    %735 = vector.broadcast %cst_256 : f32 to vector<16x64xf32>
    %736 = arith.addf %735, %734 : vector<16x64xf32>
    %737 = arith.divf %735, %736 : vector<16x64xf32>
    %738 = vector.extract_strided_slice %731 {offsets = [0, 64], sizes = [16, 64], strides = [1, 1]} : vector<16x256xf32> to vector<16x64xf32>
    %739 = arith.negf %738 : vector<16x64xf32>
    %740 = math.exp %739 : vector<16x64xf32>
    %cst_257 = arith.constant 1.000000e+00 : f32
    %741 = vector.broadcast %cst_257 : f32 to vector<16x64xf32>
    %742 = arith.addf %741, %740 : vector<16x64xf32>
    %743 = arith.divf %741, %742 : vector<16x64xf32>
    %744 = vector.extract_strided_slice %731 {offsets = [0, 128], sizes = [16, 64], strides = [1, 1]} : vector<16x256xf32> to vector<16x64xf32>
    %745 = math.tanh %744 : vector<16x64xf32>
    %746 = vector.extract_strided_slice %731 {offsets = [0, 192], sizes = [16, 64], strides = [1, 1]} : vector<16x256xf32> to vector<16x64xf32>
    %747 = arith.negf %746 : vector<16x64xf32>
    %748 = math.exp %747 : vector<16x64xf32>
    %cst_258 = arith.constant 1.000000e+00 : f32
    %749 = vector.broadcast %cst_258 : f32 to vector<16x64xf32>
    %750 = arith.addf %749, %748 : vector<16x64xf32>
    %751 = arith.divf %749, %750 : vector<16x64xf32>
    %752 = arith.mulf %743, %711 : vector<16x64xf32>
    %753 = arith.mulf %737, %745 : vector<16x64xf32>
    %754 = arith.addf %752, %753 : vector<16x64xf32>
    %755 = math.tanh %754 : vector<16x64xf32>
    %756 = arith.mulf %751, %755 : vector<16x64xf32>
    %c7_i32_259 = arith.constant 7 : i32
    %757 = arith.subi %c7_i32_259, %c7_i32_250 : i32
    %758 = vector.extract_strided_slice %756 {offsets = [0, 0], sizes = [8, 32], strides = [1, 1]} : vector<16x64xf32> to vector<8x32xf32>
    %759 = arith.index_cast %c7_i32_250 : i32 to index
    %c0_260 = arith.constant 0 : index
    %c0_261 = arith.constant 0 : index
    %760 = vector.load %arg8[%759, %c0_260, %c0_261] : memref<8x8x64xf32, #tpu.memory_space<vmem>>, vector<1x8x32xf32>
    %761 = vector.shape_cast %760 : vector<1x8x32xf32> to vector<8x32xf32>
    %762 = vector.shape_cast %758 : vector<8x32xf32> to vector<1x8x32xf32>
    tpu.vector_store %arg8[%759, %c0_260, %c0_261], %762 {strides = array<i32>} : memref<8x8x64xf32, #tpu.memory_space<vmem>>, vector<1x8x32xf32>,
    %763 = vector.extract_strided_slice %756 {offsets = [8, 32], sizes = [8, 32], strides = [1, 1]} : vector<16x64xf32> to vector<8x32xf32>
    %764 = arith.index_cast %757 : i32 to index
    %c0_262 = arith.constant 0 : index
    %c32_263 = arith.constant 32 : index
    %765 = vector.load %arg8[%764, %c0_262, %c32_263] : memref<8x8x64xf32, #tpu.memory_space<vmem>>, vector<1x8x32xf32>
    %766 = vector.shape_cast %765 : vector<1x8x32xf32> to vector<8x32xf32>
    %767 = vector.shape_cast %763 : vector<8x32xf32> to vector<1x8x32xf32>
    tpu.vector_store %arg8[%764, %c0_262, %c32_263], %767 {strides = array<i32>} : memref<8x8x64xf32, #tpu.memory_space<vmem>>, vector<1x8x32xf32>,
    %c8_i32_264 = arith.constant 8 : i32
    %c0_265 = arith.constant 0 : index
    %c0_266 = arith.constant 0 : index
    %c0_267 = arith.constant 0 : index
    %768 = vector.load %arg8[%c0_265, %c0_266, %c0_267] : memref<8x8x64xf32, #tpu.memory_space<vmem>>, vector<8x8x64xf32>
    %c0_268 = arith.constant 0 : index
    %c0_269 = arith.constant 0 : index
    %c0_270 = arith.constant 0 : index
    %769 = vector.load %arg7[%c0_268, %c0_269, %c0_270] : memref<8x8x1xf32, #tpu.memory_space<vmem>>, vector<8x8x1xf32>
    %770 = vector.broadcast %769 : vector<8x8x1xf32> to vector<8x8x64xf32>
    %771 = arith.mulf %768, %770 : vector<8x8x64xf32>
    %c0_271 = arith.constant 0 : index
    %c0_272 = arith.constant 0 : index
    %c0_273 = arith.constant 0 : index
    %772 = vector.load %arg8[%c0_271, %c0_272, %c0_273] : memref<8x8x64xf32, #tpu.memory_space<vmem>>, vector<8x8x64xf32>
    tpu.vector_store %arg8[%c0_271, %c0_272, %c0_273], %771 {strides = array<i32>} : memref<8x8x64xf32, #tpu.memory_space<vmem>>, vector<8x8x64xf32>,
    return
  }
}

</mosaic_0001>

<bundles_post_ra>
// kernel: sent_encoder_forward.1
= control target key start
LH: loop header
LB: loop body
LE: loop exit
PB: predicated region body
PF: predicated region fallthrough
CT: control target
= control target key end

     0   :  { %vm59_vm0 = vcmask 261120   ;;  %v4144_v26 = vmov 0.0   ;;  %s5476_s2 = inlined_call_operand.vmem [shape: f32[64,256], index: 2, kind: input, shape index: {}]   ;;  %s5477_s1 = inlined_call_operand.vmem [shape: f32[32,256], index: 1, kind: input, shape index: {}]   ;;  %s5478_s0 = inlined_call_operand.vmem [shape: f32[128,32], index: 0, kind: input, shape index: {}]   ;;  %s5479_s3 = inlined_call_operand.vmem [shape: f32[1,256], index: 3, kind: input, shape index: {}]   ;;  %s5480_s4 = inlined_call_operand.vmem [shape: f32[64,256], index: 4, kind: input, shape index: {}]   ;;  %s5481_s5 = inlined_call_operand.vmem [shape: f32[64,256], index: 5, kind: input, shape index: {}]   ;;  %s5482_s6 = inlined_call_operand.vmem [shape: f32[1,256], index: 6, kind: input, shape index: {}]   ;;  %s5483_s8 = inlined_call_operand.vmem [shape: f32[8,8,64], index: 8, kind: output, shape index: {}]   ;;  %s5484_s7 = inlined_call_operand.vmem [shape: f32[8,8,1], index: 7, kind: input, shape index: {}]  }
   0x1   :  { %v4195_v0 = vld [vmem:[%s5476_s2 + $0x70] sm:$0xff]  ;;  %v4200_v1 = vld [vmem:[%s5476_s2 + $0x60] sm:$0xff]  ;;  %v4206_v2 = vld [vmem:[%s5476_s2 + $0x78] sm:$0xff] }
   0x2   :  { %305 = vmatpush.msra.mxu2 %v4195_v0  ;;  %v4211_v3 = vld [vmem:[%s5476_s2 + $0x50] sm:$0xff]  ;;  %328 = vmatpush.msra.mxu3 %v4206_v2  ;;  %v4217_v4 = vld [vmem:[%s5476_s2 + $0x68] sm:$0xff]  ;;  %v4226_v6 = vld [vmem:[%s5476_s2 + $0x58] sm:$0xff] }
   0x3   :  { %v51_v5 = vld [vmem:[%s5477_s1 + $0x30] sm:$0xff]  ;;  %v49_v7 = vld [vmem:[%s5477_s1 + $0x20] sm:$0xff]  ;;  %v4244_v10 = vld [vmem:[%s5476_s2 + $0x48] sm:$0xff] }
   0x4   :  { %306 = vmatpush.msra.mxu2 %v4200_v1  ;;  %120 = vmatpush.msra.mxu0 %v51_v5  ;;  %v4234_v8 = vld [vmem:[%s5476_s2 + $0x40] sm:$0xff]  ;;  %v47_v9 = vld [vmem:[%s5477_s1 + $0x10] sm:$0xff]  ;;  %v52_v13 = vld [vmem:[%s5477_s1 + $0x38] sm:$0xff] }
   0x5   :  { %329 = vmatpush.msra.mxu3 %v4217_v4  ;;  %v4249_v11 = vld [vmem:[%s5476_s2 + $0x30] sm:$0xff]  ;;  %v45_v12 = vld [vmem:[%s5477_s1] sm:$0xff]  ;;  %v4262_v14 = vld [vmem:[%s5476_s2 + $0x38] sm:$0xff]  ;;  %185 = vmatpush.msra.mxu1 %v52_v13 }
   0x6   :  { %307 = vmatpush.msra.mxu2 %v4211_v3  ;;  %121 = vmatpush.msra.mxu0 %v49_v7  ;;  %v29_v15 = vld [vmem:[%s5478_s0] sm:$0xff]  ;;  %v50_v17 = vld [vmem:[%s5477_s1 + $0x28] sm:$0xff]  ;;  %v4285_v19 = vld [vmem:[%s5476_s2 + $0x10] sm:$0xff] }
   0x7   :  { %330 = vmatpush.msra.mxu3 %v4226_v6  ;;  %v4270_v16 = vld [vmem:[%s5476_s2 + $0x20] sm:$0xff]  ;;  %v4280_v18 = vld [vmem:[%s5476_s2 + $0x28] sm:$0xff]  ;;  %v48_v20 = vld [vmem:[%s5477_s1 + $0x18] sm:$0xff]  ;;  %186 = vmatpush.msra.mxu1 %v50_v17 }
   0x8   :  { %308 = vmatpush.msra.mxu2 %v4234_v8  ;;  %122 = vmatpush.msra.mxu0 %v47_v9  ;;  %v4296_v21 = vld [vmem:[%s5476_s2 + $0x18] sm:$0xff]  ;;  %v4301_v22 = vld [vmem:[%s5476_s2] sm:$0xff]  ;;  %v46_v23 = vld [vmem:[%s5477_s1 + $0x8] sm:$0xff] }
   0x9   :  { %331 = vmatpush.msra.mxu3 %v4244_v10  ;;  %v4311_v24 = vld [vmem:[%s5476_s2 + $0x8] sm:$0xff]  ;;  %187 = vmatpush.msra.mxu1 %v48_v20  ;;  %v53_v27 = vld [vmem:[%s5479_s3] sm:$0x3]  ;;  %s4145_s3 = smov 64  }
   0xa   :  { %309 = vmatpush.msra.mxu2 %v4249_v11  ;;  %123 = vmatpush.msra.mxu0 %v45_v12  ;;  %v30_v25 = vld [vmem:[%s5478_s0 + $0x8] sm:$0xff]  ;;  %v4361_v29 = vperm.slane %v53_v27, 0  ;;  %v4365_v39 = vperm.slane %v53_v27, 1 }
   0xb   :  { %332 = vmatpush.msra.mxu3 %v4262_v14  ;;  %3556 = vmatmul.msk.f32.vlgmr.msra.gmra.mxu0 %vm59_vm0, %v29_v15 }
   0xc   :  { %310 = vmatpush.msra.mxu2 %v4270_v16  ;;  %188 = vmatpush.msra.mxu1 %v46_v23 }
   0xd   :  { %333 = vmatpush.msra.mxu3 %v4280_v18  ;;  %3572 = vmatmul.msk.f32.vlgmr.msra.gmra.mxu1 %vm59_vm0, %v29_v15 }
   0xe   :  { %311 = vmatpush.msra.mxu2 %v4285_v19 }
   0xf   :  { %334 = vmatpush.msra.mxu3 %v4296_v21 }
  0x10   :  { %312 = vmatpush.msra.mxu2 %v4301_v22 }
  0x11   :  { %313 = vmatmul.f32.vlgmr.msra.gmra.mxu2 %v4144_v26  ;;  %335 = vmatpush.msra.mxu3 %v4311_v24 }
  0x12   :  { %336 = vmatmul.f32.vlgmr.msra.gmra.mxu3 %v4144_v26  ;;  %496 = vmatpush.msrb.mxu2 %v4195_v0 }
  0x13   :  { %3557 = vmatmul.msk.f32.gmra.mxu0 %vm59_vm0, %v30_v25  ;;  %519 = vmatpush.msrb.mxu3 %v4206_v2 }
  0x14   :  { %497 = vmatpush.msrb.mxu2 %v4200_v1 }
  0x15   :  { %520 = vmatpush.msrb.mxu3 %v4217_v4  ;;  %3573 = vmatmul.msk.f32.gmra.mxu1 %vm59_vm0, %v30_v25 }
  0x16   :  { %498 = vmatpush.msrb.mxu2 %v4211_v3 }
  0x17   :  { %521 = vmatpush.msrb.mxu3 %v4226_v6 }
  0x18   :  { %499 = vmatpush.msrb.mxu2 %v4234_v8 }
  0x19   :  { %316 = vmatmul.f32.gmra.mxu2 %v4144_v26  ;;  %522 = vmatpush.msrb.mxu3 %v4244_v10 }
  0x1a   :  { %339 = vmatmul.f32.gmra.mxu3 %v4144_v26  ;;  %500 = vmatpush.msrb.mxu2 %v4249_v11 }
  0x1b   :  { %523 = vmatpush.msrb.mxu3 %v4262_v14 }
  0x1c   :  { %501 = vmatpush.msrb.mxu2 %v4270_v16 }
  0x1d   :  { %524 = vmatpush.msrb.mxu3 %v4280_v18 }
  0x1e   :  { %502 = vmatpush.msrb.mxu2 %v4285_v19 }
  0x1f   :  { %525 = vmatpush.msrb.mxu3 %v4296_v21 }
  0x20   :  { %503 = vmatpush.msrb.mxu2 %v4301_v22 }
  0x21   :  { %526 = vmatpush.msrb.mxu3 %v4311_v24 }
  0x22   :  { %687 = vmatpush.msra.mxu2 %v4195_v0 }
  0x23   :  { %710 = vmatpush.msra.mxu3 %v4206_v2 }
  0x24   :  { %688 = vmatpush.msra.mxu2 %v4200_v1 }
  0x25   :  { %711 = vmatpush.msra.mxu3 %v4217_v4 }
  0x26   :  { %689 = vmatpush.msra.mxu2 %v4211_v3 }
  0x27   :  { %712 = vmatpush.msra.mxu3 %v4226_v6 }
  0x28   :  { %690 = vmatpush.msra.mxu2 %v4234_v8 }
  0x29   :  { %713 = vmatpush.msra.mxu3 %v4244_v10 }
  0x2a   :  { %691 = vmatpush.msra.mxu2 %v4249_v11 }
  0x2b   :  { %714 = vmatpush.msra.mxu3 %v4262_v14 }
  0x2c   :  { %692 = vmatpush.msra.mxu2 %v4270_v16 }
  0x2d   :  { %715 = vmatpush.msra.mxu3 %v4280_v18 }
  0x2e   :  { %693 = vmatpush.msra.mxu2 %v4285_v19 }
  0x2f   :  { %716 = vmatpush.msra.mxu3 %v4296_v21 }
  0x30   :  { %694 = vmatpush.msra.mxu2 %v4301_v22 }
  0x31   :  { %717 = vmatpush.msra.mxu3 %v4311_v24 }
  0x88   :  { %v125_v28 = vpop.f32.mrf.mxu0 }
  0x89   :  { %v126_v30 = vadd.f32 %v125_v28, %v4361_v29 }
  0x8a   :  { %v190_v40 = vpop.f32.mrf.mxu1 }
  0x8b   :  { %v191_v43 = vadd.f32 %v190_v40, %v4365_v39 }
  0x90   :  { %v128_v33 = vpop.f32.mrf.mxu0 }
  0x91   :  { %v129_v35 = vadd.f32 %v128_v33, %v4361_v29 }
  0x92   :  { %v193_v49 = vpop.f32.mrf.mxu1 }
  0x93   :  { %v194_v52 = vadd.f32 %v193_v49, %v4365_v39 }
  0x94   :  { %v314_v31 = vpop.f32.mrf.mxu2 }
  0x95   :  { %v343_v32 = vadd.f32 %v314_v31, %v126_v30  ;;  %v337_v44 = vpop.f32.mrf.mxu3 }
  0x96   :  { %v344_v46 = vadd.f32 %v337_v44, %v191_v43 }
  0x97   :  { %v3588_v34 = vmul.f32 -1.442695, %v343_v32 }
  0x98   :  { %v3590_v30 = vmul.f32 -1.442695, %v344_v46 }
  0x99   :  { %3760 = vpow2.f32 %v3588_v34 }
  0x9c   :  { %v317_v36 = vpop.f32.mrf.mxu2 }
  0x9d   :  { %v345_v37 = vadd.f32 %v317_v36, %v129_v35  ;;  %v340_v54 = vpop.f32.mrf.mxu3 }
  0x9e   :  { %v346_v60 = vadd.f32 %v340_v54, %v194_v52 }
  0x9f   :  { %v3761_v38 = vpop.eup %3760  ;;  %v3589_v41 = vmul.f32 -1.442695, %v345_v37 }
  0xa0   :  { %v353_v42 = vadd.f32 1.0, %v3761_v38  ;;  %v3591_v31 = vmul.f32 -1.442695, %v346_v60 }
  0xa1   :  { %3762 = vpow2.f32 %v3589_v41 }
  0xa2   :  { %3764 = vrcp.f32 %v353_v42  ;;  %v366_v53 = vand.u32 2147483648, %v353_v42  ;;  %v364_v56 = vand.u32 2147483647, %v353_v42  ;;  %vm360_vm2 = vweird.f32 %v353_v42 }
  0xa3   :  { %3766 = vtanh.f32 %v344_v46 }
  0xa4   :  { %v367_v61 = vor.u32 1.1754944e-38, %v366_v53  ;;  %vm365_vm4 = vcmp.eq.f32.partialorder %v364_v56, 8.507059e+37 }
  0xa7   :  { %v3763_v45 = vpop.eup %3762 }
  0xa8   :  { %v3765_v47 = vpop.eup %3764  ;;  %v354_v48 = vadd.f32 1.0, %v3763_v45 }
  0xa9   :  { %v356_v50 = vmul.f32 %v3765_v47, %v353_v42  ;;  %vm361_vm1 = vweird.f32 %v3765_v47  ;;  %v3767_v57 = vpop.eup %3766 }
  0xaa   :  { %3768 = vrcp.f32 %v354_v48  ;;  %vm362_vm3 = vmor %vm360_vm2, %vm361_vm1  ;;  %v381_v12 = vand.u32 2147483648, %v354_v48  ;;  %v379_v15 = vand.u32 2147483647, %v354_v48  ;;  %vm375_vm6 = vweird.f32 %v354_v48 }
  0xab   :  { %v357_v51 = vsub.f32 1.0, %v356_v50  ;;  %3770 = vtanh.f32 %v346_v60  ;;  %vm293_vm2 = vcmask 523264  }
  0xac   :  { %v382_v23 = vor.u32 1.1754944e-38, %v381_v12  ;;  %vm380_vm8 = vcmp.eq.f32.partialorder %v379_v15, 8.507059e+37  ;;  %3772 = vpow2.f32 %v3590_v30  ;;  %v31_v12 = vld [vmem:[%s5478_s0 + $0x10] sm:$0xff] }
  0xad   :  { %v358_v55 = vmul.f32 %v3765_v47, %v357_v51  ;;  %3774 = vpow2.f32 %v3591_v31  ;;  %3558 = vmatmul.msk.f32.gmra.mxu0 %vm59_vm0, %v31_v12  ;;  %3574 = vmatmul.msk.f32.gmra.mxu1 %vm59_vm0, %v31_v12 }
  0xaf   :  { %v359_v58 = vadd.f32 %v3765_v47, %v358_v55 }
  0xb0   :  { %v3769_v59 = vpop.eup %3768 }
  0xb1   :  { %v363_v62 = vsel %vm362_vm3, %v3765_v47, %v359_v58  ;;  %v371_v63 = vmul.f32 %v3769_v59, %v354_v48  ;;  %vm376_vm5 = vweird.f32 %v3769_v59  ;;  %v3771_v20 = vpop.eup %3770  ;;  %vm456_vm3 = vcmask 523520  }
  0xb2   :  { %v368_v5 = vsel %vm365_vm4, %v367_v61, %v363_v62  ;;  %vm377_vm7 = vmor %vm375_vm6, %vm376_vm5  ;;  %v3773_v32 = vpop.eup %3772 }
  0xb3   :  { %v427_v7 = vmul.f32 %v3767_v57, %v368_v5  ;;  %v372_v9 = vsub.f32 1.0, %v371_v63  ;;  %v393_v33 = vadd.f32 1.0, %v3773_v32  ;;  %v3775_v34 = vpop.eup %3774  ;;  %v425_v43 = vmul.f32 0.0, %v368_v5 }
  0xb4   :  { %v394_v35 = vadd.f32 1.0, %v3775_v34 }
  0xb5   :  { %431 = vrot.lane.b32.xlu0 %v427_v7, %s4145_s3  ;;  %v373_v13 = vmul.f32 %v3769_v59, %v372_v9  ;;  %3776 = vrcp.f32 %v393_v33  ;;  %vm400_vm9 = vweird.f32 %v393_v33  ;;  %v406_v46 = vand.u32 2147483648, %v393_v33 }
  0xb6   :  { %3778 = vrcp.f32 %v394_v35  ;;  %v404_v48 = vand.u32 2147483647, %v393_v33  ;;  %vm415_vm13 = vweird.f32 %v394_v35  ;;  %v421_v58 = vand.u32 2147483648, %v394_v35 }
  0xb7   :  { %v374_v17 = vadd.f32 %v3769_v59, %v373_v13  ;;  %v407_v50 = vor.u32 1.1754944e-38, %v406_v46  ;;  %v419_v61 = vand.u32 2147483647, %v394_v35  ;;  %v32_v13 = vld [vmem:[%s5478_s0 + $0x18] sm:$0xff] }
  0xb8   :  { %vm405_vm12 = vcmp.eq.f32.partialorder %v404_v48, 8.507059e+37  ;;  %v422_v62 = vor.u32 1.1754944e-38, %v421_v58  ;;  %3559 = vmatmul.msk.f32.gmra.mxu0 %vm59_vm0, %v32_v13  ;;  %3575 = vmatmul.msk.f32.gmra.mxu1 %vm59_vm0, %v32_v13 }
  0xb9   :  { %v378_v25 = vsel %vm377_vm7, %v3769_v59, %v374_v17  ;;  %vm420_vm1 = vcmp.eq.f32.partialorder %v419_v61, 8.507059e+37 }
  0xba   :  { %v383_v27 = vsel %vm380_vm8, %v382_v23, %v378_v25 }
  0xbb   :  { %v428_v28 = vmul.f32 %v3771_v20, %v383_v27  ;;  %v3777_v36 = vpop.eup %3776  ;;  %v426_v53 = vmul.f32 0.0, %v383_v27 }
  0xbc   :  { %v396_v37 = vmul.f32 %v3777_v36, %v393_v33  ;;  %v3779_v40 = vpop.eup %3778  ;;  %vm401_vm10 = vweird.f32 %v3777_v36 }
  0xbd   :  { %433 = vrot.lane.b32.xlu0 %v428_v28, %s4145_s3  ;;  %v411_v42 = vmul.f32 %v3779_v40, %v394_v35  ;;  %vm402_vm11 = vmor %vm400_vm9, %vm401_vm10  ;;  %vm416_vm14 = vweird.f32 %v3779_v40 }
  0xbe   :  { %v397_v38 = vsub.f32 1.0, %v396_v37  ;;  %vm417_vm15 = vmor %vm415_vm13, %vm416_vm14 }
  0xbf   :  { %v412_v49 = vsub.f32 1.0, %v411_v42 }
  0xc0   :  { %v398_v41 = vmul.f32 %v3777_v36, %v397_v38 }
  0xc1   :  { %v413_v52 = vmul.f32 %v3779_v40, %v412_v49 }
  0xc2   :  { %v399_v47 = vadd.f32 %v3777_v36, %v398_v41 }
  0xc3   :  { %v414_v60 = vadd.f32 %v3779_v40, %v413_v52 }
  0xc4   :  { %v403_v51 = vsel %vm402_vm11, %v3777_v36, %v399_v47 }
  0xc5   :  { %v408_v57 = vsel %vm405_vm12, %v407_v50, %v403_v51  ;;  %v418_v63 = vsel %vm417_vm15, %v3779_v40, %v414_v60 }
  0xc6   :  { %v423_v7 = vsel %vm420_vm1, %v422_v62, %v418_v63 }
 0x127   :  { %v432_v44 = vpop.permute.xlu0 %431 }
 0x128   :  { %v4371_v45 = vadd.f32 %v432_v44, %v425_v43 }
 0x12a   :  { %3780 = vtanh.f32 %v4371_v45 }
 0x12f   :  { %v434_v54 = vpop.permute.xlu0 %433 }
 0x130   :  { %v3781_v55 = vpop.eup %3780  ;;  %v4374_v56 = vadd.f32 %v434_v54, %v426_v53 }
 0x131   :  { %v441_v59 = vmul.f32 %v3781_v55, %v408_v57 }
 0x132   :  { %3782 = vtanh.f32 %v4374_v56 }
 0x133   :  { %444 = vrot.lane.b32.xlu1 %v441_v59, %s4145_s3 }
 0x138   :  { %v3783_v5 = vpop.eup %3782 }
 0x139   :  { %v442_v9 = vmul.f32 %v3783_v5, %v423_v7 }
 0x13b   :  { %452 = vrot.lane.b32.xlu1 %v442_v9, %s4145_s3 }
 0x1a5   :  { %v445_v15 = vpop.permute.xlu1 %444 }
 0x1a6   :  { %447 = vst.msk [vmem:[#allocation3] sm:$0xff] %vm59_vm0, %v445_v15  ;;  %3592 = vmatmul.msk.f32.vlgmr.msrb.gmra.mxu2 %vm293_vm2, %v445_v15  ;;  %3594 = vmatmul.msk.f32.vlgmr.msrb.gmra.mxu3 %vm293_vm2, %v445_v15 }
 0x1a7   :  { %450 = vst.msk [vmem:[#allocation3 + $0x78] sm:$0xff] %vm59_vm0, %v445_v15  ;;  %878 = vmatpush.msrb.mxu2 %v4195_v0  ;;  %901 = vmatpush.msrb.mxu3 %v4206_v2  ;;  %v131_v0 = vpop.f32.mrf.mxu0 }
 0x1a9   :  { %879 = vmatpush.msrb.mxu2 %v4200_v1  ;;  %902 = vmatpush.msrb.mxu3 %v4217_v4  ;;  %v132_v1 = vadd.f32 %v131_v0, %v4361_v29 }
 0x1ab   :  { %880 = vmatpush.msrb.mxu2 %v4211_v3  ;;  %903 = vmatpush.msrb.mxu3 %v4226_v6 }
 0x1ad   :  { %v453_v17 = vpop.permute.xlu1 %452  ;;  %881 = vmatpush.msrb.mxu2 %v4234_v8  ;;  %904 = vmatpush.msrb.mxu3 %v4244_v10 }
 0x1ae   :  { %3593 = vmatmul.msk.f32.gmra.mxu2 %vm293_vm2, %v453_v17  ;;  %3595 = vmatmul.msk.f32.gmra.mxu3 %vm293_vm2, %v453_v17  ;;  %457 = vst.msk [vmem:[#allocation3 + $0x70] sm:$0xff] %vm456_vm3, %v453_v17 }
 0x1af   :  { %460 = vst.msk [vmem:[#allocation3 + $0x8] sm:$0xff] %vm456_vm3, %v453_v17  ;;  %882 = vmatpush.msrb.mxu2 %v4249_v11  ;;  %905 = vmatpush.msrb.mxu3 %v4262_v14  ;;  %v134_v4 = vpop.f32.mrf.mxu0 }
 0x1b0   :  { %v135_v8 = vadd.f32 %v134_v4, %v4361_v29 }
 0x1b1   :  { %883 = vmatpush.msrb.mxu2 %v4270_v16  ;;  %906 = vmatpush.msrb.mxu3 %v4280_v18  ;;  %v196_v16 = vpop.f32.mrf.mxu1 }
 0x1b3   :  { %884 = vmatpush.msrb.mxu2 %v4285_v19  ;;  %907 = vmatpush.msrb.mxu3 %v4296_v21 }
 0x1b5   :  { %885 = vmatpush.msrb.mxu2 %v4301_v22  ;;  %908 = vmatpush.msrb.mxu3 %v4311_v24  ;;  %v197_v22 = vadd.f32 %v196_v16, %v4365_v39 }
 0x1b9   :  { %v199_v27 = vpop.f32.mrf.mxu1 }
 0x1ba   :  { %v200_v31 = vadd.f32 %v199_v27, %v4365_v39 }
 0x229   :  { %v505_v2 = vpop.f32.mrf.mxu2  ;;  %v528_v21 = vpop.f32.mrf.mxu3 }
 0x22a   :  { %v534_v3 = vadd.f32 %v505_v2, %v132_v1  ;;  %v535_v23 = vadd.f32 %v528_v21, %v197_v22 }
 0x22c   :  { %v3596_v6 = vmul.f32 -1.442695, %v534_v3  ;;  %v3598_v58 = vmul.f32 -1.442695, %v535_v23 }
 0x22e   :  { %3784 = vpow2.f32 %v3596_v6 }
 0x231   :  { %v508_v10 = vpop.f32.mrf.mxu2  ;;  %v531_v33 = vpop.f32.mrf.mxu3 }
 0x232   :  { %v536_v11 = vadd.f32 %v508_v10, %v135_v8  ;;  %v537_v38 = vadd.f32 %v531_v33, %v200_v31  ;;  %v34_v31 = vld [vmem:[%s5478_s0 + $0x28] sm:$0xff] }
 0x234   :  { %v3785_v14 = vpop.eup %3784  ;;  %v3597_v18 = vmul.f32 -1.442695, %v536_v11  ;;  %v3599_v59 = vmul.f32 -1.442695, %v537_v38 }
 0x235   :  { %v544_v19 = vadd.f32 1.0, %v3785_v14 }
 0x236   :  { %3786 = vpow2.f32 %v3597_v18 }
 0x237   :  { %3788 = vrcp.f32 %v544_v19  ;;  %v557_v32 = vand.u32 2147483648, %v544_v19  ;;  %v555_v35 = vand.u32 2147483647, %v544_v19  ;;  %vm551_vm5 = vweird.f32 %v544_v19 }
 0x239   :  { %v558_v40 = vor.u32 1.1754944e-38, %v557_v32  ;;  %vm556_vm7 = vcmp.eq.f32.partialorder %v555_v35, 8.507059e+37 }
 0x23c   :  { %v3787_v24 = vpop.eup %3786 }
 0x23d   :  { %v3789_v20 = vpop.eup %3788  ;;  %v545_v25 = vadd.f32 1.0, %v3787_v24 }
 0x23e   :  { %v547_v28 = vmul.f32 %v3789_v20, %v544_v19  ;;  %vm552_vm4 = vweird.f32 %v3789_v20 }
 0x23f   :  { %3790 = vrcp.f32 %v545_v25  ;;  %vm553_vm6 = vmor %vm551_vm5, %vm552_vm4  ;;  %v572_v48 = vand.u32 2147483648, %v545_v25  ;;  %v570_v50 = vand.u32 2147483647, %v545_v25  ;;  %vm566_vm9 = vweird.f32 %v545_v25 }
 0x240   :  { %v548_v30 = vsub.f32 1.0, %v547_v28  ;;  %3792 = vtanh.f32 %v535_v23 }
 0x241   :  { %3794 = vtanh.f32 %v537_v38  ;;  %v573_v52 = vor.u32 1.1754944e-38, %v572_v48  ;;  %vm571_vm11 = vcmp.eq.f32.partialorder %v570_v50, 8.507059e+37 }
 0x242   :  { %v549_v34 = vmul.f32 %v3789_v20, %v548_v30  ;;  %3796 = vpow2.f32 %v3598_v58  ;;  %v33_v30 = vld [vmem:[%s5478_s0 + $0x20] sm:$0xff] }
 0x243   :  { %3798 = vpow2.f32 %v3599_v59  ;;  %3560 = vmatmul.msk.f32.gmra.mxu0 %vm59_vm0, %v33_v30  ;;  %3576 = vmatmul.msk.f32.gmra.mxu1 %vm59_vm0, %v33_v30 }
 0x244   :  { %v550_v36 = vadd.f32 %v3789_v20, %v549_v34 }
 0x245   :  { %v3791_v37 = vpop.eup %3790 }
 0x246   :  { %v554_v41 = vsel %vm553_vm6, %v3789_v20, %v550_v36  ;;  %v562_v42 = vmul.f32 %v3791_v37, %v545_v25  ;;  %v3793_v43 = vpop.eup %3792  ;;  %vm567_vm8 = vweird.f32 %v3791_v37 }
 0x247   :  { %v559_v44 = vsel %vm556_vm7, %v558_v40, %v554_v41  ;;  %vm568_vm10 = vmor %vm566_vm9, %vm567_vm8  ;;  %v3795_v54 = vpop.eup %3794 }
 0x248   :  { %v618_v46 = vmul.f32 %v3793_v43, %v559_v44  ;;  %v563_v47 = vsub.f32 1.0, %v562_v42  ;;  %v3797_v60 = vpop.eup %3796  ;;  %v616_v17 = vmul.f32 %v559_v44, %v4371_v45 }
 0x249   :  { %v584_v61 = vadd.f32 1.0, %v3797_v60  ;;  %v3799_v62 = vpop.eup %3798 }
 0x24a   :  { %622 = vrot.lane.b32.xlu2 %v618_v46, %s4145_s3  ;;  %v564_v49 = vmul.f32 %v3791_v37, %v563_v47  ;;  %v585_v63 = vadd.f32 1.0, %v3799_v62 }
 0x24b   :  { %3800 = vrcp.f32 %v584_v61  ;;  %v597_v4 = vand.u32 2147483648, %v584_v61  ;;  %vm591_vm13 = vweird.f32 %v584_v61  ;;  %v595_v6 = vand.u32 2147483647, %v584_v61  ;;  %3561 = vmatmul.msk.f32.gmra.mxu0 %vm59_vm0, %v34_v31  ;;  %3577 = vmatmul.msk.f32.gmra.mxu1 %vm59_vm0, %v34_v31 }
 0x24c   :  { %v565_v51 = vadd.f32 %v3791_v37, %v564_v49  ;;  %3802 = vrcp.f32 %v585_v63  ;;  %v612_v24 = vand.u32 2147483648, %v585_v63  ;;  %vm606_vm4 = vweird.f32 %v585_v63 }
 0x24d   :  { %v598_v14 = vor.u32 1.1754944e-38, %v597_v4  ;;  %vm596_vm15 = vcmp.eq.f32.partialorder %v595_v6, 8.507059e+37  ;;  %v610_v20 = vand.u32 2147483647, %v585_v63 }
 0x24e   :  { %v569_v53 = vsel %vm568_vm10, %v3791_v37, %v565_v51 }
 0x24f   :  { %v574_v55 = vsel %vm571_vm11, %v573_v52, %v569_v53  ;;  %vm611_vm6 = vcmp.eq.f32.partialorder %v610_v20, 8.507059e+37 }
 0x250   :  { %v619_v57 = vmul.f32 %v3795_v54, %v574_v55  ;;  %v617_v11 = vmul.f32 %v574_v55, %v4374_v56  ;;  %v613_v56 = vor.u32 1.1754944e-38, %v612_v24 }
 0x251   :  { %v3801_v5 = vpop.eup %3800 }
 0x252   :  { %624 = vrot.lane.b32.xlu2 %v619_v57, %s4145_s3  ;;  %v587_v7 = vmul.f32 %v3801_v5, %v584_v61  ;;  %v3803_v12 = vpop.eup %3802  ;;  %vm592_vm12 = vweird.f32 %v3801_v5 }
 0x253   :  { %v602_v15 = vmul.f32 %v3803_v12, %v585_v63  ;;  %vm593_vm14 = vmor %vm591_vm13, %vm592_vm12  ;;  %vm607_vm1 = vweird.f32 %v3803_v12 }
 0x254   :  { %v588_v9 = vsub.f32 1.0, %v587_v7  ;;  %vm608_vm5 = vmor %vm606_vm4, %vm607_vm1 }
 0x255   :  { %v603_v3 = vsub.f32 1.0, %v602_v15 }
 0x256   :  { %v589_v13 = vmul.f32 %v3801_v5, %v588_v9 }
 0x257   :  { %v604_v10 = vmul.f32 %v3803_v12, %v603_v3 }
 0x258   :  { %v590_v2 = vadd.f32 %v3801_v5, %v589_v13 }
 0x259   :  { %v605_v22 = vadd.f32 %v3803_v12, %v604_v10 }
 0x25a   :  { %v594_v8 = vsel %vm593_vm14, %v3801_v5, %v590_v2 }
 0x25b   :  { %v599_v19 = vsel %vm596_vm15, %v598_v14, %v594_v8  ;;  %v609_v23 = vsel %vm608_vm5, %v3803_v12, %v605_v22 }
 0x25c   :  { %v614_v27 = vsel %vm611_vm6, %v613_v56, %v609_v23 }
 0x2a4   :  { %v623_v0 = vpop.permute.xlu2 %622 }
 0x2a5   :  { %v4420_v1 = vadd.f32 %v623_v0, %v616_v17 }
 0x2a7   :  { %3804 = vtanh.f32 %v4420_v1 }
 0x2ac   :  { %v625_v16 = vpop.permute.xlu2 %624 }
 0x2ad   :  { %v3805_v45 = vpop.eup %3804  ;;  %v4424_v18 = vadd.f32 %v625_v16, %v617_v11 }
 0x2ae   :  { %v632_v21 = vmul.f32 %v3805_v45, %v599_v19 }
 0x2af   :  { %3806 = vtanh.f32 %v4424_v18 }
 0x2b0   :  { %635 = vrot.lane.b32.xlu0 %v632_v21, %s4145_s3 }
 0x2b5   :  { %v3807_v25 = vpop.eup %3806 }
 0x2b6   :  { %v633_v28 = vmul.f32 %v3807_v25, %v614_v27 }
 0x2b8   :  { %644 = vrot.lane.b32.xlu1 %v633_v28, %s4145_s3 }
 0x2c0   :  { %v137_v34 = vpop.f32.mrf.mxu0  ;;  %v202_v46 = vpop.f32.mrf.mxu1 }
 0x2c1   :  { %v138_v35 = vadd.f32 %v137_v34, %v4361_v29  ;;  %v203_v50 = vadd.f32 %v202_v46, %v4365_v39 }
 0x2c8   :  { %v140_v38 = vpop.f32.mrf.mxu0  ;;  %v205_v55 = vpop.f32.mrf.mxu1 }
 0x2c9   :  { %v141_v41 = vadd.f32 %v140_v38, %v4361_v29  ;;  %v206_v59 = vadd.f32 %v205_v55, %v4365_v39 }
 0x322   :  { %v636_v32 = vpop.permute.xlu0 %635 }
 0x323   :  { %639 = vst.msk [vmem:[#allocation3 + $0x10] sm:$0xff] %vm59_vm0, %v636_v32  ;;  %3600 = vmatmul.msk.f32.vlgmr.msra.gmra.mxu2 %vm293_vm2, %v636_v32  ;;  %3602 = vmatmul.msk.f32.vlgmr.msra.gmra.mxu3 %vm293_vm2, %v636_v32 }
 0x324   :  { %642 = vst.msk [vmem:[#allocation3 + $0x68] sm:$0xff] %vm59_vm0, %v636_v32 }
 0x32a   :  { %v645_v33 = vpop.permute.xlu1 %644 }
 0x32b   :  { %648 = vst.msk [vmem:[#allocation3 + $0x60] sm:$0xff] %vm456_vm3, %v645_v33  ;;  %3601 = vmatmul.msk.f32.gmra.mxu2 %vm293_vm2, %v645_v33  ;;  %3603 = vmatmul.msk.f32.gmra.mxu3 %vm293_vm2, %v645_v33 }
 0x32c   :  { %651 = vst.msk [vmem:[#allocation3 + $0x18] sm:$0xff] %vm456_vm3, %v645_v33 }
 0x3a6   :  { %v696_v36 = vpop.f32.mrf.mxu2  ;;  %v719_v49 = vpop.f32.mrf.mxu3 }
 0x3a7   :  { %v725_v37 = vadd.f32 %v696_v36, %v138_v35  ;;  %v726_v53 = vadd.f32 %v719_v49, %v203_v50 }
 0x3a9   :  { %v3604_v40 = vmul.f32 -1.442695, %v725_v37  ;;  %v3606_v21 = vmul.f32 -1.442695, %v726_v53 }
 0x3ab   :  { %3808 = vpow2.f32 %v3604_v40 }
 0x3ae   :  { %v699_v42 = vpop.f32.mrf.mxu2  ;;  %v722_v61 = vpop.f32.mrf.mxu3 }
 0x3af   :  { %v727_v43 = vadd.f32 %v699_v42, %v141_v41  ;;  %v728_v9 = vadd.f32 %v722_v61, %v206_v59  ;;  %v36_v59 = vld [vmem:[%s5478_s0 + $0x38] sm:$0xff] }
 0x3b1   :  { %v3809_v44 = vpop.eup %3808  ;;  %v3605_v47 = vmul.f32 -1.442695, %v727_v43  ;;  %v3607_v25 = vmul.f32 -1.442695, %v728_v9 }
 0x3b2   :  { %v735_v48 = vadd.f32 1.0, %v3809_v44 }
 0x3b3   :  { %3810 = vpow2.f32 %v3605_v47 }
 0x3b4   :  { %3812 = vrcp.f32 %v735_v48  ;;  %v748_v60 = vand.u32 2147483648, %v735_v48  ;;  %v746_v63 = vand.u32 2147483647, %v735_v48  ;;  %vm742_vm8 = vweird.f32 %v735_v48 }
 0x3b6   :  { %v749_v12 = vor.u32 1.1754944e-38, %v748_v60  ;;  %vm747_vm10 = vcmp.eq.f32.partialorder %v746_v63, 8.507059e+37 }
 0x3b9   :  { %v3811_v51 = vpop.eup %3810 }
 0x3ba   :  { %v3813_v52 = vpop.eup %3812  ;;  %v736_v54 = vadd.f32 1.0, %v3811_v51 }
 0x3bb   :  { %v738_v57 = vmul.f32 %v3813_v52, %v735_v48  ;;  %vm743_vm7 = vweird.f32 %v3813_v52 }
 0x3bc   :  { %3814 = vrcp.f32 %v736_v54  ;;  %vm744_vm9 = vmor %vm742_vm8, %vm743_vm7  ;;  %v763_v4 = vand.u32 2147483648, %v736_v54  ;;  %v761_v8 = vand.u32 2147483647, %v736_v54  ;;  %vm757_vm12 = vweird.f32 %v736_v54 }
 0x3bd   :  { %v739_v58 = vsub.f32 1.0, %v738_v57  ;;  %3816 = vtanh.f32 %v726_v53 }
 0x3be   :  { %3818 = vtanh.f32 %v728_v9  ;;  %v764_v11 = vor.u32 1.1754944e-38, %v763_v4  ;;  %vm762_vm14 = vcmp.eq.f32.partialorder %v761_v8, 8.507059e+37 }
 0x3bf   :  { %v740_v62 = vmul.f32 %v3813_v52, %v739_v58  ;;  %3820 = vpow2.f32 %v3606_v21 }
 0x3c1   :  { %v741_v5 = vadd.f32 %v3813_v52, %v740_v62 }
 0x3c2   :  { %v3815_v7 = vpop.eup %3814 }
 0x3c3   :  { %v745_v13 = vsel %vm744_vm9, %v3813_v52, %v741_v5  ;;  %v753_v15 = vmul.f32 %v3815_v7, %v736_v54  ;;  %v3817_v17 = vpop.eup %3816  ;;  %vm758_vm11 = vweird.f32 %v3815_v7 }
 0x3c4   :  { %v750_v0 = vsel %vm747_vm10, %v749_v12, %v745_v13  ;;  %vm759_vm13 = vmor %vm757_vm12, %vm758_vm11  ;;  %v3819_v16 = vpop.eup %3818 }
 0x3c5   :  { %v809_v2 = vmul.f32 %v3817_v17, %v750_v0  ;;  %v754_v3 = vsub.f32 1.0, %v753_v15  ;;  %v3821_v22 = vpop.eup %3820  ;;  %v807_v28 = vmul.f32 %v750_v0, %v4420_v1 }
 0x3c6   :  { %v775_v24 = vadd.f32 1.0, %v3821_v22 }
 0x3c7   :  { %813 = vrot.lane.b32.xlu2 %v809_v2, %s4145_s3  ;;  %v755_v6 = vmul.f32 %v3815_v7, %v754_v3 }
 0x3c8   :  { %3822 = vrcp.f32 %v775_v24  ;;  %v788_v33 = vand.u32 2147483648, %v775_v24  ;;  %vm782_vm1 = vweird.f32 %v775_v24  ;;  %v786_v34 = vand.u32 2147483647, %v775_v24 }
 0x3c9   :  { %v756_v10 = vadd.f32 %v3815_v7, %v755_v6  ;;  %3824 = vpow2.f32 %v3607_v25 }
 0x3ca   :  { %v789_v37 = vor.u32 1.1754944e-38, %v788_v33  ;;  %vm787_vm5 = vcmp.eq.f32.partialorder %v786_v34, 8.507059e+37 }
 0x3cb   :  { %v760_v14 = vsel %vm759_vm13, %v3815_v7, %v756_v10 }
 0x3cc   :  { %v765_v45 = vsel %vm762_vm14, %v764_v11, %v760_v14 }
 0x3cd   :  { %v810_v19 = vmul.f32 %v3819_v16, %v765_v45  ;;  %v808_v47 = vmul.f32 %v765_v45, %v4424_v18  ;;  %v35_v18 = vld [vmem:[%s5478_s0 + $0x30] sm:$0xff] }
 0x3ce   :  { %v3823_v20 = vpop.eup %3822  ;;  %3562 = vmatmul.msk.f32.gmra.mxu0 %vm59_vm0, %v35_v18  ;;  %3578 = vmatmul.msk.f32.gmra.mxu1 %vm59_vm0, %v35_v18  ;;  %v4510_v18 = vld [vmem:[%s5476_s2 + $0x60] sm:$0xff] }
 0x3cf   :  { %815 = vrot.lane.b32.xlu0 %v810_v19, %s4145_s3  ;;  %v778_v23 = vmul.f32 %v3823_v20, %v775_v24  ;;  %vm783_vm15 = vweird.f32 %v3823_v20  ;;  %v3825_v35 = vpop.eup %3824 }
 0x3d0   :  { %vm784_vm4 = vmor %vm782_vm1, %vm783_vm15  ;;  %v776_v40 = vadd.f32 1.0, %v3825_v35 }
 0x3d1   :  { %v779_v56 = vsub.f32 1.0, %v778_v23 }
 0x3d2   :  { %v803_v51 = vand.u32 2147483648, %v776_v40  ;;  %vm797_vm7 = vweird.f32 %v776_v40  ;;  %v801_v52 = vand.u32 2147483647, %v776_v40 }
 0x3d3   :  { %v780_v27 = vmul.f32 %v3823_v20, %v779_v56 }
 0x3d4   :  { %v804_v54 = vor.u32 1.1754944e-38, %v803_v51  ;;  %vm802_vm9 = vcmp.eq.f32.partialorder %v801_v52, 8.507059e+37 }
 0x3d5   :  { %v781_v32 = vadd.f32 %v3823_v20, %v780_v27 }
 0x3d6   :  { %3563 = vmatmul.msk.f32.gmra.mxu0 %vm59_vm0, %v36_v59  ;;  %3579 = vmatmul.msk.f32.gmra.mxu1 %vm59_vm0, %v36_v59  ;;  %v4518_v59 = vld [vmem:[%s5476_s2 + $0x68] sm:$0xff] }
 0x3d7   :  { %v785_v36 = vsel %vm784_vm4, %v3823_v20, %v781_v32 }
 0x3d8   :  { %v790_v41 = vsel %vm787_vm5, %v789_v37, %v785_v36 }
 0x421   :  { %v814_v30 = vpop.permute.xlu2 %813 }
 0x422   :  { %v4454_v31 = vadd.f32 %v814_v30, %v807_v28 }
 0x424   :  { %3826 = vtanh.f32 %v4454_v31 }
 0x425   :  { %3828 = vrcp.f32 %v776_v40 }
 0x42a   :  { %v3827_v38 = vpop.eup %3826 }
 0x42b   :  { %v823_v1 = vmul.f32 %v3827_v38, %v790_v41  ;;  %v3829_v42 = vpop.eup %3828 }
 0x42c   :  { %v793_v43 = vmul.f32 %v3829_v42, %v776_v40  ;;  %vm798_vm6 = vweird.f32 %v3829_v42 }
 0x42d   :  { %826 = vrot.lane.b32.xlu1 %v823_v1, %s4145_s3  ;;  %vm799_vm8 = vmor %vm797_vm7, %vm798_vm6 }
 0x42e   :  { %v794_v44 = vsub.f32 1.0, %v793_v43 }
 0x430   :  { %v795_v46 = vmul.f32 %v3829_v42, %v794_v44 }
 0x432   :  { %v796_v50 = vadd.f32 %v3829_v42, %v795_v46 }
 0x434   :  { %v800_v53 = vsel %vm799_vm8, %v3829_v42, %v796_v50 }
 0x435   :  { %v805_v57 = vsel %vm802_vm9, %v804_v54, %v800_v53 }
 0x441   :  { %v816_v48 = vpop.permute.xlu0 %815 }
 0x442   :  { %v4459_v49 = vadd.f32 %v816_v48, %v808_v47 }
 0x444   :  { %3830 = vtanh.f32 %v4459_v49 }
 0x44a   :  { %v3831_v55 = vpop.eup %3830 }
 0x44b   :  { %v824_v58 = vmul.f32 %v3831_v55, %v805_v57  ;;  %v143_v62 = vpop.f32.mrf.mxu0  ;;  %v208_v2 = vpop.f32.mrf.mxu1  ;;  %v4500_v57 = vld [vmem:[%s5476_s2 + $0x70] sm:$0xff] }
 0x44c   :  { %v144_v63 = vadd.f32 %v143_v62, %v4361_v29  ;;  %v209_v8 = vadd.f32 %v208_v2, %v4365_v39  ;;  %1069 = vmatpush.msra.mxu2 %v4500_v57  ;;  %v4530_v62 = vld [vmem:[%s5476_s2 + $0x58] sm:$0xff] }
 0x44d   :  { %835 = vrot.lane.b32.xlu2 %v824_v58, %s4145_s3  ;;  %v4505_v58 = vld [vmem:[%s5476_s2 + $0x78] sm:$0xff] }
 0x44e   :  { %1092 = vmatpush.msra.mxu3 %v4505_v58  ;;  %1070 = vmatpush.msra.mxu2 %v4510_v18 }
 0x450   :  { %1093 = vmatpush.msra.mxu3 %v4518_v59 }
 0x452   :  { %1094 = vmatpush.msra.mxu3 %v4530_v62 }
 0x453   :  { %v146_v9 = vpop.f32.mrf.mxu0  ;;  %v211_v45 = vpop.f32.mrf.mxu1 }
 0x454   :  { %v147_v13 = vadd.f32 %v146_v9, %v4361_v29  ;;  %v212_v22 = vadd.f32 %v211_v45, %v4365_v39  ;;  %v4549_v9 = vld [vmem:[%s5476_s2 + $0x30] sm:$0xff] }
 0x49f   :  { %v827_v60 = vpop.permute.xlu1 %826 }
 0x4a0   :  { %830 = vst.msk [vmem:[#allocation3 + $0x20] sm:$0xff] %vm59_vm0, %v827_v60  ;;  %3608 = vmatmul.msk.f32.vlgmr.msrb.gmra.mxu2 %vm293_vm2, %v827_v60  ;;  %3610 = vmatmul.msk.f32.vlgmr.msrb.gmra.mxu3 %vm293_vm2, %v827_v60 }
 0x4a1   :  { %833 = vst.msk [vmem:[#allocation3 + $0x58] sm:$0xff] %vm59_vm0, %v827_v60 }
 0x4a7   :  { %v836_v61 = vpop.permute.xlu2 %835 }
 0x4a8   :  { %839 = vst.msk [vmem:[#allocation3 + $0x50] sm:$0xff] %vm456_vm3, %v836_v61  ;;  %3609 = vmatmul.msk.f32.gmra.mxu2 %vm293_vm2, %v836_v61  ;;  %3611 = vmatmul.msk.f32.gmra.mxu3 %vm293_vm2, %v836_v61 }
 0x4a9   :  { %842 = vst.msk [vmem:[#allocation3 + $0x28] sm:$0xff] %vm456_vm3, %v836_v61  ;;  %v4525_v61 = vld [vmem:[%s5476_s2 + $0x50] sm:$0xff] }
 0x4aa   :  { %1071 = vmatpush.msra.mxu2 %v4525_v61 }
 0x523   :  { %v887_v5 = vpop.f32.mrf.mxu2  ;;  %v910_v6 = vpop.f32.mrf.mxu3 }
 0x524   :  { %v916_v7 = vadd.f32 %v887_v5, %v144_v63  ;;  %v917_v14 = vadd.f32 %v910_v6, %v209_v8  ;;  %v4537_v63 = vld [vmem:[%s5476_s2 + $0x40] sm:$0xff]  ;;  %v4542_v5 = vld [vmem:[%s5476_s2 + $0x48] sm:$0xff] }
 0x525   :  { %1072 = vmatpush.msra.mxu2 %v4537_v63  ;;  %1095 = vmatpush.msra.mxu3 %v4542_v5 }
 0x526   :  { %v3612_v12 = vmul.f32 -1.442695, %v916_v7  ;;  %v3614_v48 = vmul.f32 -1.442695, %v917_v14 }
 0x527   :  { %1073 = vmatpush.msra.mxu2 %v4549_v9 }
 0x528   :  { %3832 = vpow2.f32 %v3612_v12  ;;  %v4554_v12 = vld [vmem:[%s5476_s2 + $0x38] sm:$0xff] }
 0x529   :  { %1096 = vmatpush.msra.mxu3 %v4554_v12 }
 0x52b   :  { %v890_v15 = vpop.f32.mrf.mxu2  ;;  %v913_v20 = vpop.f32.mrf.mxu3 }
 0x52c   :  { %v918_v17 = vadd.f32 %v890_v15, %v147_v13  ;;  %v919_v28 = vadd.f32 %v913_v20, %v212_v22  ;;  %v4563_v15 = vld [vmem:[%s5476_s2 + $0x20] sm:$0xff] }
 0x52d   :  { %1074 = vmatpush.msra.mxu2 %v4563_v15 }
 0x52e   :  { %v3833_v0 = vpop.eup %3832  ;;  %v3613_v3 = vmul.f32 -1.442695, %v918_v17  ;;  %v3615_v50 = vmul.f32 -1.442695, %v919_v28  ;;  %v4568_v17 = vld [vmem:[%s5476_s2 + $0x28] sm:$0xff] }
 0x52f   :  { %v926_v4 = vadd.f32 1.0, %v3833_v0  ;;  %1097 = vmatpush.msra.mxu3 %v4568_v17 }
 0x530   :  { %3834 = vpow2.f32 %v3613_v3  ;;  %v4578_v3 = vld [vmem:[%s5476_s2 + $0x10] sm:$0xff] }
 0x531   :  { %3836 = vrcp.f32 %v926_v4  ;;  %v939_v24 = vand.u32 2147483648, %v926_v4  ;;  %v937_v56 = vand.u32 2147483647, %v926_v4  ;;  %vm933_vm11 = vweird.f32 %v926_v4  ;;  %1075 = vmatpush.msra.mxu2 %v4578_v3 }
 0x533   :  { %v940_v30 = vor.u32 1.1754944e-38, %v939_v24  ;;  %vm938_vm13 = vcmp.eq.f32.partialorder %v937_v56, 8.507059e+37 }
 0x536   :  { %v3835_v10 = vpop.eup %3834 }
 0x537   :  { %v3837_v11 = vpop.eup %3836  ;;  %v927_v16 = vadd.f32 1.0, %v3835_v10  ;;  %v4591_v10 = vld [vmem:[%s5476_s2] sm:$0xff] }
 0x538   :  { %v929_v19 = vmul.f32 %v3837_v11, %v926_v4  ;;  %vm934_vm10 = vweird.f32 %v3837_v11  ;;  %v4583_v4 = vld [vmem:[%s5476_s2 + $0x18] sm:$0xff]  ;;  %1076 = vmatpush.msra.mxu2 %v4591_v10 }
 0x539   :  { %3838 = vrcp.f32 %v927_v16  ;;  %vm935_vm12 = vmor %vm933_vm11, %vm934_vm10  ;;  %v954_v38 = vand.u32 2147483648, %v927_v16  ;;  %v952_v41 = vand.u32 2147483647, %v927_v16  ;;  %vm948_vm15 = vweird.f32 %v927_v16  ;;  %1098 = vmatpush.msra.mxu3 %v4583_v4 }
 0x53a   :  { %v930_v21 = vsub.f32 1.0, %v929_v19  ;;  %3840 = vtanh.f32 %v917_v14  ;;  %1254 = vmatpush.msrb.mxu2 %v4500_v57 }
 0x53b   :  { %3842 = vtanh.f32 %v919_v28  ;;  %v955_v42 = vor.u32 1.1754944e-38, %v954_v38  ;;  %vm953_vm4 = vcmp.eq.f32.partialorder %v952_v41, 8.507059e+37  ;;  %v37_v38 = vld [vmem:[%s5478_s0 + $0x40] sm:$0xff]  ;;  %v38_v41 = vld [vmem:[%s5478_s0 + $0x48] sm:$0xff] }
 0x53c   :  { %v931_v23 = vmul.f32 %v3837_v11, %v930_v21  ;;  %3844 = vpow2.f32 %v3614_v48  ;;  %1255 = vmatpush.msrb.mxu2 %v4510_v18  ;;  %3564 = vmatmul.msk.f32.gmra.mxu0 %vm59_vm0, %v37_v38 }
 0x53d   :  { %3846 = vpow2.f32 %v3615_v50  ;;  %3580 = vmatmul.msk.f32.gmra.mxu1 %vm59_vm0, %v37_v38 }
 0x53e   :  { %v932_v25 = vadd.f32 %v3837_v11, %v931_v23  ;;  %1256 = vmatpush.msrb.mxu2 %v4525_v61 }
 0x53f   :  { %v3839_v27 = vpop.eup %3838 }
 0x540   :  { %v936_v32 = vsel %vm935_vm12, %v3837_v11, %v932_v25  ;;  %v944_v33 = vmul.f32 %v3839_v27, %v927_v16  ;;  %v3841_v34 = vpop.eup %3840  ;;  %vm949_vm14 = vweird.f32 %v3839_v27  ;;  %v4596_v11 = vld [vmem:[%s5476_s2 + $0x8] sm:$0xff]  ;;  %1257 = vmatpush.msrb.mxu2 %v4537_v63 }
 0x541   :  { %v941_v35 = vsel %vm938_vm13, %v940_v30, %v936_v32  ;;  %vm950_vm1 = vmor %vm948_vm15, %vm949_vm14  ;;  %v3843_v44 = vpop.eup %3842  ;;  %1099 = vmatpush.msra.mxu3 %v4596_v11 }
 0x542   :  { %v1000_v36 = vmul.f32 %v3841_v34, %v941_v35  ;;  %v945_v37 = vsub.f32 1.0, %v944_v33  ;;  %v3845_v51 = vpop.eup %3844  ;;  %v998_v6 = vmul.f32 %v941_v35, %v4454_v31  ;;  %1258 = vmatpush.msrb.mxu2 %v4549_v9 }
 0x543   :  { %v4490_v52 = vadd.f32 1.0, %v3845_v51  ;;  %v3847_v53 = vpop.eup %3846  ;;  %1277 = vmatpush.msrb.mxu3 %v4505_v58 }
 0x544   :  { %1004 = vrot.lane.b32.xlu0 %v1000_v36, %s4145_s3  ;;  %v946_v40 = vmul.f32 %v3839_v27, %v945_v37  ;;  %v4493_v54 = vadd.f32 1.0, %v3847_v53  ;;  %1259 = vmatpush.msrb.mxu2 %v4563_v15 }
 0x545   :  { %3848 = vrcp.f32 %v4490_v52  ;;  %v979_v45 = vand.u32 2147483648, %v4490_v52  ;;  %vm973_vm6 = vweird.f32 %v4490_v52  ;;  %v977_v19 = vand.u32 2147483647, %v4490_v52  ;;  %1278 = vmatpush.msrb.mxu3 %v4518_v59  ;;  %3565 = vmatmul.msk.f32.gmra.mxu0 %vm59_vm0, %v38_v41 }
 0x546   :  { %v947_v1 = vadd.f32 %v3839_v27, %v946_v40  ;;  %3850 = vrcp.f32 %v4493_v54  ;;  %vm988_vm10 = vweird.f32 %v4493_v54  ;;  %v992_v32 = vand.u32 2147483647, %v4493_v54  ;;  %1260 = vmatpush.msrb.mxu2 %v4578_v3  ;;  %3581 = vmatmul.msk.f32.gmra.mxu1 %vm59_vm0, %v38_v41 }
 0x547   :  { %v980_v20 = vor.u32 1.1754944e-38, %v979_v45  ;;  %vm978_vm8 = vcmp.eq.f32.partialorder %v977_v19, 8.507059e+37  ;;  %1279 = vmatpush.msrb.mxu3 %v4530_v62 }
 0x548   :  { %v951_v43 = vsel %vm950_vm1, %v3839_v27, %v947_v1  ;;  %vm993_vm12 = vcmp.eq.f32.partialorder %v992_v32, 8.507059e+37  ;;  %1261 = vmatpush.msrb.mxu2 %v4591_v10 }
 0x549   :  { %v4486_v46 = vsel %vm953_vm4, %v955_v42, %v951_v43  ;;  %1280 = vmatpush.msrb.mxu3 %v4542_v5 }
 0x54a   :  { %v1001_v47 = vmul.f32 %v3843_v44, %v4486_v46  ;;  %v999_v24 = vmul.f32 %v4486_v46, %v4459_v49  ;;  %v994_v49 = vand.u32 2147483648, %v4493_v54 }
 0x54b   :  { %v4495_v55 = vpop.eup %3848  ;;  %1281 = vmatpush.msrb.mxu3 %v4554_v12 }
 0x54c   :  { %1006 = vrot.lane.b32.xlu1 %v1001_v47, %s4145_s3  ;;  %v969_v60 = vmul.f32 %v4495_v55, %v4490_v52  ;;  %v4556_v13 = vpop.eup %3850  ;;  %vm974_vm5 = vweird.f32 %v4495_v55  ;;  %v995_v34 = vor.u32 1.1754944e-38, %v994_v49 }
 0x54d   :  { %v984_v2 = vmul.f32 %v4556_v13, %v4493_v54  ;;  %vm975_vm7 = vmor %vm973_vm6, %vm974_vm5  ;;  %vm989_vm9 = vweird.f32 %v4556_v13  ;;  %1282 = vmatpush.msrb.mxu3 %v4568_v17 }
 0x54e   :  { %v970_v7 = vsub.f32 1.0, %v969_v60  ;;  %vm990_vm11 = vmor %vm988_vm10, %vm989_vm9 }
 0x54f   :  { %v985_v16 = vsub.f32 1.0, %v984_v2  ;;  %1283 = vmatpush.msrb.mxu3 %v4583_v4 }
 0x550   :  { %v971_v0 = vmul.f32 %v4495_v55, %v970_v7 }
 0x551   :  { %v986_v22 = vmul.f32 %v4556_v13, %v985_v16  ;;  %1284 = vmatpush.msrb.mxu3 %v4596_v11 }
 0x552   :  { %v972_v31 = vadd.f32 %v4495_v55, %v971_v0 }
 0x553   :  { %v987_v30 = vadd.f32 %v4556_v13, %v986_v22 }
 0x554   :  { %v976_v21 = vsel %vm975_vm7, %v4495_v55, %v972_v31 }
 0x555   :  { %v981_v27 = vsel %vm978_vm8, %v980_v20, %v976_v21  ;;  %v991_v33 = vsel %vm990_vm11, %v4556_v13, %v987_v30 }
 0x556   :  { %v996_v36 = vsel %vm993_vm12, %v995_v34, %v991_v33 }
 0x5b6   :  { %v1005_v8 = vpop.permute.xlu0 %1004 }
 0x5b7   :  { %v4598_v14 = vadd.f32 %v1005_v8, %v998_v6 }
 0x5b9   :  { %3852 = vtanh.f32 %v4598_v14  ;;  %v149_v42 = vpop.f32.mrf.mxu0 }
 0x5ba   :  { %v150_v43 = vadd.f32 %v149_v42, %v4361_v29  ;;  %v214_v51 = vpop.f32.mrf.mxu1 }
 0x5bb   :  { %v215_v52 = vadd.f32 %v214_v51, %v4365_v39 }
 0x5be   :  { %v1007_v23 = vpop.permute.xlu1 %1006 }
 0x5bf   :  { %v3853_v56 = vpop.eup %3852  ;;  %v4620_v25 = vadd.f32 %v1007_v23, %v999_v24 }
 0x5c0   :  { %v1014_v28 = vmul.f32 %v3853_v56, %v981_v27 }
 0x5c1   :  { %3854 = vtanh.f32 %v4620_v25 }
 0x5c2   :  { %1017 = vrot.lane.b32.xlu2 %v1014_v28, %s4145_s3  ;;  %v152_v6 = vpop.f32.mrf.mxu0 }
 0x5c3   :  { %v153_v16 = vadd.f32 %v152_v6, %v4361_v29  ;;  %v217_v28 = vpop.f32.mrf.mxu1 }
 0x5c4   :  { %v218_v30 = vadd.f32 %v217_v28, %v4365_v39 }
 0x5c7   :  { %v3855_v35 = vpop.eup %3854 }
 0x5c8   :  { %v1015_v37 = vmul.f32 %v3855_v35, %v996_v36 }
 0x5ca   :  { %1026 = vrot.lane.b32.xlu0 %v1015_v37, %s4145_s3 }
 0x61c   :  { %v1018_v40 = vpop.permute.xlu2 %1017 }
 0x61d   :  { %1021 = vst.msk [vmem:[#allocation3 + $0x30] sm:$0xff] %vm59_vm0, %v1018_v40  ;;  %3616 = vmatmul.msk.f32.vlgmr.msra.gmra.mxu2 %vm293_vm2, %v1018_v40  ;;  %3618 = vmatmul.msk.f32.vlgmr.msra.gmra.mxu3 %vm293_vm2, %v1018_v40 }
 0x61e   :  { %1024 = vst.msk [vmem:[#allocation3 + $0x48] sm:$0xff] %vm59_vm0, %v1018_v40  ;;  %1439 = vmatpush.msra.mxu2 %v4500_v57  ;;  %1462 = vmatpush.msra.mxu3 %v4505_v58 }
 0x620   :  { %1440 = vmatpush.msra.mxu2 %v4510_v18  ;;  %1463 = vmatpush.msra.mxu3 %v4518_v59 }
 0x622   :  { %1441 = vmatpush.msra.mxu2 %v4525_v61  ;;  %1464 = vmatpush.msra.mxu3 %v4530_v62 }
 0x624   :  { %1442 = vmatpush.msra.mxu2 %v4537_v63  ;;  %1465 = vmatpush.msra.mxu3 %v4542_v5 }
 0x626   :  { %1443 = vmatpush.msra.mxu2 %v4549_v9  ;;  %1466 = vmatpush.msra.mxu3 %v4554_v12 }
 0x628   :  { %1444 = vmatpush.msra.mxu2 %v4563_v15  ;;  %1467 = vmatpush.msra.mxu3 %v4568_v17 }
 0x62a   :  { %1445 = vmatpush.msra.mxu2 %v4578_v3  ;;  %1468 = vmatpush.msra.mxu3 %v4583_v4 }
 0x62c   :  { %1446 = vmatpush.msra.mxu2 %v4591_v10  ;;  %1469 = vmatpush.msra.mxu3 %v4596_v11 }
 0x63c   :  { %v1027_v1 = vpop.permute.xlu0 %1026 }
 0x63d   :  { %1030 = vst.msk [vmem:[#allocation3 + $0x40] sm:$0xff] %vm456_vm3, %v1027_v1  ;;  %3617 = vmatmul.msk.f32.gmra.mxu2 %vm293_vm2, %v1027_v1  ;;  %3619 = vmatmul.msk.f32.gmra.mxu3 %vm293_vm2, %v1027_v1 }
 0x63e   :  { %1033 = vst.msk [vmem:[#allocation3 + $0x38] sm:$0xff] %vm456_vm3, %v1027_v1 }
 0x6a0   :  { %v1078_v44 = vpop.f32.mrf.mxu2  ;;  %v1101_v53 = vpop.f32.mrf.mxu3 }
 0x6a1   :  { %v1107_v46 = vadd.f32 %v1078_v44, %v150_v43  ;;  %v1108_v55 = vadd.f32 %v1101_v53, %v215_v52 }
 0x6a3   :  { %v3620_v47 = vmul.f32 -1.442695, %v1107_v46  ;;  %v3622_v46 = vmul.f32 -1.442695, %v1108_v55 }
 0x6a5   :  { %3856 = vpow2.f32 %v3620_v47 }
 0x6ab   :  { %v3857_v48 = vpop.eup %3856 }
 0x6ac   :  { %v1117_v50 = vadd.f32 1.0, %v3857_v48 }
 0x6ae   :  { %3858 = vrcp.f32 %v1117_v50  ;;  %v1130_v13 = vand.u32 2147483648, %v1117_v50  ;;  %v1128_v2 = vand.u32 2147483647, %v1117_v50  ;;  %vm1124_vm14 = vweird.f32 %v1117_v50 }
 0x6af   :  { %3860 = vtanh.f32 %v1108_v55 }
 0x6b0   :  { %v1131_v31 = vor.u32 1.1754944e-38, %v1130_v13  ;;  %vm1129_vm1 = vcmp.eq.f32.partialorder %v1128_v2, 8.507059e+37 }
 0x6b4   :  { %v3859_v54 = vpop.eup %3858 }
 0x6b5   :  { %v1120_v60 = vmul.f32 %v3859_v54, %v1117_v50  ;;  %vm1125_vm13 = vweird.f32 %v3859_v54  ;;  %v3861_v19 = vpop.eup %3860 }
 0x6b6   :  { %vm1126_vm15 = vmor %vm1124_vm14, %vm1125_vm13 }
 0x6b7   :  { %v1121_v7 = vsub.f32 1.0, %v1120_v60 }
 0x6b9   :  { %v1122_v0 = vmul.f32 %v3859_v54, %v1121_v7 }
 0x6bb   :  { %v1123_v8 = vadd.f32 %v3859_v54, %v1122_v0 }
 0x6bd   :  { %v1127_v45 = vsel %vm1126_vm15, %v3859_v54, %v1123_v8 }
 0x6be   :  { %v1132_v21 = vsel %vm1129_vm1, %v1131_v31, %v1127_v45 }
 0x6bf   :  { %v1191_v22 = vmul.f32 %v3861_v19, %v1132_v21  ;;  %v1189_v2 = vmul.f32 %v1132_v21, %v4598_v14 }
 0x6c0   :  { %v1081_v24 = vpop.f32.mrf.mxu2  ;;  %v1104_v49 = vpop.f32.mrf.mxu3 }
 0x6c1   :  { %v1109_v20 = vadd.f32 %v1081_v24, %v153_v16  ;;  %1195 = vrot.lane.b32.xlu1 %v1191_v22, %s4145_s3  ;;  %v1110_v33 = vadd.f32 %v1104_v49, %v218_v30 }
 0x6c3   :  { %v3621_v23 = vmul.f32 -1.442695, %v1109_v20  ;;  %v3623_v47 = vmul.f32 -1.442695, %v1110_v33 }
 0x6c5   :  { %3862 = vpow2.f32 %v3621_v23 }
 0x6cb   :  { %v3863_v56 = vpop.eup %3862 }
 0x6cc   :  { %v1118_v27 = vadd.f32 1.0, %v3863_v56 }
 0x6ce   :  { %3864 = vrcp.f32 %v1118_v27  ;;  %v1145_v36 = vand.u32 2147483648, %v1118_v27  ;;  %v1143_v38 = vand.u32 2147483647, %v1118_v27  ;;  %vm1139_vm5 = vweird.f32 %v1118_v27 }
 0x6cf   :  { %3866 = vtanh.f32 %v1110_v33 }
 0x6d0   :  { %v1146_v41 = vor.u32 1.1754944e-38, %v1145_v36  ;;  %vm1144_vm7 = vcmp.eq.f32.partialorder %v1143_v38, 8.507059e+37  ;;  %3868 = vpow2.f32 %v3622_v46  ;;  %v39_v36 = vld [vmem:[%s5478_s0 + $0x50] sm:$0xff] }
 0x6d1   :  { %3870 = vpow2.f32 %v3623_v47  ;;  %3566 = vmatmul.msk.f32.gmra.mxu0 %vm59_vm0, %v39_v36  ;;  %3582 = vmatmul.msk.f32.gmra.mxu1 %vm59_vm0, %v39_v36 }
 0x6d4   :  { %v3865_v32 = vpop.eup %3864 }
 0x6d5   :  { %v1135_v34 = vmul.f32 %v3865_v32, %v1118_v27  ;;  %vm1140_vm4 = vweird.f32 %v3865_v32  ;;  %v3867_v42 = vpop.eup %3866 }
 0x6d6   :  { %vm1141_vm6 = vmor %vm1139_vm5, %vm1140_vm4  ;;  %v3869_v48 = vpop.eup %3868 }
 0x6d7   :  { %v1136_v35 = vsub.f32 1.0, %v1135_v34  ;;  %v1157_v50 = vadd.f32 1.0, %v3869_v48  ;;  %v3871_v51 = vpop.eup %3870 }
 0x6d8   :  { %v1158_v52 = vadd.f32 1.0, %v3871_v51 }
 0x6d9   :  { %v1137_v37 = vmul.f32 %v3865_v32, %v1136_v35  ;;  %3872 = vrcp.f32 %v1157_v50  ;;  %v1170_v16 = vand.u32 2147483648, %v1157_v50  ;;  %vm1164_vm9 = vweird.f32 %v1157_v50 }
 0x6da   :  { %3874 = vrcp.f32 %v1158_v52  ;;  %v1168_v45 = vand.u32 2147483647, %v1157_v50  ;;  %v1185_v30 = vand.u32 2147483648, %v1158_v52  ;;  %vm1179_vm13 = vweird.f32 %v1158_v52 }
 0x6db   :  { %v1138_v40 = vadd.f32 %v3865_v32, %v1137_v37  ;;  %v1171_v20 = vor.u32 1.1754944e-38, %v1170_v16  ;;  %v1183_v49 = vand.u32 2147483647, %v1158_v52  ;;  %v40_v37 = vld [vmem:[%s5478_s0 + $0x58] sm:$0xff] }
 0x6dc   :  { %vm1169_vm11 = vcmp.eq.f32.partialorder %v1168_v45, 8.507059e+37  ;;  %3567 = vmatmul.msk.f32.gmra.mxu0 %vm59_vm0, %v40_v37  ;;  %3583 = vmatmul.msk.f32.gmra.mxu1 %vm59_vm0, %v40_v37 }
 0x6dd   :  { %v1142_v1 = vsel %vm1141_vm6, %v3865_v32, %v1138_v40  ;;  %vm1184_vm15 = vcmp.eq.f32.partialorder %v1183_v49, 8.507059e+37 }
 0x6de   :  { %v1147_v43 = vsel %vm1144_vm7, %v1146_v41, %v1142_v1 }
 0x6df   :  { %v1192_v44 = vmul.f32 %v3867_v42, %v1147_v43  ;;  %v3873_v53 = vpop.eup %3872  ;;  %v1190_v24 = vmul.f32 %v1147_v43, %v4620_v25  ;;  %v1186_v25 = vor.u32 1.1754944e-38, %v1185_v30 }
 0x6e0   :  { %v1160_v54 = vmul.f32 %v3873_v53, %v1157_v50  ;;  %v3875_v7 = vpop.eup %3874  ;;  %vm1165_vm8 = vweird.f32 %v3873_v53 }
 0x6e1   :  { %1197 = vrot.lane.b32.xlu2 %v1192_v44, %s4145_s3  ;;  %v1175_v0 = vmul.f32 %v3875_v7, %v1158_v52  ;;  %vm1166_vm10 = vmor %vm1164_vm9, %vm1165_vm8  ;;  %vm1180_vm12 = vweird.f32 %v3875_v7 }
 0x6e2   :  { %v1161_v60 = vsub.f32 1.0, %v1160_v54  ;;  %vm1181_vm14 = vmor %vm1179_vm13, %vm1180_vm12 }
 0x6e3   :  { %v1176_v31 = vsub.f32 1.0, %v1175_v0 }
 0x6e4   :  { %v1162_v13 = vmul.f32 %v3873_v53, %v1161_v60 }
 0x6e5   :  { %v1177_v22 = vmul.f32 %v3875_v7, %v1176_v31 }
 0x6e6   :  { %v1163_v55 = vadd.f32 %v3873_v53, %v1162_v13 }
 0x6e7   :  { %v1178_v28 = vadd.f32 %v3875_v7, %v1177_v22 }
 0x6e8   :  { %v1167_v19 = vsel %vm1166_vm10, %v3873_v53, %v1163_v55 }
 0x6e9   :  { %v1172_v56 = vsel %vm1169_vm11, %v1171_v20, %v1167_v19  ;;  %v1182_v32 = vsel %vm1181_vm14, %v3875_v7, %v1178_v28 }
 0x6ea   :  { %v1187_v34 = vsel %vm1184_vm15, %v1186_v25, %v1182_v32 }
 0x733   :  { %v1196_v6 = vpop.permute.xlu1 %1195 }
 0x734   :  { %v4682_v8 = vadd.f32 %v1196_v6, %v1189_v2 }
 0x736   :  { %3876 = vtanh.f32 %v4682_v8 }
 0x73b   :  { %v1198_v23 = vpop.permute.xlu2 %1197 }
 0x73c   :  { %v3877_v14 = vpop.eup %3876  ;;  %v4686_v21 = vadd.f32 %v1198_v23, %v1190_v24 }
 0x73d   :  { %v1205_v27 = vmul.f32 %v3877_v14, %v1172_v56 }
 0x73e   :  { %3878 = vtanh.f32 %v4686_v21 }
 0x73f   :  { %1208 = vrot.lane.b32.xlu0 %v1205_v27, %s4145_s3 }
 0x744   :  { %v3879_v33 = vpop.eup %3878 }
 0x745   :  { %v1206_v35 = vmul.f32 %v3879_v33, %v1187_v34 }
 0x747   :  { %1214 = vrot.lane.b32.xlu1 %v1206_v35, %s4145_s3 }
 0x7b1   :  { %v1209_v38 = vpop.permute.xlu0 %1208 }
 0x7b2   :  { %1211 = vst.msk [vmem:[#allocation3 + $0x40] sm:$0xff] %vm59_vm0, %v1209_v38  ;;  %3624 = vmatmul.msk.f32.vlgmr.msrb.gmra.mxu2 %vm293_vm2, %v1209_v38  ;;  %3626 = vmatmul.msk.f32.vlgmr.msrb.gmra.mxu3 %vm293_vm2, %v1209_v38 }
 0x7b3   :  { %1212 = vst.msk [vmem:[#allocation3 + $0x38] sm:$0xff] %vm59_vm0, %v1209_v38  ;;  %1624 = vmatpush.msrb.mxu2 %v4500_v57  ;;  %1647 = vmatpush.msrb.mxu3 %v4505_v58  ;;  %v155_v57 = vpop.f32.mrf.mxu0 }
 0x7b4   :  { %v156_v58 = vadd.f32 %v155_v57, %v4361_v29 }
 0x7b5   :  { %1625 = vmatpush.msrb.mxu2 %v4510_v18  ;;  %1648 = vmatpush.msrb.mxu3 %v4518_v59 }
 0x7b7   :  { %1626 = vmatpush.msrb.mxu2 %v4525_v61  ;;  %1649 = vmatpush.msrb.mxu3 %v4530_v62 }
 0x7b9   :  { %v1215_v40 = vpop.permute.xlu1 %1214  ;;  %1627 = vmatpush.msrb.mxu2 %v4537_v63  ;;  %1650 = vmatpush.msrb.mxu3 %v4542_v5 }
 0x7ba   :  { %1217 = vst.msk [vmem:[#allocation3 + $0x30] sm:$0xff] %vm456_vm3, %v1215_v40  ;;  %3625 = vmatmul.msk.f32.gmra.mxu2 %vm293_vm2, %v1215_v40  ;;  %3627 = vmatmul.msk.f32.gmra.mxu3 %vm293_vm2, %v1215_v40 }
 0x7bb   :  { %1218 = vst.msk [vmem:[#allocation3 + $0x48] sm:$0xff] %vm456_vm3, %v1215_v40  ;;  %1628 = vmatpush.msrb.mxu2 %v4549_v9  ;;  %1651 = vmatpush.msrb.mxu3 %v4554_v12  ;;  %v158_v61 = vpop.f32.mrf.mxu0 }
 0x7bc   :  { %v159_v63 = vadd.f32 %v158_v61, %v4361_v29 }
 0x7bd   :  { %1629 = vmatpush.msrb.mxu2 %v4563_v15  ;;  %1652 = vmatpush.msrb.mxu3 %v4568_v17  ;;  %v220_v15 = vpop.f32.mrf.mxu1 }
 0x7bf   :  { %1630 = vmatpush.msrb.mxu2 %v4578_v3  ;;  %1653 = vmatpush.msrb.mxu3 %v4583_v4 }
 0x7c1   :  { %1631 = vmatpush.msrb.mxu2 %v4591_v10  ;;  %1654 = vmatpush.msrb.mxu3 %v4596_v11  ;;  %v221_v10 = vadd.f32 %v220_v15, %v4365_v39 }
 0x7c5   :  { %v223_v44 = vpop.f32.mrf.mxu1 }
 0x7c6   :  { %v224_v47 = vadd.f32 %v223_v44, %v4365_v39 }
 0x835   :  { %v1263_v18 = vpop.f32.mrf.mxu2  ;;  %v1286_v4 = vpop.f32.mrf.mxu3 }
 0x836   :  { %v1292_v59 = vadd.f32 %v1263_v18, %v156_v58  ;;  %v1293_v1 = vadd.f32 %v1286_v4, %v221_v10 }
 0x838   :  { %v3628_v62 = vmul.f32 -1.442695, %v1292_v59  ;;  %v3630_v27 = vmul.f32 -1.442695, %v1293_v1 }
 0x83a   :  { %3880 = vpow2.f32 %v3628_v62 }
 0x83d   :  { %v1266_v5 = vpop.f32.mrf.mxu2  ;;  %v1289_v50 = vpop.f32.mrf.mxu3 }
 0x83e   :  { %v1294_v9 = vadd.f32 %v1266_v5, %v159_v63  ;;  %v1295_v60 = vadd.f32 %v1289_v50, %v224_v47  ;;  %v42_v47 = vld [vmem:[%s5478_s0 + $0x68] sm:$0xff] }
 0x840   :  { %v3881_v12 = vpop.eup %3880  ;;  %v3629_v17 = vmul.f32 -1.442695, %v1294_v9  ;;  %v3631_v33 = vmul.f32 -1.442695, %v1295_v60 }
 0x841   :  { %v1302_v3 = vadd.f32 1.0, %v3881_v12 }
 0x842   :  { %3882 = vpow2.f32 %v3629_v17 }
 0x843   :  { %3884 = vrcp.f32 %v1302_v3  ;;  %v1315_v48 = vand.u32 2147483648, %v1302_v3  ;;  %v1313_v52 = vand.u32 2147483647, %v1302_v3  ;;  %vm1309_vm4 = vweird.f32 %v1302_v3 }
 0x845   :  { %v1316_v7 = vor.u32 1.1754944e-38, %v1315_v48  ;;  %vm1314_vm6 = vcmp.eq.f32.partialorder %v1313_v52, 8.507059e+37 }
 0x848   :  { %v3883_v11 = vpop.eup %3882 }
 0x849   :  { %v3885_v41 = vpop.eup %3884  ;;  %v1303_v42 = vadd.f32 1.0, %v3883_v11 }
 0x84a   :  { %v1305_v43 = vmul.f32 %v3885_v41, %v1302_v3  ;;  %vm1310_vm1 = vweird.f32 %v3885_v41 }
 0x84b   :  { %3886 = vrcp.f32 %v1303_v42  ;;  %vm1311_vm5 = vmor %vm1309_vm4, %vm1310_vm1  ;;  %v1330_v16 = vand.u32 2147483648, %v1303_v42  ;;  %v1328_v19 = vand.u32 2147483647, %v1303_v42  ;;  %vm1324_vm8 = vweird.f32 %v1303_v42 }
 0x84c   :  { %v1306_v46 = vsub.f32 1.0, %v1305_v43  ;;  %3888 = vtanh.f32 %v1293_v1 }
 0x84d   :  { %3890 = vtanh.f32 %v1295_v60  ;;  %v1331_v24 = vor.u32 1.1754944e-38, %v1330_v16  ;;  %vm1329_vm10 = vcmp.eq.f32.partialorder %v1328_v19, 8.507059e+37 }
 0x84e   :  { %v1307_v51 = vmul.f32 %v3885_v41, %v1306_v46  ;;  %3892 = vpow2.f32 %v3630_v27 }
 0x850   :  { %v1308_v53 = vadd.f32 %v3885_v41, %v1307_v51 }
 0x851   :  { %v3887_v54 = vpop.eup %3886 }
 0x852   :  { %v1320_v13 = vmul.f32 %v3887_v54, %v1303_v42  ;;  %v1312_v0 = vsel %vm1311_vm5, %v3885_v41, %v1308_v53  ;;  %v3889_v2 = vpop.eup %3888  ;;  %vm1325_vm7 = vweird.f32 %v3887_v54 }
 0x853   :  { %v1317_v6 = vsel %vm1314_vm6, %v1316_v7, %v1312_v0  ;;  %vm1326_vm9 = vmor %vm1324_vm8, %vm1325_vm7  ;;  %v3891_v23 = vpop.eup %3890 }
 0x854   :  { %v1376_v55 = vmul.f32 %v3889_v2, %v1317_v6  ;;  %v1321_v31 = vsub.f32 1.0, %v1320_v13  ;;  %v3893_v28 = vpop.eup %3892  ;;  %v1374_v35 = vmul.f32 %v1317_v6, %v4682_v8 }
 0x855   :  { %v1342_v30 = vadd.f32 1.0, %v3893_v28 }
 0x856   :  { %1380 = vrot.lane.b32.xlu2 %v1376_v55, %s4145_s3  ;;  %v1322_v45 = vmul.f32 %v3887_v54, %v1321_v31 }
 0x857   :  { %3894 = vrcp.f32 %v1342_v30  ;;  %v1355_v40 = vand.u32 2147483648, %v1342_v30  ;;  %vm1349_vm12 = vweird.f32 %v1342_v30  ;;  %v1353_v57 = vand.u32 2147483647, %v1342_v30 }
 0x858   :  { %v1323_v22 = vadd.f32 %v3887_v54, %v1322_v45  ;;  %3896 = vpow2.f32 %v3631_v33 }
 0x859   :  { %v1356_v59 = vor.u32 1.1754944e-38, %v1355_v40  ;;  %vm1354_vm14 = vcmp.eq.f32.partialorder %v1353_v57, 8.507059e+37 }
 0x85a   :  { %v1327_v20 = vsel %vm1326_vm9, %v3887_v54, %v1323_v22 }
 0x85b   :  { %v1332_v14 = vsel %vm1329_vm10, %v1331_v24, %v1327_v20 }
 0x85c   :  { %v1377_v56 = vmul.f32 %v3891_v23, %v1332_v14  ;;  %v1375_v17 = vmul.f32 %v1332_v14, %v4686_v21  ;;  %v41_v21 = vld [vmem:[%s5478_s0 + $0x60] sm:$0xff] }
 0x85d   :  { %v3895_v49 = vpop.eup %3894  ;;  %3568 = vmatmul.msk.f32.gmra.mxu0 %vm59_vm0, %v41_v21  ;;  %3584 = vmatmul.msk.f32.gmra.mxu1 %vm59_vm0, %v41_v21 }
 0x85e   :  { %1382 = vrot.lane.b32.xlu0 %v1377_v56, %s4145_s3  ;;  %v1345_v32 = vmul.f32 %v3895_v49, %v1342_v30  ;;  %vm1350_vm11 = vweird.f32 %v3895_v49  ;;  %v3897_v58 = vpop.eup %3896 }
 0x85f   :  { %vm1351_vm13 = vmor %vm1349_vm12, %vm1350_vm11  ;;  %v1343_v62 = vadd.f32 1.0, %v3897_v58 }
 0x860   :  { %v1346_v25 = vsub.f32 1.0, %v1345_v32 }
 0x861   :  { %v1370_v11 = vand.u32 2147483648, %v1343_v62  ;;  %vm1364_vm1 = vweird.f32 %v1343_v62  ;;  %v1368_v41 = vand.u32 2147483647, %v1343_v62 }
 0x862   :  { %v1347_v34 = vmul.f32 %v3895_v49, %v1346_v25 }
 0x863   :  { %v1371_v42 = vor.u32 1.1754944e-38, %v1370_v11  ;;  %vm1369_vm5 = vcmp.eq.f32.partialorder %v1368_v41, 8.507059e+37 }
 0x864   :  { %v1348_v38 = vadd.f32 %v3895_v49, %v1347_v34 }
 0x865   :  { %3569 = vmatmul.msk.f32.gmra.mxu0 %vm59_vm0, %v42_v47  ;;  %3585 = vmatmul.msk.f32.gmra.mxu1 %vm59_vm0, %v42_v47 }
 0x866   :  { %v1352_v18 = vsel %vm1351_vm13, %v3895_v49, %v1348_v38 }
 0x867   :  { %v1357_v63 = vsel %vm1354_vm14, %v1356_v59, %v1352_v18 }
 0x8b0   :  { %v1381_v36 = vpop.permute.xlu2 %1380 }
 0x8b1   :  { %v4732_v37 = vadd.f32 %v1381_v36, %v1374_v35 }
 0x8b3   :  { %3898 = vtanh.f32 %v4732_v37 }
 0x8b4   :  { %3900 = vrcp.f32 %v1343_v62 }
 0x8b9   :  { %v3899_v61 = vpop.eup %3898 }
 0x8ba   :  { %v1390_v8 = vmul.f32 %v3899_v61, %v1357_v63  ;;  %v3901_v5 = vpop.eup %3900 }
 0x8bb   :  { %v1360_v9 = vmul.f32 %v3901_v5, %v1343_v62  ;;  %vm1365_vm15 = vweird.f32 %v3901_v5 }
 0x8bc   :  { %1393 = vrot.lane.b32.xlu1 %v1390_v8, %s4145_s3  ;;  %vm1366_vm4 = vmor %vm1364_vm1, %vm1365_vm15 }
 0x8bd   :  { %v1361_v12 = vsub.f32 1.0, %v1360_v9 }
 0x8bf   :  { %v1362_v15 = vmul.f32 %v3901_v5, %v1361_v12 }
 0x8c1   :  { %v1363_v10 = vadd.f32 %v3901_v5, %v1362_v15 }
 0x8c3   :  { %v1367_v1 = vsel %vm1366_vm4, %v3901_v5, %v1363_v10 }
 0x8c4   :  { %v1372_v44 = vsel %vm1369_vm5, %v1371_v42, %v1367_v1 }
 0x8d0   :  { %v1383_v3 = vpop.permute.xlu0 %1382 }
 0x8d1   :  { %v4737_v4 = vadd.f32 %v1383_v3, %v1375_v17 }
 0x8d3   :  { %3902 = vtanh.f32 %v4737_v4 }
 0x8d9   :  { %v3903_v43 = vpop.eup %3902 }
 0x8da   :  { %v1391_v46 = vmul.f32 %v3903_v43, %v1372_v44  ;;  %v161_v51 = vpop.f32.mrf.mxu0  ;;  %v226_v55 = vpop.f32.mrf.mxu1 }
 0x8db   :  { %v162_v52 = vadd.f32 %v161_v51, %v4361_v29  ;;  %v227_v19 = vadd.f32 %v226_v55, %v4365_v39 }
 0x8dc   :  { %1399 = vrot.lane.b32.xlu2 %v1391_v46, %s4145_s3 }
 0x8e2   :  { %v164_v60 = vpop.f32.mrf.mxu0  ;;  %v229_v56 = vpop.f32.mrf.mxu1 }
 0x8e3   :  { %v165_v13 = vadd.f32 %v164_v60, %v4361_v29  ;;  %v230_v28 = vadd.f32 %v229_v56, %v4365_v39 }
 0x92e   :  { %v1394_v48 = vpop.permute.xlu1 %1393 }
 0x92f   :  { %1396 = vst.msk [vmem:[#allocation3 + $0x50] sm:$0xff] %vm59_vm0, %v1394_v48  ;;  %3632 = vmatmul.msk.f32.vlgmr.msra.gmra.mxu2 %vm293_vm2, %v1394_v48  ;;  %3634 = vmatmul.msk.f32.vlgmr.msra.gmra.mxu3 %vm293_vm2, %v1394_v48 }
 0x930   :  { %1397 = vst.msk [vmem:[#allocation3 + $0x28] sm:$0xff] %vm59_vm0, %v1394_v48 }
 0x936   :  { %v1400_v50 = vpop.permute.xlu2 %1399 }
 0x937   :  { %1402 = vst.msk [vmem:[#allocation3 + $0x20] sm:$0xff] %vm456_vm3, %v1400_v50  ;;  %3633 = vmatmul.msk.f32.gmra.mxu2 %vm293_vm2, %v1400_v50  ;;  %3635 = vmatmul.msk.f32.gmra.mxu3 %vm293_vm2, %v1400_v50 }
 0x938   :  { %1403 = vst.msk [vmem:[#allocation3 + $0x58] sm:$0xff] %vm456_vm3, %v1400_v50 }
 0x9b2   :  { %v1448_v53 = vpop.f32.mrf.mxu2  ;;  %v1471_v45 = vpop.f32.mrf.mxu3 }
 0x9b3   :  { %v1477_v54 = vadd.f32 %v1448_v53, %v162_v52  ;;  %v1478_v20 = vadd.f32 %v1471_v45, %v227_v19 }
 0x9b5   :  { %v3636_v7 = vmul.f32 -1.442695, %v1477_v54  ;;  %v3638_v3 = vmul.f32 -1.442695, %v1478_v20 }
 0x9b7   :  { %3904 = vpow2.f32 %v3636_v7 }
 0x9ba   :  { %v1451_v0 = vpop.f32.mrf.mxu2  ;;  %v1474_v49 = vpop.f32.mrf.mxu3 }
 0x9bb   :  { %v1479_v2 = vadd.f32 %v1451_v0, %v165_v13  ;;  %v1480_v35 = vadd.f32 %v1474_v49, %v230_v28 }
 0x9bd   :  { %v3905_v6 = vpop.eup %3904  ;;  %v3637_v31 = vmul.f32 -1.442695, %v1479_v2  ;;  %v3639_v10 = vmul.f32 -1.442695, %v1480_v35 }
 0x9be   :  { %v1487_v16 = vadd.f32 1.0, %v3905_v6 }
 0x9bf   :  { %3906 = vpow2.f32 %v3637_v31 }
 0x9c0   :  { %3908 = vrcp.f32 %v1487_v16  ;;  %v1500_v30 = vand.u32 2147483648, %v1487_v16  ;;  %v1498_v25 = vand.u32 2147483647, %v1487_v16  ;;  %vm1494_vm7 = vweird.f32 %v1487_v16 }
 0x9c2   :  { %v1501_v36 = vor.u32 1.1754944e-38, %v1500_v30  ;;  %vm1499_vm9 = vcmp.eq.f32.partialorder %v1498_v25, 8.507059e+37  ;;  %v44_v30 = vld [vmem:[%s5478_s0 + $0x78] sm:$0xff] }
 0x9c5   :  { %v3907_v22 = vpop.eup %3906 }
 0x9c6   :  { %v3909_v24 = vpop.eup %3908  ;;  %v1488_v23 = vadd.f32 1.0, %v3907_v22 }
 0x9c7   :  { %v1490_v14 = vmul.f32 %v3909_v24, %v1487_v16  ;;  %vm1495_vm6 = vweird.f32 %v3909_v24 }
 0x9c8   :  { %3910 = vrcp.f32 %v1488_v23  ;;  %vm1496_vm8 = vmor %vm1494_vm7, %vm1495_vm6  ;;  %v1515_v61 = vand.u32 2147483648, %v1488_v23  ;;  %v1513_v63 = vand.u32 2147483647, %v1488_v23  ;;  %vm1509_vm11 = vweird.f32 %v1488_v23 }
 0x9c9   :  { %v1491_v27 = vsub.f32 1.0, %v1490_v14  ;;  %3912 = vtanh.f32 %v1478_v20 }
 0x9ca   :  { %3914 = vtanh.f32 %v1480_v35  ;;  %v1516_v5 = vor.u32 1.1754944e-38, %v1515_v61  ;;  %vm1514_vm13 = vcmp.eq.f32.partialorder %v1513_v63, 8.507059e+37 }
 0x9cb   :  { %v1492_v32 = vmul.f32 %v3909_v24, %v1491_v27  ;;  %3916 = vpow2.f32 %v3638_v3  ;;  %v43_v27 = vld [vmem:[%s5478_s0 + $0x70] sm:$0xff] }
 0x9cc   :  { %3918 = vpow2.f32 %v3639_v10  ;;  %3570 = vmatmul.msk.f32.gmra.mxu0 %vm59_vm0, %v43_v27  ;;  %3586 = vmatmul.msk.f32.gmra.mxu1 %vm59_vm0, %v43_v27 }
 0x9cd   :  { %v1493_v33 = vadd.f32 %v3909_v24, %v1492_v32 }
 0x9ce   :  { %v3911_v34 = vpop.eup %3910 }
 0x9cf   :  { %v1505_v38 = vmul.f32 %v3911_v34, %v1488_v23  ;;  %v1497_v40 = vsel %vm1496_vm8, %v3909_v24, %v1493_v33  ;;  %v3913_v57 = vpop.eup %3912  ;;  %vm1510_vm10 = vweird.f32 %v3911_v34 }
 0x9d0   :  { %v1502_v58 = vsel %vm1499_vm9, %v1501_v36, %v1497_v40  ;;  %vm1511_vm12 = vmor %vm1509_vm11, %vm1510_vm10  ;;  %v3915_v12 = vpop.eup %3914 }
 0x9d1   :  { %v1561_v18 = vmul.f32 %v3913_v57, %v1502_v58  ;;  %v1506_v59 = vsub.f32 1.0, %v1505_v38  ;;  %v3917_v11 = vpop.eup %3916  ;;  %v1559_v50 = vmul.f32 %v1502_v58, %v4732_v37 }
 0x9d2   :  { %v1527_v41 = vadd.f32 1.0, %v3917_v11  ;;  %v3919_v1 = vpop.eup %3918 }
 0x9d3   :  { %1565 = vrot.lane.b32.xlu0 %v1561_v18, %s4145_s3  ;;  %v1507_v62 = vmul.f32 %v3911_v34, %v1506_v59  ;;  %v1528_v42 = vadd.f32 1.0, %v3919_v1 }
 0x9d4   :  { %3920 = vrcp.f32 %v1527_v41  ;;  %v1540_v60 = vand.u32 2147483648, %v1527_v41  ;;  %vm1534_vm15 = vweird.f32 %v1527_v41  ;;  %v1538_v7 = vand.u32 2147483647, %v1527_v41  ;;  %3571 = vmatmul.msk.f32.gmra.mxu0 %vm59_vm0, %v44_v30  ;;  %3587 = vmatmul.msk.f32.gmra.mxu1 %vm59_vm0, %v44_v30 }
 0x9d5   :  { %v1508_v8 = vadd.f32 %v3911_v34, %v1507_v62  ;;  %3922 = vrcp.f32 %v1528_v42  ;;  %v1555_v22 = vand.u32 2147483648, %v1528_v42  ;;  %vm1549_vm6 = vweird.f32 %v1528_v42 }
 0x9d6   :  { %v1541_v6 = vor.u32 1.1754944e-38, %v1540_v60  ;;  %vm1539_vm4 = vcmp.eq.f32.partialorder %v1538_v7, 8.507059e+37  ;;  %v1553_v24 = vand.u32 2147483647, %v1528_v42 }
 0x9d7   :  { %v1512_v9 = vsel %vm1511_vm12, %v3911_v34, %v1508_v8 }
 0x9d8   :  { %v1517_v15 = vsel %vm1514_vm13, %v1516_v5, %v1512_v9  ;;  %vm1554_vm8 = vcmp.eq.f32.partialorder %v1553_v24, 8.507059e+37 }
 0x9d9   :  { %v1562_v17 = vmul.f32 %v3915_v12, %v1517_v15  ;;  %v1560_v2 = vmul.f32 %v1517_v15, %v4737_v4  ;;  %v1556_v4 = vor.u32 1.1754944e-38, %v1555_v22 }
 0x9da   :  { %v3921_v43 = vpop.eup %3920 }
 0x9db   :  { %1567 = vrot.lane.b32.xlu1 %v1562_v17, %s4145_s3  ;;  %v1530_v44 = vmul.f32 %v3921_v43, %v1527_v41  ;;  %v3923_v21 = vpop.eup %3922  ;;  %vm1535_vm14 = vweird.f32 %v3921_v43 }
 0x9dc   :  { %v1545_v48 = vmul.f32 %v3923_v21, %v1528_v42  ;;  %vm1536_vm1 = vmor %vm1534_vm15, %vm1535_vm14  ;;  %vm1550_vm5 = vweird.f32 %v3923_v21 }
 0x9dd   :  { %v1531_v46 = vsub.f32 1.0, %v1530_v44  ;;  %vm1551_vm7 = vmor %vm1549_vm6, %vm1550_vm5 }
 0x9de   :  { %v1546_v54 = vsub.f32 1.0, %v1545_v48 }
 0x9df   :  { %v1532_v47 = vmul.f32 %v3921_v43, %v1531_v46 }
 0x9e0   :  { %v1547_v0 = vmul.f32 %v3923_v21, %v1546_v54 }
 0x9e1   :  { %v1533_v53 = vadd.f32 %v3921_v43, %v1532_v47 }
 0x9e2   :  { %v1548_v19 = vadd.f32 %v3923_v21, %v1547_v0 }
 0x9e3   :  { %v1537_v13 = vsel %vm1536_vm1, %v3921_v43, %v1533_v53 }
 0x9e4   :  { %v1542_v16 = vsel %vm1539_vm4, %v1541_v6, %v1537_v13  ;;  %v1552_v20 = vsel %vm1551_vm7, %v3923_v21, %v1548_v19 }
 0x9e5   :  { %v1557_v14 = vsel %vm1554_vm8, %v1556_v4, %v1552_v20 }
 0xa45   :  { %v1566_v51 = vpop.permute.xlu0 %1565 }
 0xa46   :  { %v4766_v52 = vadd.f32 %v1566_v51, %v1559_v50 }
 0xa48   :  { %3924 = vtanh.f32 %v4766_v52 }
 0xa49   :  { %v167_v32 = vpop.f32.mrf.mxu0  ;;  %v232_v40 = vpop.f32.mrf.mxu1 }
 0xa4a   :  { %v168_v25 = vadd.f32 %v167_v32, %v4361_v29  ;;  %v233_v57 = vadd.f32 %v232_v40, %v4365_v39  ;;  %v1805_v40 = vld [vmem:[%s5480_s4 + $0x78] sm:$0xff] }
 0xa4b   :  { %1933 = vmatpush.msrb.mxu1 %v1805_v40 }
 0xa4d   :  { %v1568_v55 = vpop.permute.xlu1 %1567 }
 0xa4e   :  { %v3925_v37 = vpop.eup %3924  ;;  %v4770_v31 = vadd.f32 %v1568_v55, %v1560_v2 }
 0xa4f   :  { %v1575_v45 = vmul.f32 %v3925_v37, %v1542_v16 }
 0xa50   :  { %3926 = vtanh.f32 %v4770_v31 }
 0xa51   :  { %1578 = vrot.lane.b32.xlu2 %v1575_v45, %s4145_s3  ;;  %v170_v9 = vpop.f32.mrf.mxu0  ;;  %v235_v21 = vpop.f32.mrf.mxu1 }
 0xa52   :  { %v171_v17 = vadd.f32 %v170_v9, %v4361_v29  ;;  %v236_v47 = vadd.f32 %v235_v21, %v4365_v39  ;;  %v1792_v21 = vld [vmem:[%s5480_s4 + $0x10] sm:$0xff] }
 0xa56   :  { %v3927_v23 = vpop.eup %3926 }
 0xa57   :  { %v1576_v56 = vmul.f32 %v3927_v23, %v1557_v14 }
 0xa59   :  { %1584 = vrot.lane.b32.xlu0 %v1576_v56, %s4145_s3 }
 0xaab   :  { %v1579_v28 = vpop.permute.xlu2 %1578 }
 0xaac   :  { %1581 = vst.msk [vmem:[#allocation3 + $0x60] sm:$0xff] %vm59_vm0, %v1579_v28  ;;  %3640 = vmatmul.msk.f32.vlgmr.msrb.gmra.mxu2 %vm293_vm2, %v1579_v28  ;;  %3642 = vmatmul.msk.f32.vlgmr.msrb.gmra.mxu3 %vm293_vm2, %v1579_v28 }
 0xaad   :  { %1582 = vst.msk [vmem:[#allocation3 + $0x18] sm:$0xff] %vm59_vm0, %v1579_v28 }
 0xacb   :  { %v1585_v49 = vpop.permute.xlu0 %1584 }
 0xacc   :  { %1587 = vst.msk [vmem:[#allocation3 + $0x10] sm:$0xff] %vm456_vm3, %v1585_v49  ;;  %3641 = vmatmul.msk.f32.gmra.mxu2 %vm293_vm2, %v1585_v49  ;;  %3643 = vmatmul.msk.f32.gmra.mxu3 %vm293_vm2, %v1585_v49 }
 0xacd   :  { %1588 = vst.msk [vmem:[#allocation3 + $0x68] sm:$0xff] %vm456_vm3, %v1585_v49 }
 0xb2f   :  { %v1633_v33 = vpop.f32.mrf.mxu2  ;;  %v1656_v58 = vpop.f32.mrf.mxu3 }
 0xb30   :  { %v1662_v34 = vadd.f32 %v1633_v33, %v168_v25  ;;  %v1663_v59 = vadd.f32 %v1656_v58, %v233_v57  ;;  %v1800_v57 = vld [vmem:[%s5480_s4 + $0x50] sm:$0xff]  ;;  %v1803_v58 = vld [vmem:[%s5480_s4 + $0x68] sm:$0xff] }
 0xb31   :  { %1934 = vmatpush.msrb.mxu1 %v1803_v58 }
 0xb32   :  { %v3644_v35 = vmul.f32 -1.442695, %v1662_v34  ;;  %v3646_v39 = vmul.f32 -1.442695, %v1663_v59 }
 0xb34   :  { %3928 = vpow2.f32 %v3644_v35 }
 0xb3a   :  { %v3929_v36 = vpop.eup %3928 }
 0xb3b   :  { %v1672_v38 = vadd.f32 1.0, %v3929_v36 }
 0xb3d   :  { %3930 = vrcp.f32 %v1672_v38  ;;  %v1685_v63 = vand.u32 2147483648, %v1672_v38  ;;  %v1683_v5 = vand.u32 2147483647, %v1672_v38  ;;  %vm1679_vm10 = vweird.f32 %v1672_v38 }
 0xb3e   :  { %3932 = vtanh.f32 %v1663_v59  ;;  %v1801_v59 = vld [vmem:[%s5480_s4 + $0x58] sm:$0xff] }
 0xb3f   :  { %v1686_v15 = vor.u32 1.1754944e-38, %v1685_v63  ;;  %vm1684_vm12 = vcmp.eq.f32.partialorder %v1683_v5, 8.507059e+37  ;;  %1935 = vmatpush.msrb.mxu1 %v1801_v59 }
 0xb43   :  { %v3931_v18 = vpop.eup %3930 }
 0xb44   :  { %v1675_v61 = vmul.f32 %v3931_v18, %v1672_v38  ;;  %vm1680_vm9 = vweird.f32 %v3931_v18  ;;  %v3933_v10 = vpop.eup %3932  ;;  %v1802_v38 = vld [vmem:[%s5480_s4 + $0x60] sm:$0xff] }
 0xb45   :  { %vm1681_vm11 = vmor %vm1679_vm10, %vm1680_vm9 }
 0xb46   :  { %v1676_v62 = vsub.f32 1.0, %v1675_v61 }
 0xb48   :  { %v1677_v8 = vmul.f32 %v3931_v18, %v1676_v62 }
 0xb4a   :  { %v1678_v12 = vadd.f32 %v3931_v18, %v1677_v8 }
 0xb4c   :  { %v1682_v3 = vsel %vm1681_vm11, %v3931_v18, %v1678_v12  ;;  %v1798_v18 = vld [vmem:[%s5480_s4 + $0x40] sm:$0xff] }
 0xb4d   :  { %v1687_v11 = vsel %vm1684_vm12, %v1686_v15, %v1682_v3 }
 0xb4e   :  { %v1746_v41 = vmul.f32 %v3933_v10, %v1687_v11  ;;  %v1744_v4 = vmul.f32 %v1687_v11, %v4766_v52  ;;  %v1804_v52 = vld [vmem:[%s5480_s4 + $0x70] sm:$0xff] }
 0xb4f   :  { %v1636_v1 = vpop.f32.mrf.mxu2  ;;  %v1659_v48 = vpop.f32.mrf.mxu3  ;;  %1868 = vmatpush.msrb.mxu0 %v1804_v52  ;;  %v1787_v52 = vld [vmem:[#allocation3 + $0x68] sm:$0xff] }
 0xb50   :  { %v1664_v42 = vadd.f32 %v1636_v1, %v171_v17  ;;  %1750 = vrot.lane.b32.xlu2 %v1746_v41, %s4145_s3  ;;  %v1665_v29 = vadd.f32 %v1659_v48, %v236_v47  ;;  %v1795_v47 = vld [vmem:[%s5480_s4 + $0x28] sm:$0xff]  ;;  %v4845_v48 = vld [vmem:[%s5481_s5 + $0x70] sm:$0xff] }
 0xb51   :  { %1869 = vmatpush.msrb.mxu0 %v1802_v38  ;;  %2050 = vmatpush.msra.mxu2 %v4845_v48  ;;  %v1806_v38 = vld [vmem:[%s5482_s6] sm:$0x3] }
 0xb52   :  { %v3645_v43 = vmul.f32 -1.442695, %v1664_v42  ;;  %v3647_v34 = vmul.f32 -1.442695, %v1665_v29  ;;  %v4952_v40 = vperm.slane %v1806_v38, 0 }
 0xb53   :  { %1870 = vmatpush.msrb.mxu0 %v1800_v57 }
 0xb54   :  { %3934 = vpow2.f32 %v3645_v43  ;;  %v1799_v43 = vld [vmem:[%s5480_s4 + $0x48] sm:$0xff] }
 0xb55   :  { %1871 = vmatpush.msrb.mxu0 %v1798_v18  ;;  %1936 = vmatpush.msrb.mxu1 %v1799_v43 }
 0xb5a   :  { %v3935_v44 = vpop.eup %3934 }
 0xb5b   :  { %v1673_v46 = vadd.f32 1.0, %v3935_v44  ;;  %v1794_v44 = vld [vmem:[%s5480_s4 + $0x20] sm:$0xff] }
 0xb5d   :  { %3936 = vrcp.f32 %v1673_v46  ;;  %v1700_v54 = vand.u32 2147483648, %v1673_v46  ;;  %v1698_v7 = vand.u32 2147483647, %v1673_v46  ;;  %vm1694_vm14 = vweird.f32 %v1673_v46 }
 0xb5e   :  { %3938 = vtanh.f32 %v1665_v29  ;;  %v2038_v29 = vld [vmem:[%s5481_s5 + $0x60] sm:$0xff] }
 0xb5f   :  { %v1701_v0 = vor.u32 1.1754944e-38, %v1700_v54  ;;  %vm1699_vm1 = vcmp.eq.f32.partialorder %v1698_v7, 8.507059e+37  ;;  %3940 = vpow2.f32 %v3646_v39  ;;  %v2036_v54 = vld [vmem:[%s5481_s5 + $0x50] sm:$0xff]  ;;  %v1793_v7 = vld [vmem:[%s5480_s4 + $0x18] sm:$0xff]  ;;  %2051 = vmatpush.msra.mxu2 %v2038_v29 }
 0xb61   :  { %2052 = vmatpush.msra.mxu2 %v2036_v54 }
 0xb63   :  { %v3937_v50 = vpop.eup %3936 }
 0xb64   :  { %v1690_v51 = vmul.f32 %v3937_v50, %v1673_v46  ;;  %vm1695_vm13 = vweird.f32 %v3937_v50  ;;  %v3939_v6 = vpop.eup %3938  ;;  %v1797_v46 = vld [vmem:[%s5480_s4 + $0x38] sm:$0xff] }
 0xb65   :  { %vm1696_vm15 = vmor %vm1694_vm14, %vm1695_vm13  ;;  %v3941_v16 = vpop.eup %3940  ;;  %1937 = vmatpush.msrb.mxu1 %v1797_v46 }
 0xb66   :  { %v1691_v53 = vsub.f32 1.0, %v1690_v51  ;;  %v1712_v45 = vadd.f32 1.0, %v3941_v16  ;;  %v2039_v51 = vld [vmem:[%s5481_s5 + $0x68] sm:$0xff]  ;;  %v2028_v16 = vld [vmem:[%s5481_s5 + $0x10] sm:$0xff] }
 0xb67   :  { %1938 = vmatpush.msrb.mxu1 %v1795_v47 }
 0xb68   :  { %v1692_v60 = vmul.f32 %v3937_v50, %v1691_v53  ;;  %3942 = vrcp.f32 %v1712_v45  ;;  %v1725_v27 = vand.u32 2147483648, %v1712_v45  ;;  %vm1719_vm5 = vweird.f32 %v1712_v45  ;;  %v1790_v53 = vld [vmem:[%s5480_s4] sm:$0xff] }
 0xb69   :  { %v1723_v28 = vand.u32 2147483647, %v1712_v45  ;;  %1939 = vmatpush.msrb.mxu1 %v1793_v7 }
 0xb6a   :  { %v1693_v13 = vadd.f32 %v3937_v50, %v1692_v60  ;;  %v1726_v49 = vor.u32 1.1754944e-38, %v1725_v27  ;;  %v2037_v60 = vld [vmem:[%s5481_s5 + $0x58] sm:$0xff]  ;;  %v1779_v27 = vld [vmem:[#allocation3 + $0x28] sm:$0xff] }
 0xb6b   :  { %vm1724_vm7 = vcmp.eq.f32.partialorder %v1723_v28, 8.507059e+37  ;;  %v1780_v28 = vld [vmem:[#allocation3 + $0x30] sm:$0xff] }
 0xb6c   :  { %v1697_v2 = vsel %vm1696_vm15, %v3937_v50, %v1693_v13  ;;  %v4850_v50 = vld [vmem:[%s5481_s5 + $0x78] sm:$0xff]  ;;  %v2034_v13 = vld [vmem:[%s5481_s5 + $0x40] sm:$0xff] }
 0xb6d   :  { %v1702_v55 = vsel %vm1699_vm1, %v1701_v0, %v1697_v2  ;;  %2073 = vmatpush.msra.mxu3 %v4850_v50  ;;  %v2035_v0 = vld [vmem:[%s5481_s5 + $0x48] sm:$0xff]  ;;  %v2032_v2 = vld [vmem:[%s5481_s5 + $0x30] sm:$0xff]  ;;  %2053 = vmatpush.msra.mxu2 %v2034_v13 }
 0xb6e   :  { %v1747_v37 = vmul.f32 %v3939_v6, %v1702_v55  ;;  %v3943_v19 = vpop.eup %3942  ;;  %v1745_v5 = vmul.f32 %v1702_v55, %v4770_v31  ;;  %v1796_v31 = vld [vmem:[%s5480_s4 + $0x30] sm:$0xff]  ;;  %v2033_v6 = vld [vmem:[%s5481_s5 + $0x38] sm:$0xff]  ;;  %v2030_v55 = vld [vmem:[%s5481_s5 + $0x20] sm:$0xff] }
 0xb6f   :  { %v1715_v22 = vmul.f32 %v3943_v19, %v1712_v45  ;;  %vm1720_vm4 = vweird.f32 %v3943_v19  ;;  %1872 = vmatpush.msrb.mxu0 %v1796_v31  ;;  %2074 = vmatpush.msra.mxu3 %v2039_v51  ;;  %v2029_v45 = vld [vmem:[%s5481_s5 + $0x18] sm:$0xff] }
 0xb70   :  { %1752 = vrot.lane.b32.xlu1 %v1747_v37, %s4145_s3  ;;  %vm1721_vm6 = vmor %vm1719_vm5, %vm1720_vm4  ;;  %v2031_v37 = vld [vmem:[%s5481_s5 + $0x28] sm:$0xff]  ;;  %2054 = vmatpush.msra.mxu2 %v2032_v2 }
 0xb71   :  { %v1716_v24 = vsub.f32 1.0, %v1715_v22  ;;  %1873 = vmatpush.msrb.mxu0 %v1794_v44  ;;  %2075 = vmatpush.msra.mxu3 %v2037_v60  ;;  %v2027_v22 = vld [vmem:[%s5481_s5 + $0x8] sm:$0xff] }
 0xb72   :  { %2055 = vmatpush.msra.mxu2 %v2030_v55 }
 0xb73   :  { %v1717_v20 = vmul.f32 %v3943_v19, %v1716_v24  ;;  %1874 = vmatpush.msrb.mxu0 %v1792_v21  ;;  %2076 = vmatpush.msra.mxu3 %v2035_v0  ;;  %v1791_v24 = vld [vmem:[%s5480_s4 + $0x8] sm:$0xff] }
 0xb74   :  { %2056 = vmatpush.msra.mxu2 %v2028_v16  ;;  %1940 = vmatpush.msrb.mxu1 %v1791_v24 }
 0xb75   :  { %v1718_v56 = vadd.f32 %v3943_v19, %v1717_v20  ;;  %1875 = vmatpush.msrb.mxu0 %v1790_v53  ;;  %2077 = vmatpush.msra.mxu3 %v2033_v6 }
 0xb77   :  { %v1722_v30 = vsel %vm1721_vm6, %v3943_v19, %v1718_v56  ;;  %2078 = vmatpush.msra.mxu3 %v2031_v37  ;;  %v2026_v19 = vld [vmem:[%s5481_s5] sm:$0xff] }
 0xb78   :  { %v1727_v25 = vsel %vm1724_vm7, %v1726_v49, %v1722_v30  ;;  %2057 = vmatpush.msra.mxu2 %v2026_v19  ;;  %v1778_v56 = vld [vmem:[#allocation3 + $0x20] sm:$0xff]  ;;  %v1781_v30 = vld [vmem:[#allocation3 + $0x38] sm:$0xff] }
 0xb79   :  { %2079 = vmatpush.msra.mxu3 %v2029_v45  ;;  %2058 = vmatmul.f32.vlgmr.msra.gmra.mxu2 %v4144_v26  ;;  %v1782_v49 = vld [vmem:[#allocation3 + $0x40] sm:$0xff] }
 0xb7a   :  { %2231 = vmatpush.msrb.mxu2 %v4845_v48 }
 0xb7b   :  { %2080 = vmatpush.msra.mxu3 %v2027_v22 }
 0xb7c   :  { %2081 = vmatmul.f32.vlgmr.msra.gmra.mxu3 %v4144_v26  ;;  %2232 = vmatpush.msrb.mxu2 %v2038_v29 }
 0xb7d   :  { %2254 = vmatpush.msrb.mxu3 %v4850_v50 }
 0xb7e   :  { %2233 = vmatpush.msrb.mxu2 %v2036_v54 }
 0xb7f   :  { %2255 = vmatpush.msrb.mxu3 %v2039_v51 }
 0xb80   :  { %2234 = vmatpush.msrb.mxu2 %v2034_v13 }
 0xb81   :  { %2256 = vmatpush.msrb.mxu3 %v2037_v60  ;;  %2061 = vmatmul.f32.gmra.mxu2 %v4144_v26 }
 0xb82   :  { %2235 = vmatpush.msrb.mxu2 %v2032_v2 }
 0xb83   :  { %2257 = vmatpush.msrb.mxu3 %v2035_v0 }
 0xb84   :  { %2084 = vmatmul.f32.gmra.mxu3 %v4144_v26  ;;  %2236 = vmatpush.msrb.mxu2 %v2030_v55 }
 0xb85   :  { %2258 = vmatpush.msrb.mxu3 %v2033_v6 }
 0xb86   :  { %2237 = vmatpush.msrb.mxu2 %v2028_v16 }
 0xb87   :  { %2259 = vmatpush.msrb.mxu3 %v2031_v37 }
 0xb88   :  { %2238 = vmatpush.msrb.mxu2 %v2026_v19 }
 0xb89   :  { %2260 = vmatpush.msrb.mxu3 %v2029_v45 }
 0xb8a   :  { %2413 = vmatpush.msra.mxu2 %v4845_v48 }
 0xb8b   :  { %2261 = vmatpush.msrb.mxu3 %v2027_v22 }
 0xb8c   :  { %2414 = vmatpush.msra.mxu2 %v2038_v29 }
 0xb8d   :  { %2436 = vmatpush.msra.mxu3 %v4850_v50 }
 0xb8e   :  { %2415 = vmatpush.msra.mxu2 %v2036_v54 }
 0xb8f   :  { %2437 = vmatpush.msra.mxu3 %v2039_v51 }
 0xb90   :  { %2416 = vmatpush.msra.mxu2 %v2034_v13 }
 0xb91   :  { %2438 = vmatpush.msra.mxu3 %v2037_v60 }
 0xb92   :  { %2417 = vmatpush.msra.mxu2 %v2032_v2 }
 0xb93   :  { %2439 = vmatpush.msra.mxu3 %v2035_v0 }
 0xb94   :  { %2418 = vmatpush.msra.mxu2 %v2030_v55 }
 0xb95   :  { %2440 = vmatpush.msra.mxu3 %v2033_v6 }
 0xb96   :  { %2419 = vmatpush.msra.mxu2 %v2028_v16 }
 0xb97   :  { %2441 = vmatpush.msra.mxu3 %v2031_v37 }
 0xb98   :  { %2420 = vmatpush.msra.mxu2 %v2026_v19 }
 0xb99   :  { %2442 = vmatpush.msra.mxu3 %v2029_v45 }
 0xb9b   :  { %2443 = vmatpush.msra.mxu3 %v2027_v22 }
 0xbaa   :  { %v1751_v23 = vpop.permute.xlu2 %1750 }
 0xbab   :  { %v1756_v14 = vadd.f32 %v1751_v23, %v1744_v4  ;;  %v1776_v23 = vld [vmem:[#allocation3 + $0x10] sm:$0xff] }
 0xbad   :  { %3944 = vtanh.f32 %v1756_v14  ;;  %v1777_v14 = vld [vmem:[#allocation3 + $0x18] sm:$0xff] }
 0xbae   :  { %3946 = vpow2.f32 %v3647_v34  ;;  %v1786_v34 = vld [vmem:[#allocation3 + $0x60] sm:$0xff] }
 0xbb3   :  { %v3945_v32 = vpop.eup %3944 }
 0xbb4   :  { %v1760_v33 = vmul.f32 %v3945_v32, %v1727_v25  ;;  %v3947_v35 = vpop.eup %3946  ;;  %v1783_v32 = vld [vmem:[#allocation3 + $0x48] sm:$0xff]  ;;  %v1784_v25 = vld [vmem:[#allocation3 + $0x50] sm:$0xff] }
 0xbb5   :  { %v1713_v36 = vadd.f32 1.0, %v3947_v35 }
 0xbb6   :  { %1763 = vrot.lane.b32.xlu1 %v1760_v33, %s4145_s3  ;;  %v1785_v33 = vld [vmem:[#allocation3 + $0x58] sm:$0xff] }
 0xbb7   :  { %3948 = vrcp.f32 %v1713_v36  ;;  %v1740_v17 = vand.u32 2147483648, %v1713_v36  ;;  %vm1734_vm9 = vweird.f32 %v1713_v36  ;;  %v1738_v3 = vand.u32 2147483647, %v1713_v36 }
 0xbb9   :  { %v1741_v11 = vor.u32 1.1754944e-38, %v1740_v17  ;;  %vm1739_vm11 = vcmp.eq.f32.partialorder %v1738_v3, 8.507059e+37  ;;  %v4956_v17 = vperm.slane %v1806_v38, 1 }
 0xbbd   :  { %v3949_v61 = vpop.eup %3948 }
 0xbbe   :  { %v1730_v62 = vmul.f32 %v3949_v61, %v1713_v36  ;;  %vm1735_vm8 = vweird.f32 %v3949_v61 }
 0xbbf   :  { %vm1736_vm10 = vmor %vm1734_vm9, %vm1735_vm8 }
 0xbc0   :  { %v1731_v63 = vsub.f32 1.0, %v1730_v62 }
 0xbc2   :  { %v1732_v8 = vmul.f32 %v3949_v61, %v1731_v63 }
 0xbc4   :  { %v1733_v15 = vadd.f32 %v3949_v61, %v1732_v8 }
 0xbc6   :  { %v1737_v10 = vsel %vm1736_vm10, %v3949_v61, %v1733_v15 }
 0xbc7   :  { %v1742_v1 = vsel %vm1739_vm11, %v1741_v11, %v1737_v10 }
 0xbe2   :  { %v1753_v9 = vpop.permute.xlu1 %1752 }
 0xbe3   :  { %v1757_v12 = vadd.f32 %v1753_v9, %v1745_v5 }
 0xbe5   :  { %3950 = vtanh.f32 %v1757_v12 }
 0xbeb   :  { %v3951_v41 = vpop.eup %3950 }
 0xbec   :  { %v1761_v42 = vmul.f32 %v3951_v41, %v1742_v1 }
 0xbee   :  { %1769 = vrot.lane.b32.xlu0 %v1761_v42, %s4145_s3 }
 0xbfc   :  { %v2059_v57 = vpop.f32.mrf.mxu2 }
 0xbff   :  { %v2082_v10 = vpop.f32.mrf.mxu3 }
 0xc04   :  { %v2062_v63 = vpop.f32.mrf.mxu2 }
 0xc07   :  { %v2085_v48 = vpop.f32.mrf.mxu3 }
 0xc28   :  { %v1764_v39 = vpop.permute.xlu1 %1763 }
 0xc29   :  { %1766 = vst.msk [vmem:[#allocation3 + $0x70] sm:$0xff] %vm59_vm0, %v1764_v39 }
 0xc2a   :  { %1767 = vst.msk [vmem:[#allocation3 + $0x8] sm:$0xff] %vm59_vm0, %v1764_v39 }
 0xc30   :  { %v1788_v35 = vld [vmem:[#allocation3 + $0x70] sm:$0xff] }
 0xc31   :  { %v1775_v4 = vld [vmem:[#allocation3 + $0x8] sm:$0xff] }
 0xc60   :  { %v1770_v26 = vpop.permute.xlu0 %1769 }
 0xc61   :  { %1772 = vst.msk [vmem:[#allocation3] sm:$0xff] %vm456_vm3, %v1770_v26 }
 0xc62   :  { %1773 = vst.msk [vmem:[#allocation3 + $0x78] sm:$0xff] %vm456_vm3, %v1770_v26 }
 0xc68   :  { %v1774_v20 = vld [vmem:[#allocation3] sm:$0xff] }
 0xc69   :  { %3648 = vmatmul.msk.f32.vlgmr.msrb.gmra.mxu0 %vm293_vm2, %v1774_v20  ;;  %3664 = vmatmul.msk.f32.vlgmr.msrb.gmra.mxu1 %vm293_vm2, %v1774_v20  ;;  %v1789_v36 = vld [vmem:[#allocation3 + $0x78] sm:$0xff] }
 0xc71   :  { %3649 = vmatmul.msk.f32.gmra.mxu0 %vm293_vm2, %v1775_v4  ;;  %3665 = vmatmul.msk.f32.gmra.mxu1 %vm293_vm2, %v1775_v4 }
 0xc79   :  { %3650 = vmatmul.msk.f32.gmra.mxu0 %vm293_vm2, %v1776_v23  ;;  %3666 = vmatmul.msk.f32.gmra.mxu1 %vm293_vm2, %v1776_v23 }
 0xc81   :  { %3651 = vmatmul.msk.f32.gmra.mxu0 %vm293_vm2, %v1777_v14  ;;  %3667 = vmatmul.msk.f32.gmra.mxu1 %vm293_vm2, %v1777_v14 }
 0xc89   :  { %3652 = vmatmul.msk.f32.gmra.mxu0 %vm293_vm2, %v1778_v56  ;;  %3668 = vmatmul.msk.f32.gmra.mxu1 %vm293_vm2, %v1778_v56 }
 0xc91   :  { %3653 = vmatmul.msk.f32.gmra.mxu0 %vm293_vm2, %v1779_v27  ;;  %3669 = vmatmul.msk.f32.gmra.mxu1 %vm293_vm2, %v1779_v27 }
 0xc99   :  { %3654 = vmatmul.msk.f32.gmra.mxu0 %vm293_vm2, %v1780_v28  ;;  %3670 = vmatmul.msk.f32.gmra.mxu1 %vm293_vm2, %v1780_v28 }
 0xca1   :  { %3655 = vmatmul.msk.f32.gmra.mxu0 %vm293_vm2, %v1781_v30  ;;  %3671 = vmatmul.msk.f32.gmra.mxu1 %vm293_vm2, %v1781_v30 }
 0xca9   :  { %3656 = vmatmul.msk.f32.gmra.mxu0 %vm293_vm2, %v1782_v49  ;;  %3672 = vmatmul.msk.f32.gmra.mxu1 %vm293_vm2, %v1782_v49 }
 0xcb1   :  { %3657 = vmatmul.msk.f32.gmra.mxu0 %vm293_vm2, %v1783_v32  ;;  %3673 = vmatmul.msk.f32.gmra.mxu1 %vm293_vm2, %v1783_v32 }
 0xcb9   :  { %3658 = vmatmul.msk.f32.gmra.mxu0 %vm293_vm2, %v1784_v25  ;;  %3674 = vmatmul.msk.f32.gmra.mxu1 %vm293_vm2, %v1784_v25 }
 0xcc1   :  { %3659 = vmatmul.msk.f32.gmra.mxu0 %vm293_vm2, %v1785_v33  ;;  %3675 = vmatmul.msk.f32.gmra.mxu1 %vm293_vm2, %v1785_v33 }
 0xcc9   :  { %3660 = vmatmul.msk.f32.gmra.mxu0 %vm293_vm2, %v1786_v34  ;;  %3676 = vmatmul.msk.f32.gmra.mxu1 %vm293_vm2, %v1786_v34 }
 0xcd1   :  { %3661 = vmatmul.msk.f32.gmra.mxu0 %vm293_vm2, %v1787_v52  ;;  %3677 = vmatmul.msk.f32.gmra.mxu1 %vm293_vm2, %v1787_v52 }
 0xcd9   :  { %3662 = vmatmul.msk.f32.gmra.mxu0 %vm293_vm2, %v1788_v35  ;;  %3678 = vmatmul.msk.f32.gmra.mxu1 %vm293_vm2, %v1788_v35 }
 0xce1   :  { %3663 = vmatmul.msk.f32.gmra.mxu0 %vm293_vm2, %v1789_v36  ;;  %3679 = vmatmul.msk.f32.gmra.mxu1 %vm293_vm2, %v1789_v36 }
 0xce6   :  { %v1877_v58 = vpop.f32.mrf.mxu0  ;;  %v1942_v12 = vpop.f32.mrf.mxu1 }
 0xce7   :  { %v1878_v18 = vadd.f32 %v1877_v58, %v4952_v40  ;;  %v1943_v11 = vadd.f32 %v1942_v12, %v4956_v17 }
 0xce9   :  { %v2088_v59 = vadd.f32 %v2059_v57, %v1878_v18  ;;  %v2089_v42 = vadd.f32 %v2082_v10, %v1943_v11 }
 0xceb   :  { %v3680_v61 = vmul.f32 -1.442695, %v2088_v59  ;;  %v3682_v4 = vmul.f32 -1.442695, %v2089_v42 }
 0xced   :  { %3952 = vpow2.f32 %v3680_v61 }
 0xcee   :  { %v1880_v62 = vpop.f32.mrf.mxu0  ;;  %v1945_v44 = vpop.f32.mrf.mxu1 }
 0xcef   :  { %v1881_v8 = vadd.f32 %v1880_v62, %v4952_v40  ;;  %v1946_v21 = vadd.f32 %v1945_v44, %v4956_v17 }
 0xcf1   :  { %v2090_v5 = vadd.f32 %v2062_v63, %v1881_v8  ;;  %v2091_v54 = vadd.f32 %v2085_v48, %v1946_v21 }
 0xcf3   :  { %v3953_v9 = vpop.eup %3952  ;;  %v3681_v15 = vmul.f32 -1.442695, %v2090_v5  ;;  %v3683_v30 = vmul.f32 -1.442695, %v2091_v54 }
 0xcf4   :  { %v2098_v3 = vadd.f32 1.0, %v3953_v9 }
 0xcf5   :  { %3954 = vpow2.f32 %v3681_v15 }
 0xcf6   :  { %3956 = vrcp.f32 %v2098_v3  ;;  %v2111_v47 = vand.u32 2147483648, %v2098_v3  ;;  %v2109_v29 = vand.u32 2147483647, %v2098_v3  ;;  %vm2105_vm13 = vweird.f32 %v2098_v3  ;;  %v1883_v21 = vpop.f32.mrf.mxu0 }
 0xcf8   :  { %v2112_v60 = vor.u32 1.1754944e-38, %v2111_v47  ;;  %vm2110_vm15 = vcmp.eq.f32.partialorder %v2109_v29, 8.507059e+37  ;;  %v1884_v47 = vadd.f32 %v1883_v21, %v4952_v40 }
 0xcfb   :  { %v3955_v41 = vpop.eup %3954 }
 0xcfc   :  { %v3957_v1 = vpop.eup %3956  ;;  %v2099_v31 = vadd.f32 1.0, %v3955_v41 }
 0xcfd   :  { %v2101_v43 = vmul.f32 %v3957_v1, %v2098_v3  ;;  %vm2106_vm12 = vweird.f32 %v3957_v1 }
 0xcfe   :  { %3958 = vrcp.f32 %v2099_v31  ;;  %vm2107_vm14 = vmor %vm2105_vm13, %vm2106_vm12  ;;  %v2126_v37 = vand.u32 2147483648, %v2099_v31  ;;  %v2124_v16 = vand.u32 2147483647, %v2099_v31  ;;  %vm2120_vm4 = vweird.f32 %v2099_v31 }
 0xcff   :  { %v2102_v46 = vsub.f32 1.0, %v2101_v43  ;;  %3960 = vtanh.f32 %v2089_v42 }
 0xd00   :  { %3962 = vtanh.f32 %v2091_v54  ;;  %v2127_v19 = vor.u32 1.1754944e-38, %v2126_v37  ;;  %vm2125_vm6 = vcmp.eq.f32.partialorder %v2124_v16, 8.507059e+37 }
 0xd01   :  { %v2103_v50 = vmul.f32 %v3957_v1, %v2102_v46  ;;  %3964 = vpow2.f32 %v3682_v4 }
 0xd03   :  { %v2104_v51 = vadd.f32 %v3957_v1, %v2103_v50 }
 0xd04   :  { %v3959_v53 = vpop.eup %3958 }
 0xd05   :  { %v2116_v7 = vmul.f32 %v3959_v53, %v2099_v31  ;;  %v2108_v13 = vsel %vm2107_vm14, %v3957_v1, %v2104_v51  ;;  %v3961_v0 = vpop.eup %3960  ;;  %vm2121_vm1 = vweird.f32 %v3959_v53  ;;  %v1886_v51 = vpop.f32.mrf.mxu0 }
 0xd06   :  { %v2113_v2 = vsel %vm2110_vm15, %v2112_v60, %v2108_v13  ;;  %vm2122_vm5 = vmor %vm2120_vm4, %vm2121_vm1  ;;  %v3963_v24 = vpop.eup %3962 }
 0xd07   :  { %v2172_v6 = vmul.f32 %v3961_v0, %v2113_v2  ;;  %v2117_v55 = vsub.f32 1.0, %v2116_v7  ;;  %v3965_v23 = vpop.eup %3964  ;;  %v2170_v32 = vmul.f32 0.0, %v2113_v2  ;;  %v1948_v2 = vpop.f32.mrf.mxu1 }
 0xd08   :  { %v2138_v14 = vadd.f32 1.0, %v3965_v23 }
 0xd09   :  { %2176 = vrot.lane.b32.xlu2 %v2172_v6, %s4145_s3  ;;  %v2118_v39 = vmul.f32 %v3959_v53, %v2117_v55  ;;  %v1949_v55 = vadd.f32 %v1948_v2, %v4956_v17 }
 0xd0a   :  { %3966 = vrcp.f32 %v2138_v14  ;;  %v2151_v52 = vand.u32 2147483648, %v2138_v14  ;;  %vm2145_vm8 = vweird.f32 %v2138_v14  ;;  %v2149_v35 = vand.u32 2147483647, %v2138_v14 }
 0xd0b   :  { %v2119_v45 = vadd.f32 %v3959_v53, %v2118_v39  ;;  %3968 = vpow2.f32 %v3683_v30 }
 0xd0c   :  { %v2152_v57 = vor.u32 1.1754944e-38, %v2151_v52  ;;  %vm2150_vm10 = vcmp.eq.f32.partialorder %v2149_v35, 8.507059e+37 }
 0xd0d   :  { %v2123_v22 = vsel %vm2122_vm5, %v3959_v53, %v2119_v45  ;;  %v1887_v53 = vadd.f32 %v1886_v51, %v4952_v40 }
 0xd0e   :  { %v2128_v26 = vsel %vm2125_vm6, %v2127_v19, %v2123_v22 }
 0xd0f   :  { %v2173_v20 = vmul.f32 %v3963_v24, %v2128_v26  ;;  %v2171_v9 = vmul.f32 0.0, %v2128_v26  ;;  %v1951_v22 = vpop.f32.mrf.mxu1 }
 0xd10   :  { %v3967_v56 = vpop.eup %3966 }
 0xd11   :  { %2178 = vrot.lane.b32.xlu0 %v2173_v20, %s4145_s3  ;;  %v2141_v27 = vmul.f32 %v3967_v56, %v2138_v14  ;;  %vm2146_vm7 = vweird.f32 %v3967_v56  ;;  %v3969_v36 = vpop.eup %3968  ;;  %v1952_v14 = vadd.f32 %v1951_v22, %v4956_v17 }
 0xd12   :  { %vm2147_vm9 = vmor %vm2145_vm8, %vm2146_vm7  ;;  %v2139_v18 = vadd.f32 1.0, %v3969_v36 }
 0xd13   :  { %v2142_v28 = vsub.f32 1.0, %v2141_v27 }
 0xd14   :  { %v2166_v10 = vand.u32 2147483648, %v2139_v18  ;;  %vm2160_vm12 = vweird.f32 %v2139_v18  ;;  %v2164_v11 = vand.u32 2147483647, %v2139_v18 }
 0xd15   :  { %v2143_v49 = vmul.f32 %v3967_v56, %v2142_v28 }
 0xd16   :  { %v2167_v1 = vor.u32 1.1754944e-38, %v2166_v10  ;;  %vm2165_vm14 = vcmp.eq.f32.partialorder %v2164_v11, 8.507059e+37 }
 0xd17   :  { %v2144_v34 = vadd.f32 %v3967_v56, %v2143_v49 }
 0xd19   :  { %v2148_v38 = vsel %vm2147_vm9, %v3967_v56, %v2144_v34 }
 0xd1a   :  { %v2153_v59 = vsel %vm2150_vm10, %v2152_v57, %v2148_v38 }
 0xd63   :  { %v2177_v25 = vpop.permute.xlu2 %2176 }
 0xd64   :  { %v4962_v33 = vadd.f32 %v2177_v25, %v2170_v32 }
 0xd66   :  { %3970 = vtanh.f32 %v4962_v33 }
 0xd67   :  { %3972 = vrcp.f32 %v2139_v18 }
 0xd6c   :  { %v3971_v58 = vpop.eup %3970 }
 0xd6d   :  { %v2186_v61 = vmul.f32 %v3971_v58, %v2153_v59  ;;  %v3973_v62 = vpop.eup %3972 }
 0xd6e   :  { %v2156_v63 = vmul.f32 %v3973_v62, %v2139_v18  ;;  %vm2161_vm11 = vweird.f32 %v3973_v62 }
 0xd6f   :  { %2189 = vrot.lane.b32.xlu1 %v2186_v61, %s4145_s3  ;;  %vm2162_vm13 = vmor %vm2160_vm12, %vm2161_vm11 }
 0xd70   :  { %v2157_v8 = vsub.f32 1.0, %v2156_v63 }
 0xd72   :  { %v2158_v5 = vmul.f32 %v3973_v62, %v2157_v8 }
 0xd74   :  { %v2159_v3 = vadd.f32 %v3973_v62, %v2158_v5 }
 0xd76   :  { %v2163_v41 = vsel %vm2162_vm13, %v3973_v62, %v2159_v3 }
 0xd77   :  { %v2168_v31 = vsel %vm2165_vm14, %v2167_v1, %v2163_v41 }
 0xd83   :  { %v2179_v12 = vpop.permute.xlu0 %2178 }
 0xd84   :  { %v4966_v15 = vadd.f32 %v2179_v12, %v2171_v9 }
 0xd86   :  { %3974 = vtanh.f32 %v4966_v15 }
 0xd8c   :  { %v3975_v42 = vpop.eup %3974 }
 0xd8d   :  { %v2187_v43 = vmul.f32 %v3975_v42, %v2168_v31 }
 0xd8f   :  { %2194 = vrot.lane.b32.xlu2 %v2187_v43, %s4145_s3 }
 0xde1   :  { %v2190_v44 = vpop.permute.xlu1 %2189 }
 0xde2   :  { %2192 = vst.msk [vmem:[%s5483_s8] sm:$0xff] %vm59_vm0, %v2190_v44  ;;  %3685 = vmatmul.msk.f32.vlgmr.msrb.gmra.mxu2 %vm293_vm2, %v2190_v44  ;;  %3687 = vmatmul.msk.f32.vlgmr.msrb.gmra.mxu3 %vm293_vm2, %v2190_v44 }
 0xde9   :  { %v2195_v46 = vpop.permute.xlu2 %2194 }
 0xdea   :  { %3684 = vst.msk [vmem:[%s5483_s8 + $0x38] sm:$0xff] %vm456_vm3, %v2195_v46  ;;  %3686 = vmatmul.msk.f32.gmra.mxu2 %vm293_vm2, %v2195_v46  ;;  %3688 = vmatmul.msk.f32.gmra.mxu3 %vm293_vm2, %v2195_v46 }
 0xe65   :  { %v2240_v48 = vpop.f32.mrf.mxu2  ;;  %v2263_v6 = vpop.f32.mrf.mxu3 }
 0xe66   :  { %v2269_v50 = vadd.f32 %v2240_v48, %v1884_v47  ;;  %v2270_v16 = vadd.f32 %v2263_v6, %v1949_v55 }
 0xe68   :  { %v3689_v29 = vmul.f32 -1.442695, %v2269_v50  ;;  %v3691_v8 = vmul.f32 -1.442695, %v2270_v16 }
 0xe6a   :  { %3976 = vpow2.f32 %v3689_v29 }
 0xe6d   :  { %v2243_v54 = vpop.f32.mrf.mxu2  ;;  %v2266_v20 = vpop.f32.mrf.mxu3 }
 0xe6e   :  { %v2271_v60 = vadd.f32 %v2243_v54, %v1887_v53  ;;  %v2272_v28 = vadd.f32 %v2266_v20, %v1952_v14 }
 0xe70   :  { %v3977_v7 = vpop.eup %3976  ;;  %v3690_v13 = vmul.f32 -1.442695, %v2271_v60  ;;  %v3692_v5 = vmul.f32 -1.442695, %v2272_v28 }
 0xe71   :  { %v2279_v0 = vadd.f32 1.0, %v3977_v7 }
 0xe72   :  { %3978 = vpow2.f32 %v3690_v13 }
 0xe73   :  { %3980 = vrcp.f32 %v2279_v0  ;;  %v2292_v26 = vand.u32 2147483648, %v2279_v0  ;;  %v2290_v23 = vand.u32 2147483647, %v2279_v0  ;;  %vm2286_vm1 = vweird.f32 %v2279_v0 }
 0xe75   :  { %v2293_v30 = vor.u32 1.1754944e-38, %v2292_v26  ;;  %vm2291_vm5 = vcmp.eq.f32.partialorder %v2290_v23, 8.507059e+37  ;;  %v1889_v26 = vpop.f32.mrf.mxu0 }
 0xe76   :  { %v1890_v20 = vadd.f32 %v1889_v26, %v4952_v40  ;;  %v5069_v26 = vld [vmem:[%s5481_s5 + $0x40] sm:$0xff] }
 0xe78   :  { %v3979_v37 = vpop.eup %3978 }
 0xe79   :  { %v3981_v39 = vpop.eup %3980  ;;  %v2280_v45 = vadd.f32 1.0, %v3979_v37 }
 0xe7a   :  { %v2282_v19 = vmul.f32 %v3981_v39, %v2279_v0  ;;  %vm2287_vm15 = vweird.f32 %v3981_v39 }
 0xe7b   :  { %3982 = vrcp.f32 %v2280_v45  ;;  %vm2288_vm4 = vmor %vm2286_vm1, %vm2287_vm15  ;;  %v2307_v36 = vand.u32 2147483648, %v2280_v45  ;;  %v2305_v57 = vand.u32 2147483647, %v2280_v45  ;;  %vm2301_vm7 = vweird.f32 %v2280_v45 }
 0xe7c   :  { %v2283_v24 = vsub.f32 1.0, %v2282_v19  ;;  %3984 = vtanh.f32 %v2270_v16 }
 0xe7d   :  { %3986 = vtanh.f32 %v2272_v28  ;;  %v2308_v18 = vor.u32 1.1754944e-38, %v2307_v36  ;;  %vm2306_vm9 = vcmp.eq.f32.partialorder %v2305_v57, 8.507059e+37  ;;  %v1954_v28 = vpop.f32.mrf.mxu1 }
 0xe7e   :  { %v2284_v4 = vmul.f32 %v3981_v39, %v2283_v24  ;;  %3988 = vpow2.f32 %v3691_v8 }
 0xe7f   :  { %3990 = vpow2.f32 %v3692_v5 }
 0xe80   :  { %v2285_v56 = vadd.f32 %v3981_v39, %v2284_v4 }
 0xe81   :  { %v3983_v27 = vpop.eup %3982 }
 0xe82   :  { %v2297_v49 = vmul.f32 %v3983_v27, %v2280_v45  ;;  %v2289_v32 = vsel %vm2288_vm4, %v3981_v39, %v2285_v56  ;;  %v3985_v25 = vpop.eup %3984  ;;  %vm2302_vm6 = vweird.f32 %v3983_v27 }
 0xe83   :  { %v2294_v34 = vsel %vm2291_vm5, %v2293_v30, %v2289_v32  ;;  %vm2303_vm8 = vmor %vm2301_vm7, %vm2302_vm6  ;;  %v3987_v61 = vpop.eup %3986 }
 0xe84   :  { %v2353_v52 = vmul.f32 %v3985_v25, %v2294_v34  ;;  %v2298_v35 = vsub.f32 1.0, %v2297_v49  ;;  %v3989_v9 = vpop.eup %3988  ;;  %v2351_v44 = vmul.f32 %v2294_v34, %v4962_v33  ;;  %v1955_v49 = vadd.f32 %v1954_v28, %v4956_v17  ;;  %v5100_v28 = vld [vmem:[%s5481_s5 + $0x28] sm:$0xff] }
 0xe85   :  { %v2319_v12 = vadd.f32 1.0, %v3989_v9  ;;  %v3991_v3 = vpop.eup %3990 }
 0xe86   :  { %2357 = vrot.lane.b32.xlu0 %v2353_v52, %s4145_s3  ;;  %v2299_v38 = vmul.f32 %v3983_v27, %v2298_v35  ;;  %v2320_v10 = vadd.f32 1.0, %v3991_v3 }
 0xe87   :  { %3992 = vrcp.f32 %v2319_v12  ;;  %v2332_v50 = vand.u32 2147483648, %v2319_v12  ;;  %vm2326_vm11 = vweird.f32 %v2319_v12  ;;  %v2330_v29 = vand.u32 2147483647, %v2319_v12 }
 0xe88   :  { %v2300_v58 = vadd.f32 %v3983_v27, %v2299_v38  ;;  %3994 = vrcp.f32 %v2320_v10  ;;  %v2347_v55 = vand.u32 2147483648, %v2320_v10  ;;  %vm2341_vm15 = vweird.f32 %v2320_v10 }
 0xe89   :  { %v2333_v60 = vor.u32 1.1754944e-38, %v2332_v50  ;;  %vm2331_vm13 = vcmp.eq.f32.partialorder %v2330_v29, 8.507059e+37  ;;  %v2345_v37 = vand.u32 2147483647, %v2320_v10 }
 0xe8a   :  { %v2304_v59 = vsel %vm2303_vm8, %v3983_v27, %v2300_v58  ;;  %v1892_v58 = vpop.f32.mrf.mxu0 }
 0xe8b   :  { %v2309_v62 = vsel %vm2306_vm9, %v2308_v18, %v2304_v59  ;;  %vm2346_vm4 = vcmp.eq.f32.partialorder %v2345_v37, 8.507059e+37 }
 0xe8c   :  { %v2354_v63 = vmul.f32 %v3987_v61, %v2309_v62  ;;  %v2352_v54 = vmul.f32 %v2309_v62, %v4966_v15  ;;  %v2348_v15 = vor.u32 1.1754944e-38, %v2347_v55 }
 0xe8d   :  { %v3993_v11 = vpop.eup %3992 }
 0xe8e   :  { %2359 = vrot.lane.b32.xlu1 %v2354_v63, %s4145_s3  ;;  %v2322_v41 = vmul.f32 %v3993_v11, %v2319_v12  ;;  %v3995_v42 = vpop.eup %3994  ;;  %vm2327_vm10 = vweird.f32 %v3993_v11  ;;  %v1893_v63 = vadd.f32 %v1892_v58, %v4952_v40 }
 0xe8f   :  { %v2337_v43 = vmul.f32 %v3995_v42, %v2320_v10  ;;  %vm2328_vm12 = vmor %vm2326_vm11, %vm2327_vm10  ;;  %vm2342_vm14 = vweird.f32 %v3995_v42 }
 0xe90   :  { %v2323_v1 = vsub.f32 1.0, %v2322_v41  ;;  %vm2343_vm1 = vmor %vm2341_vm15, %vm2342_vm14 }
 0xe91   :  { %v2338_v48 = vsub.f32 1.0, %v2337_v43 }
 0xe92   :  { %v2324_v31 = vmul.f32 %v3993_v11, %v2323_v1 }
 0xe93   :  { %v2339_v53 = vmul.f32 %v3995_v42, %v2338_v48 }
 0xe94   :  { %v2325_v47 = vadd.f32 %v3993_v11, %v2324_v31 }
 0xe95   :  { %v2340_v6 = vadd.f32 %v3995_v42, %v2339_v53 }
 0xe96   :  { %v2329_v51 = vsel %vm2328_vm12, %v3993_v11, %v2325_v47  ;;  %v1957_v11 = vpop.f32.mrf.mxu1 }
 0xe97   :  { %v2334_v0 = vsel %vm2331_vm13, %v2333_v60, %v2329_v51  ;;  %v2344_v39 = vsel %vm2343_vm1, %v3995_v42, %v2340_v6  ;;  %v1958_v1 = vadd.f32 %v1957_v11, %v4956_v17 }
 0xe98   :  { %v2349_v45 = vsel %vm2346_vm4, %v2348_v15, %v2344_v39  ;;  %v5032_v39 = vld [vmem:[%s5481_s5 + $0x70] sm:$0xff]  ;;  %v5037_v15 = vld [vmem:[%s5481_s5 + $0x78] sm:$0xff] }
 0xe99   :  { %2595 = vmatpush.msrb.mxu2 %v5032_v39  ;;  %2618 = vmatpush.msrb.mxu3 %v5037_v15 }
 0xef8   :  { %v2358_v46 = vpop.permute.xlu0 %2357 }
 0xef9   :  { %v4989_v21 = vadd.f32 %v2358_v46, %v2351_v44 }
 0xefb   :  { %3996 = vtanh.f32 %v4989_v21 }
 0xf00   :  { %v2360_v7 = vpop.permute.xlu1 %2359 }
 0xf01   :  { %v3997_v33 = vpop.eup %3996  ;;  %v4993_v13 = vadd.f32 %v2360_v7, %v2352_v54 }
 0xf02   :  { %v2367_v2 = vmul.f32 %v3997_v33, %v2334_v0 }
 0xf03   :  { %3998 = vtanh.f32 %v4993_v13 }
 0xf04   :  { %2370 = vrot.lane.b32.xlu2 %v2367_v2, %s4145_s3 }
 0xf09   :  { %v3999_v16 = vpop.eup %3998 }
 0xf0a   :  { %v2368_v19 = vmul.f32 %v3999_v16, %v2349_v45  ;;  %v5042_v16 = vld [vmem:[%s5481_s5 + $0x60] sm:$0xff]  ;;  %v5050_v45 = vld [vmem:[%s5481_s5 + $0x68] sm:$0xff] }
 0xf0b   :  { %2596 = vmatpush.msrb.mxu2 %v5042_v16  ;;  %2619 = vmatpush.msrb.mxu3 %v5050_v45 }
 0xf0c   :  { %2376 = vrot.lane.b32.xlu0 %v2368_v19, %s4145_s3 }
 0xf5e   :  { %v2371_v22 = vpop.permute.xlu2 %2370 }
 0xf5f   :  { %3693 = vst.msk [vmem:[%s5483_s8 + $0x8] sm:$0xff] %vm59_vm0, %v2371_v22  ;;  %3695 = vmatmul.msk.f32.vlgmr.msra.gmra.mxu2 %vm293_vm2, %v2371_v22  ;;  %3697 = vmatmul.msk.f32.vlgmr.msra.gmra.mxu3 %vm293_vm2, %v2371_v22  ;;  %v5057_v22 = vld [vmem:[%s5481_s5 + $0x50] sm:$0xff] }
 0xf60   :  { %2597 = vmatpush.msrb.mxu2 %v5057_v22 }
 0xf62   :  { %2598 = vmatpush.msrb.mxu2 %v5069_v26 }
 0xf7e   :  { %v2377_v24 = vpop.permute.xlu0 %2376 }
 0xf7f   :  { %3694 = vst.msk [vmem:[%s5483_s8 + $0x30] sm:$0xff] %vm456_vm3, %v2377_v24  ;;  %3696 = vmatmul.msk.f32.gmra.mxu2 %vm293_vm2, %v2377_v24  ;;  %3698 = vmatmul.msk.f32.gmra.mxu3 %vm293_vm2, %v2377_v24  ;;  %v5062_v24 = vld [vmem:[%s5481_s5 + $0x58] sm:$0xff] }
 0xf80   :  { %2620 = vmatpush.msrb.mxu3 %v5062_v24 }
 0xfe2   :  { %v2422_v4 = vpop.f32.mrf.mxu2  ;;  %v2445_v30 = vpop.f32.mrf.mxu3 }
 0xfe3   :  { %v2451_v23 = vadd.f32 %v2422_v4, %v1890_v20  ;;  %v2452_v25 = vadd.f32 %v2445_v30, %v1955_v49  ;;  %v5074_v20 = vld [vmem:[%s5481_s5 + $0x48] sm:$0xff] }
 0xfe4   :  { %2621 = vmatpush.msrb.mxu3 %v5074_v20 }
 0xfe5   :  { %v3699_v14 = vmul.f32 -1.442695, %v2451_v23  ;;  %v3701_v7 = vmul.f32 -1.442695, %v2452_v25  ;;  %v5081_v23 = vld [vmem:[%s5481_s5 + $0x30] sm:$0xff] }
 0xfe6   :  { %2599 = vmatpush.msrb.mxu2 %v5081_v23 }
 0xfe7   :  { %4000 = vpow2.f32 %v3699_v14  ;;  %v5086_v14 = vld [vmem:[%s5481_s5 + $0x38] sm:$0xff] }
 0xfe8   :  { %2622 = vmatpush.msrb.mxu3 %v5086_v14 }
 0xfea   :  { %2623 = vmatpush.msrb.mxu3 %v5100_v28 }
 0xfed   :  { %v4001_v56 = vpop.eup %4000 }
 0xfee   :  { %v2461_v27 = vadd.f32 1.0, %v4001_v56 }
 0xff0   :  { %4002 = vrcp.f32 %v2461_v27  ;;  %v2474_v35 = vand.u32 2147483648, %v2461_v27  ;;  %v2472_v38 = vand.u32 2147483647, %v2461_v27  ;;  %vm2468_vm6 = vweird.f32 %v2461_v27 }
 0xff1   :  { %4004 = vtanh.f32 %v2452_v25  ;;  %v5115_v25 = vld [vmem:[%s5481_s5 + $0x18] sm:$0xff] }
 0xff2   :  { %v2475_v18 = vor.u32 1.1754944e-38, %v2474_v35  ;;  %vm2473_vm8 = vcmp.eq.f32.partialorder %v2472_v38, 8.507059e+37  ;;  %v5124_v35 = vld [vmem:[%s5481_s5] sm:$0xff]  ;;  %2624 = vmatpush.msrb.mxu3 %v5115_v25 }
 0xff6   :  { %v4003_v32 = vpop.eup %4002 }
 0xff7   :  { %v2464_v34 = vmul.f32 %v4003_v32, %v2461_v27  ;;  %vm2469_vm5 = vweird.f32 %v4003_v32  ;;  %v4005_v61 = vpop.eup %4004  ;;  %v5095_v27 = vld [vmem:[%s5481_s5 + $0x20] sm:$0xff] }
 0xff8   :  { %vm2470_vm7 = vmor %vm2468_vm6, %vm2469_vm5  ;;  %2600 = vmatpush.msrb.mxu2 %v5095_v27 }
 0xff9   :  { %v2465_v52 = vsub.f32 1.0, %v2464_v34 }
 0xffb   :  { %v2466_v36 = vmul.f32 %v4003_v32, %v2465_v52 }
 0xffd   :  { %v2467_v57 = vadd.f32 %v4003_v32, %v2466_v36  ;;  %v5129_v36 = vld [vmem:[%s5481_s5 + $0x8] sm:$0xff] }
 0xffe   :  { %2625 = vmatpush.msrb.mxu3 %v5129_v36 }
 0xfff   :  { %v2471_v59 = vsel %vm2470_vm7, %v4003_v32, %v2467_v57  ;;  %v5110_v32 = vld [vmem:[%s5481_s5 + $0x10] sm:$0xff] }
0x1000   :  { %v5012_v62 = vsel %vm2473_vm8, %v2475_v18, %v2471_v59  ;;  %2601 = vmatpush.msrb.mxu2 %v5110_v32  ;;  %2800 = vmatpush.msra.mxu3 %v5037_v15 }
0x1001   :  { %v2535_v8 = vmul.f32 %v4005_v61, %v5012_v62  ;;  %v2533_v34 = vmul.f32 %v5012_v62, %v4989_v21 }
0x1002   :  { %v2425_v5 = vpop.f32.mrf.mxu2  ;;  %v2448_v41 = vpop.f32.mrf.mxu3  ;;  %2602 = vmatpush.msrb.mxu2 %v5124_v35  ;;  %2801 = vmatpush.msra.mxu3 %v5050_v45 }
0x1003   :  { %v2453_v9 = vadd.f32 %v2425_v5, %v1893_v63  ;;  %2539 = vrot.lane.b32.xlu1 %v2535_v8, %s4145_s3  ;;  %v2454_v31 = vadd.f32 %v2448_v41, %v1958_v1 }
0x1004   :  { %2777 = vmatpush.msra.mxu2 %v5032_v39  ;;  %2802 = vmatpush.msra.mxu3 %v5062_v24 }
0x1005   :  { %v3700_v12 = vmul.f32 -1.442695, %v2453_v9  ;;  %v3702_v33 = vmul.f32 -1.442695, %v2454_v31 }
0x1006   :  { %2778 = vmatpush.msra.mxu2 %v5042_v16  ;;  %2803 = vmatpush.msra.mxu3 %v5074_v20 }
0x1007   :  { %4006 = vpow2.f32 %v3700_v12 }
0x1008   :  { %2779 = vmatpush.msra.mxu2 %v5057_v22  ;;  %2804 = vmatpush.msra.mxu3 %v5086_v14 }
0x100a   :  { %2780 = vmatpush.msra.mxu2 %v5069_v26  ;;  %2805 = vmatpush.msra.mxu3 %v5100_v28 }
0x100c   :  { %2781 = vmatpush.msra.mxu2 %v5081_v23  ;;  %2806 = vmatpush.msra.mxu3 %v5115_v25 }
0x100d   :  { %v4007_v3 = vpop.eup %4006 }
0x100e   :  { %v2462_v10 = vadd.f32 1.0, %v4007_v3  ;;  %2782 = vmatpush.msra.mxu2 %v5095_v27  ;;  %2807 = vmatpush.msra.mxu3 %v5129_v36 }
0x1010   :  { %4008 = vrcp.f32 %v2462_v10  ;;  %v2489_v46 = vand.u32 2147483648, %v2462_v10  ;;  %v2487_v48 = vand.u32 2147483647, %v2462_v10  ;;  %vm2483_vm10 = vweird.f32 %v2462_v10  ;;  %2783 = vmatpush.msra.mxu2 %v5110_v32 }
0x1011   :  { %4010 = vtanh.f32 %v2454_v31 }
0x1012   :  { %v2490_v29 = vor.u32 1.1754944e-38, %v2489_v46  ;;  %vm2488_vm12 = vcmp.eq.f32.partialorder %v2487_v48, 8.507059e+37  ;;  %4012 = vpow2.f32 %v3701_v7  ;;  %2784 = vmatpush.msra.mxu2 %v5124_v35 }
0x1013   :  { %4014 = vpow2.f32 %v3702_v33 }
0x1016   :  { %v4009_v42 = vpop.eup %4008 }
0x1017   :  { %v2479_v43 = vmul.f32 %v4009_v42, %v2462_v10  ;;  %vm2484_vm9 = vweird.f32 %v4009_v42  ;;  %v4011_v53 = vpop.eup %4010 }
0x1018   :  { %vm2485_vm11 = vmor %vm2483_vm10, %vm2484_vm9  ;;  %v4013_v0 = vpop.eup %4012 }
0x1019   :  { %v2480_v44 = vsub.f32 1.0, %v2479_v43  ;;  %v5022_v2 = vadd.f32 1.0, %v4013_v0  ;;  %v4015_v6 = vpop.eup %4014 }
0x101a   :  { %v5025_v55 = vadd.f32 1.0, %v4015_v6  ;;  %v1960_v6 = vpop.f32.mrf.mxu1 }
0x101b   :  { %v2481_v47 = vmul.f32 %v4009_v42, %v2480_v44  ;;  %4016 = vrcp.f32 %v5022_v2  ;;  %v2514_v58 = vand.u32 2147483648, %v5022_v2  ;;  %vm2508_vm14 = vweird.f32 %v5022_v2 }
0x101c   :  { %4018 = vrcp.f32 %v5025_v55  ;;  %v2512_v18 = vand.u32 2147483647, %v5022_v2  ;;  %vm2523_vm5 = vweird.f32 %v5025_v55  ;;  %v2527_v11 = vand.u32 2147483647, %v5025_v55 }
0x101d   :  { %v2482_v50 = vadd.f32 %v4009_v42, %v2481_v47  ;;  %v2515_v63 = vor.u32 1.1754944e-38, %v2514_v58  ;;  %v1895_v47 = vpop.f32.mrf.mxu0 }
0x101e   :  { %vm2513_vm1 = vcmp.eq.f32.partialorder %v2512_v18, 8.507059e+37  ;;  %vm2528_vm7 = vcmp.eq.f32.partialorder %v2527_v11, 8.507059e+37  ;;  %v1896_v48 = vadd.f32 %v1895_v47, %v4952_v40 }
0x101f   :  { %v2486_v51 = vsel %vm2485_vm11, %v4009_v42, %v2482_v50 }
0x1020   :  { %v5018_v54 = vsel %vm2488_vm12, %v2490_v29, %v2486_v51 }
0x1021   :  { %v2536_v60 = vmul.f32 %v4011_v53, %v5018_v54  ;;  %v5027_v37 = vpop.eup %4016  ;;  %v2534_v62 = vmul.f32 %v5018_v54, %v4993_v13  ;;  %v2529_v13 = vand.u32 2147483648, %v5025_v55 }
0x1022   :  { %v2504_v19 = vmul.f32 %v5027_v37, %v5022_v2  ;;  %v5088_v56 = vpop.eup %4018  ;;  %vm2509_vm13 = vweird.f32 %v5027_v37 }
0x1023   :  { %2541 = vrot.lane.b32.xlu2 %v2536_v60, %s4145_s3  ;;  %v2519_v49 = vmul.f32 %v5088_v56, %v5025_v55  ;;  %vm2510_vm15 = vmor %vm2508_vm14, %vm2509_vm13  ;;  %vm2524_vm4 = vweird.f32 %v5088_v56  ;;  %v2530_v1 = vor.u32 1.1754944e-38, %v2529_v13 }
0x1024   :  { %v2505_v4 = vsub.f32 1.0, %v2504_v19  ;;  %vm2525_vm6 = vmor %vm2523_vm5, %vm2524_vm4 }
0x1025   :  { %v2520_v57 = vsub.f32 1.0, %v2519_v49  ;;  %v1898_v53 = vpop.f32.mrf.mxu0 }
0x1026   :  { %v2506_v30 = vmul.f32 %v5027_v37, %v2505_v4  ;;  %v1899_v54 = vadd.f32 %v1898_v53, %v4952_v40 }
0x1027   :  { %v2521_v61 = vmul.f32 %v5088_v56, %v2520_v57 }
0x1028   :  { %v2507_v21 = vadd.f32 %v5027_v37, %v2506_v30 }
0x1029   :  { %v2522_v10 = vadd.f32 %v5088_v56, %v2521_v61 }
0x102a   :  { %v2511_v59 = vsel %vm2510_vm15, %v5027_v37, %v2507_v21  ;;  %v1961_v37 = vadd.f32 %v1960_v6, %v4956_v17 }
0x102b   :  { %v2516_v12 = vsel %vm2513_vm1, %v2515_v63, %v2511_v59  ;;  %v2526_v41 = vsel %vm2525_vm6, %v5088_v56, %v2522_v10 }
0x102c   :  { %v2531_v31 = vsel %vm2528_vm7, %v2530_v1, %v2526_v41 }
0x1075   :  { %v2540_v52 = vpop.permute.xlu1 %2539 }
0x1076   :  { %v5131_v38 = vadd.f32 %v2540_v52, %v2533_v34  ;;  %v1963_v34 = vpop.f32.mrf.mxu1 }
0x1077   :  { %v1964_v59 = vadd.f32 %v1963_v34, %v4956_v17 }
0x1078   :  { %4020 = vtanh.f32 %v5131_v38 }
0x107d   :  { %v2542_v8 = vpop.permute.xlu2 %2541 }
0x107e   :  { %v4021_v5 = vpop.eup %4020  ;;  %v5153_v9 = vadd.f32 %v2542_v8, %v2534_v62 }
0x107f   :  { %v2549_v3 = vmul.f32 %v4021_v5, %v2516_v12 }
0x1080   :  { %4022 = vtanh.f32 %v5153_v9 }
0x1081   :  { %2552 = vrot.lane.b32.xlu0 %v2549_v3, %s4145_s3 }
0x1086   :  { %v4023_v42 = vpop.eup %4022 }
0x1087   :  { %v2550_v43 = vmul.f32 %v4023_v42, %v2531_v31 }
0x1089   :  { %2558 = vrot.lane.b32.xlu1 %v2550_v43, %s4145_s3 }
0x10f3   :  { %v2553_v44 = vpop.permute.xlu0 %2552 }
0x10f4   :  { %3703 = vst.msk [vmem:[%s5483_s8 + $0x10] sm:$0xff] %vm59_vm0, %v2553_v44  ;;  %3705 = vmatmul.msk.f32.vlgmr.msrb.gmra.mxu2 %vm293_vm2, %v2553_v44  ;;  %3707 = vmatmul.msk.f32.vlgmr.msrb.gmra.mxu3 %vm293_vm2, %v2553_v44 }
0x10f5   :  { %2957 = vmatpush.msrb.mxu2 %v5032_v39  ;;  %2980 = vmatpush.msrb.mxu3 %v5037_v15 }
0x10f7   :  { %2958 = vmatpush.msrb.mxu2 %v5042_v16  ;;  %2981 = vmatpush.msrb.mxu3 %v5050_v45 }
0x10f9   :  { %2959 = vmatpush.msrb.mxu2 %v5057_v22  ;;  %2982 = vmatpush.msrb.mxu3 %v5062_v24 }
0x10fb   :  { %v2559_v46 = vpop.permute.xlu1 %2558  ;;  %2960 = vmatpush.msrb.mxu2 %v5069_v26  ;;  %2983 = vmatpush.msrb.mxu3 %v5074_v20 }
0x10fc   :  { %3704 = vst.msk [vmem:[%s5483_s8 + $0x28] sm:$0xff] %vm456_vm3, %v2559_v46  ;;  %3706 = vmatmul.msk.f32.gmra.mxu2 %vm293_vm2, %v2559_v46  ;;  %3708 = vmatmul.msk.f32.gmra.mxu3 %vm293_vm2, %v2559_v46 }
0x10fd   :  { %2961 = vmatpush.msrb.mxu2 %v5081_v23  ;;  %2984 = vmatpush.msrb.mxu3 %v5086_v14 }
0x10ff   :  { %2962 = vmatpush.msrb.mxu2 %v5095_v27  ;;  %2985 = vmatpush.msrb.mxu3 %v5100_v28 }
0x1101   :  { %2963 = vmatpush.msrb.mxu2 %v5110_v32  ;;  %2986 = vmatpush.msrb.mxu3 %v5115_v25 }
0x1103   :  { %2964 = vmatpush.msrb.mxu2 %v5124_v35  ;;  %2987 = vmatpush.msrb.mxu3 %v5129_v36 }
0x1177   :  { %v2604_v50 = vpop.f32.mrf.mxu2  ;;  %v2627_v55 = vpop.f32.mrf.mxu3 }
0x1178   :  { %v2633_v29 = vadd.f32 %v2604_v50, %v1896_v48  ;;  %v2634_v56 = vadd.f32 %v2627_v55, %v1961_v37 }
0x117a   :  { %v3709_v51 = vmul.f32 -1.442695, %v2633_v29  ;;  %v3711_v50 = vmul.f32 -1.442695, %v2634_v56 }
0x117c   :  { %4024 = vpow2.f32 %v3709_v51 }
0x117f   :  { %v2607_v60 = vpop.f32.mrf.mxu2  ;;  %v2630_v57 = vpop.f32.mrf.mxu3 }
0x1180   :  { %v2635_v7 = vadd.f32 %v2607_v60, %v1899_v54  ;;  %v2636_v63 = vadd.f32 %v2630_v57, %v1964_v59 }
0x1182   :  { %v4025_v33 = vpop.eup %4024  ;;  %v3710_v0 = vmul.f32 -1.442695, %v2635_v7  ;;  %v3712_v7 = vmul.f32 -1.442695, %v2636_v63 }
0x1183   :  { %v2643_v2 = vadd.f32 1.0, %v4025_v33 }
0x1184   :  { %4026 = vpow2.f32 %v3710_v0 }
0x1185   :  { %4028 = vrcp.f32 %v2643_v2  ;;  %v2656_v21 = vand.u32 2147483648, %v2643_v2  ;;  %v2654_v18 = vand.u32 2147483647, %v2643_v2  ;;  %vm2650_vm9 = vweird.f32 %v2643_v2 }
0x1187   :  { %v2657_v8 = vor.u32 1.1754944e-38, %v2656_v21  ;;  %vm2655_vm11 = vcmp.eq.f32.partialorder %v2654_v18, 8.507059e+37 }
0x118a   :  { %v4027_v19 = vpop.eup %4026 }
0x118b   :  { %v4029_v4 = vpop.eup %4028  ;;  %v2644_v30 = vadd.f32 1.0, %v4027_v19 }
0x118c   :  { %v2646_v49 = vmul.f32 %v4029_v4, %v2643_v2  ;;  %vm2651_vm8 = vweird.f32 %v4029_v4 }
0x118d   :  { %4030 = vrcp.f32 %v2644_v30  ;;  %vm2652_vm10 = vmor %vm2650_vm9, %vm2651_vm8  ;;  %v2671_v41 = vand.u32 2147483648, %v2644_v30  ;;  %v2669_v42 = vand.u32 2147483647, %v2644_v30  ;;  %vm2665_vm13 = vweird.f32 %v2644_v30 }
0x118e   :  { %v2647_v52 = vsub.f32 1.0, %v2646_v49  ;;  %4032 = vtanh.f32 %v2634_v56 }
0x118f   :  { %4034 = vtanh.f32 %v2636_v63  ;;  %v2672_v43 = vor.u32 1.1754944e-38, %v2671_v41  ;;  %vm2670_vm15 = vcmp.eq.f32.partialorder %v2669_v42, 8.507059e+37 }
0x1190   :  { %v2648_v58 = vmul.f32 %v4029_v4, %v2647_v52  ;;  %4036 = vpow2.f32 %v3711_v50 }
0x1192   :  { %v2649_v61 = vadd.f32 %v4029_v4, %v2648_v58 }
0x1193   :  { %v4031_v62 = vpop.eup %4030 }
0x1194   :  { %v2661_v5 = vmul.f32 %v4031_v62, %v2644_v30  ;;  %v2653_v12 = vsel %vm2652_vm10, %v4029_v4, %v2649_v61  ;;  %v4033_v3 = vpop.eup %4032  ;;  %vm2666_vm12 = vweird.f32 %v4031_v62 }
0x1195   :  { %v2658_v10 = vsel %vm2655_vm11, %v2657_v8, %v2653_v12  ;;  %vm2667_vm14 = vmor %vm2665_vm13, %vm2666_vm12  ;;  %v4035_v46 = vpop.eup %4034 }
0x1196   :  { %v2717_v13 = vmul.f32 %v4033_v3, %v2658_v10  ;;  %v2662_v11 = vsub.f32 1.0, %v2661_v5  ;;  %v4037_v29 = vpop.eup %4036  ;;  %v2715_v0 = vmul.f32 %v2658_v10, %v5131_v38 }
0x1197   :  { %v2683_v51 = vadd.f32 1.0, %v4037_v29 }
0x1198   :  { %2721 = vrot.lane.b32.xlu2 %v2717_v13, %s4145_s3  ;;  %v2663_v1 = vmul.f32 %v4031_v62, %v2662_v11 }
0x1199   :  { %4038 = vrcp.f32 %v2683_v51  ;;  %v2696_v37 = vand.u32 2147483648, %v2683_v51  ;;  %vm2690_vm4 = vweird.f32 %v2683_v51  ;;  %v2694_v19 = vand.u32 2147483647, %v2683_v51 }
0x119a   :  { %v2664_v31 = vadd.f32 %v4031_v62, %v2663_v1  ;;  %4040 = vpow2.f32 %v3712_v7 }
0x119b   :  { %v2697_v30 = vor.u32 1.1754944e-38, %v2696_v37  ;;  %vm2695_vm6 = vcmp.eq.f32.partialorder %v2694_v19, 8.507059e+37 }
0x119c   :  { %v2668_v44 = vsel %vm2667_vm14, %v4031_v62, %v2664_v31 }
0x119d   :  { %v2673_v47 = vsel %vm2670_vm15, %v2672_v43, %v2668_v44 }
0x119e   :  { %v2718_v48 = vmul.f32 %v4035_v46, %v2673_v47  ;;  %v2716_v59 = vmul.f32 %v2673_v47, %v5153_v9 }
0x119f   :  { %v4039_v53 = vpop.eup %4038 }
0x11a0   :  { %2723 = vrot.lane.b32.xlu0 %v2718_v48, %s4145_s3  ;;  %v2686_v54 = vmul.f32 %v4039_v53, %v2683_v51  ;;  %vm2691_vm1 = vweird.f32 %v4039_v53  ;;  %v4041_v4 = vpop.eup %4040 }
0x11a1   :  { %vm2692_vm5 = vmor %vm2690_vm4, %vm2691_vm1  ;;  %v2684_v34 = vadd.f32 1.0, %v4041_v4 }
0x11a2   :  { %v2687_v60 = vsub.f32 1.0, %v2686_v54 }
0x11a3   :  { %v2711_v8 = vand.u32 2147483648, %v2684_v34  ;;  %vm2705_vm8 = vweird.f32 %v2684_v34  ;;  %v2709_v5 = vand.u32 2147483647, %v2684_v34 }
0x11a4   :  { %v2688_v33 = vmul.f32 %v4039_v53, %v2687_v60 }
0x11a5   :  { %v2712_v3 = vor.u32 1.1754944e-38, %v2711_v8  ;;  %vm2710_vm10 = vcmp.eq.f32.partialorder %v2709_v5, 8.507059e+37 }
0x11a6   :  { %v2689_v55 = vadd.f32 %v4039_v53, %v2688_v33 }
0x11a8   :  { %v2693_v56 = vsel %vm2692_vm5, %v4039_v53, %v2689_v55 }
0x11a9   :  { %v2698_v52 = vsel %vm2695_vm6, %v2697_v30, %v2693_v56 }
0x11f2   :  { %v2722_v2 = vpop.permute.xlu2 %2721 }
0x11f3   :  { %v5209_v6 = vadd.f32 %v2722_v2, %v2715_v0 }
0x11f5   :  { %4042 = vtanh.f32 %v5209_v6 }
0x11f6   :  { %4044 = vrcp.f32 %v2684_v34 }
0x11fb   :  { %v4043_v49 = vpop.eup %4042 }
0x11fc   :  { %v2731_v38 = vmul.f32 %v4043_v49, %v2698_v52  ;;  %v4045_v21 = vpop.eup %4044 }
0x11fd   :  { %v2701_v57 = vmul.f32 %v4045_v21, %v2684_v34  ;;  %vm2706_vm7 = vweird.f32 %v4045_v21 }
0x11fe   :  { %2734 = vrot.lane.b32.xlu1 %v2731_v38, %s4145_s3  ;;  %vm2707_vm9 = vmor %vm2705_vm8, %vm2706_vm7 }
0x11ff   :  { %v2702_v58 = vsub.f32 1.0, %v2701_v57 }
0x1201   :  { %v2703_v18 = vmul.f32 %v4045_v21, %v2702_v58 }
0x1203   :  { %v2704_v63 = vadd.f32 %v4045_v21, %v2703_v18 }
0x1205   :  { %v2708_v12 = vsel %vm2707_vm9, %v4045_v21, %v2704_v63 }
0x1206   :  { %v2713_v13 = vsel %vm2710_vm10, %v2712_v3, %v2708_v12 }
0x1212   :  { %v2724_v61 = vpop.permute.xlu0 %2723 }
0x1213   :  { %v5214_v62 = vadd.f32 %v2724_v61, %v2716_v59 }
0x1215   :  { %4046 = vtanh.f32 %v5214_v62 }
0x121b   :  { %v4047_v10 = vpop.eup %4046 }
0x121c   :  { %v2732_v11 = vmul.f32 %v4047_v10, %v2713_v13 }
0x121e   :  { %2740 = vrot.lane.b32.xlu2 %v2732_v11, %s4145_s3 }
0x1270   :  { %v2735_v9 = vpop.permute.xlu1 %2734 }
0x1271   :  { %3713 = vst.msk [vmem:[%s5483_s8 + $0x18] sm:$0xff] %vm59_vm0, %v2735_v9  ;;  %3715 = vmatmul.msk.f32.vlgmr.msra.gmra.mxu2 %vm293_vm2, %v2735_v9  ;;  %3717 = vmatmul.msk.f32.vlgmr.msra.gmra.mxu3 %vm293_vm2, %v2735_v9 }
0x1272   :  { %3137 = vmatpush.msra.mxu2 %v5032_v39  ;;  %3160 = vmatpush.msra.mxu3 %v5037_v15  ;;  %v1901_v39 = vpop.f32.mrf.mxu0 }
0x1273   :  { %v1902_v15 = vadd.f32 %v1901_v39, %v4952_v40 }
0x1274   :  { %3138 = vmatpush.msra.mxu2 %v5042_v16  ;;  %3161 = vmatpush.msra.mxu3 %v5050_v45 }
0x1276   :  { %3139 = vmatpush.msra.mxu2 %v5057_v22  ;;  %3162 = vmatpush.msra.mxu3 %v5062_v24 }
0x1278   :  { %v2741_v41 = vpop.permute.xlu2 %2740  ;;  %3140 = vmatpush.msra.mxu2 %v5069_v26  ;;  %3163 = vmatpush.msra.mxu3 %v5074_v20 }
0x1279   :  { %3714 = vst.msk [vmem:[%s5483_s8 + $0x20] sm:$0xff] %vm456_vm3, %v2741_v41  ;;  %3716 = vmatmul.msk.f32.gmra.mxu2 %vm293_vm2, %v2741_v41  ;;  %3718 = vmatmul.msk.f32.gmra.mxu3 %vm293_vm2, %v2741_v41 }
0x127a   :  { %3141 = vmatpush.msra.mxu2 %v5081_v23  ;;  %3164 = vmatpush.msra.mxu3 %v5086_v14  ;;  %v1904_v24 = vpop.f32.mrf.mxu0 }
0x127b   :  { %v1905_v26 = vadd.f32 %v1904_v24, %v4952_v40 }
0x127c   :  { %3142 = vmatpush.msra.mxu2 %v5095_v27  ;;  %3165 = vmatpush.msra.mxu3 %v5100_v28 }
0x127e   :  { %3143 = vmatpush.msra.mxu2 %v5110_v32  ;;  %3166 = vmatpush.msra.mxu3 %v5115_v25  ;;  %v1966_v32 = vpop.f32.mrf.mxu1 }
0x1280   :  { %3144 = vmatpush.msra.mxu2 %v5124_v35  ;;  %3167 = vmatpush.msra.mxu3 %v5129_v36  ;;  %v1967_v35 = vadd.f32 %v1966_v32, %v4956_v17 }
0x1286   :  { %v1969_v44 = vpop.f32.mrf.mxu1 }
0x1287   :  { %v1970_v51 = vadd.f32 %v1969_v44, %v4956_v17 }
0x12f4   :  { %v2786_v16 = vpop.f32.mrf.mxu2  ;;  %v2809_v25 = vpop.f32.mrf.mxu3 }
0x12f5   :  { %v2815_v45 = vadd.f32 %v2786_v16, %v1902_v15  ;;  %v2816_v42 = vadd.f32 %v2809_v25, %v1967_v35 }
0x12f7   :  { %v3719_v22 = vmul.f32 -1.442695, %v2815_v45  ;;  %v3721_v58 = vmul.f32 -1.442695, %v2816_v42 }
0x12f9   :  { %4048 = vpow2.f32 %v3719_v22 }
0x12fc   :  { %v2789_v20 = vpop.f32.mrf.mxu2  ;;  %v2812_v48 = vpop.f32.mrf.mxu3 }
0x12fd   :  { %v2817_v23 = vadd.f32 %v2789_v20, %v1905_v26  ;;  %v2818_v60 = vadd.f32 %v2812_v48, %v1970_v51 }
0x12ff   :  { %v4049_v14 = vpop.eup %4048  ;;  %v3720_v27 = vmul.f32 -1.442695, %v2817_v23  ;;  %v3722_v18 = vmul.f32 -1.442695, %v2818_v60 }
0x1300   :  { %v2825_v28 = vadd.f32 1.0, %v4049_v14 }
0x1301   :  { %4050 = vpow2.f32 %v3720_v27 }
0x1302   :  { %4052 = vrcp.f32 %v2825_v28  ;;  %v2838_v47 = vand.u32 2147483648, %v2825_v28  ;;  %v2836_v29 = vand.u32 2147483647, %v2825_v28  ;;  %vm2832_vm12 = vweird.f32 %v2825_v28 }
0x1304   :  { %v2839_v7 = vor.u32 1.1754944e-38, %v2838_v47  ;;  %vm2837_vm14 = vcmp.eq.f32.partialorder %v2836_v29, 8.507059e+37  ;;  %v1907_v47 = vpop.f32.mrf.mxu0 }
0x1305   :  { %v1908_v48 = vadd.f32 %v1907_v47, %v4952_v40 }
0x1307   :  { %v4051_v36 = vpop.eup %4050 }
0x1308   :  { %v4053_v1 = vpop.eup %4052  ;;  %v2826_v31 = vadd.f32 1.0, %v4051_v36 }
0x1309   :  { %v2828_v43 = vmul.f32 %v4053_v1, %v2825_v28  ;;  %vm2833_vm11 = vweird.f32 %v4053_v1 }
0x130a   :  { %4054 = vrcp.f32 %v2826_v31  ;;  %vm2834_vm13 = vmor %vm2832_vm12, %vm2833_vm11  ;;  %v2853_v4 = vand.u32 2147483648, %v2826_v31  ;;  %v2851_v30 = vand.u32 2147483647, %v2826_v31  ;;  %vm2847_vm1 = vweird.f32 %v2826_v31 }
0x130b   :  { %v2829_v46 = vsub.f32 1.0, %v2828_v43  ;;  %4056 = vtanh.f32 %v2816_v42 }
0x130c   :  { %4058 = vtanh.f32 %v2818_v60  ;;  %v2854_v34 = vor.u32 1.1754944e-38, %v2853_v4  ;;  %vm2852_vm5 = vcmp.eq.f32.partialorder %v2851_v30, 8.507059e+37  ;;  %v1972_v60 = vpop.f32.mrf.mxu1 }
0x130d   :  { %v2830_v50 = vmul.f32 %v4053_v1, %v2829_v46  ;;  %4060 = vpow2.f32 %v3721_v58 }
0x130e   :  { %4062 = vpow2.f32 %v3722_v18 }
0x130f   :  { %v2831_v53 = vadd.f32 %v4053_v1, %v2830_v50 }
0x1310   :  { %v4055_v54 = vpop.eup %4054 }
0x1311   :  { %v2843_v33 = vmul.f32 %v4055_v54, %v2826_v31  ;;  %v2835_v0 = vsel %vm2834_vm13, %v4053_v1, %v2831_v53  ;;  %v4057_v2 = vpop.eup %4056  ;;  %vm2848_vm15 = vweird.f32 %v4055_v54 }
0x1312   :  { %v2840_v55 = vsel %vm2837_vm14, %v2839_v7, %v2835_v0  ;;  %vm2849_vm4 = vmor %vm2847_vm1, %vm2848_vm15  ;;  %v4059_v38 = vpop.eup %4058 }
0x1313   :  { %v2899_v37 = vmul.f32 %v4057_v2, %v2840_v55  ;;  %v2844_v19 = vsub.f32 1.0, %v2843_v33  ;;  %v4061_v59 = vpop.eup %4060  ;;  %v2897_v9 = vmul.f32 %v2840_v55, %v5209_v6  ;;  %v1973_v33 = vadd.f32 %v1972_v60, %v4956_v17 }
0x1314   :  { %v2865_v61 = vadd.f32 1.0, %v4061_v59  ;;  %v4063_v63 = vpop.eup %4062 }
0x1315   :  { %2903 = vrot.lane.b32.xlu0 %v2899_v37, %s4145_s3  ;;  %v2845_v56 = vmul.f32 %v4055_v54, %v2844_v19  ;;  %v2866_v8 = vadd.f32 1.0, %v4063_v63 }
0x1316   :  { %4064 = vrcp.f32 %v2865_v61  ;;  %v2878_v45 = vand.u32 2147483648, %v2865_v61  ;;  %vm2872_vm7 = vweird.f32 %v2865_v61  ;;  %v2876_v22 = vand.u32 2147483647, %v2865_v61 }
0x1317   :  { %v2846_v49 = vadd.f32 %v4055_v54, %v2845_v56  ;;  %4066 = vrcp.f32 %v2866_v8  ;;  %v2893_v35 = vand.u32 2147483648, %v2866_v8  ;;  %vm2887_vm11 = vweird.f32 %v2866_v8 }
0x1318   :  { %v2879_v23 = vor.u32 1.1754944e-38, %v2878_v45  ;;  %vm2877_vm9 = vcmp.eq.f32.partialorder %v2876_v22, 8.507059e+37  ;;  %v2891_v36 = vand.u32 2147483647, %v2866_v8 }
0x1319   :  { %v2850_v52 = vsel %vm2849_vm4, %v4055_v54, %v2846_v49  ;;  %v1910_v49 = vpop.f32.mrf.mxu0 }
0x131a   :  { %v2855_v21 = vsel %vm2852_vm5, %v2854_v34, %v2850_v52  ;;  %vm2892_vm13 = vcmp.eq.f32.partialorder %v2891_v36, 8.507059e+37 }
0x131b   :  { %v2900_v57 = vmul.f32 %v4059_v38, %v2855_v21  ;;  %v2898_v20 = vmul.f32 %v2855_v21, %v5214_v62  ;;  %v2894_v62 = vor.u32 1.1754944e-38, %v2893_v35 }
0x131c   :  { %v4065_v5 = vpop.eup %4064 }
0x131d   :  { %2905 = vrot.lane.b32.xlu1 %v2900_v57, %s4145_s3  ;;  %v2868_v12 = vmul.f32 %v4065_v5, %v2865_v61  ;;  %v4067_v10 = vpop.eup %4066  ;;  %vm2873_vm6 = vweird.f32 %v4065_v5  ;;  %v1911_v57 = vadd.f32 %v1910_v49, %v4952_v40 }
0x131e   :  { %v2883_v11 = vmul.f32 %v4067_v10, %v2866_v8  ;;  %vm2874_vm8 = vmor %vm2872_vm7, %vm2873_vm6  ;;  %vm2888_vm10 = vweird.f32 %v4067_v10 }
0x131f   :  { %v2869_v3 = vsub.f32 1.0, %v2868_v12  ;;  %vm2889_vm12 = vmor %vm2887_vm11, %vm2888_vm10 }
0x1320   :  { %v2884_v16 = vsub.f32 1.0, %v2883_v11 }
0x1321   :  { %v2870_v13 = vmul.f32 %v4065_v5, %v2869_v3 }
0x1322   :  { %v2885_v26 = vmul.f32 %v4067_v10, %v2884_v16 }
0x1323   :  { %v2871_v15 = vadd.f32 %v4065_v5, %v2870_v13 }
0x1324   :  { %v2886_v25 = vadd.f32 %v4067_v10, %v2885_v26 }
0x1325   :  { %v2875_v24 = vsel %vm2874_vm8, %v4065_v5, %v2871_v15  ;;  %v1975_v5 = vpop.f32.mrf.mxu1 }
0x1326   :  { %v2880_v28 = vsel %vm2877_vm9, %v2879_v23, %v2875_v24  ;;  %v2890_v1 = vsel %vm2889_vm12, %v4067_v10, %v2886_v25  ;;  %v1976_v3 = vadd.f32 %v1975_v5, %v4956_v17 }
0x1327   :  { %v2895_v31 = vsel %vm2892_vm13, %v2894_v62, %v2890_v1 }
0x1387   :  { %v2904_v41 = vpop.permute.xlu0 %2903 }
0x1388   :  { %v5253_v39 = vadd.f32 %v2904_v41, %v2897_v9 }
0x138a   :  { %4068 = vtanh.f32 %v5253_v39 }
0x138f   :  { %v2906_v14 = vpop.permute.xlu1 %2905 }
0x1390   :  { %v4069_v6 = vpop.eup %4068  ;;  %v5257_v27 = vadd.f32 %v2906_v14, %v2898_v20 }
0x1391   :  { %v2913_v32 = vmul.f32 %v4069_v6, %v2880_v28 }
0x1392   :  { %4070 = vtanh.f32 %v5257_v27 }
0x1393   :  { %2916 = vrot.lane.b32.xlu2 %v2913_v32, %s4145_s3 }
0x1398   :  { %v4071_v42 = vpop.eup %4070 }
0x1399   :  { %v2914_v43 = vmul.f32 %v4071_v42, %v2895_v31 }
0x139b   :  { %2921 = vrot.lane.b32.xlu0 %v2914_v43, %s4145_s3 }
0x13ed   :  { %v2917_v44 = vpop.permute.xlu2 %2916 }
0x13ee   :  { %3723 = vst.msk [vmem:[%s5483_s8 + $0x20] sm:$0xff] %vm59_vm0, %v2917_v44  ;;  %3725 = vmatmul.msk.f32.vlgmr.msrb.gmra.mxu2 %vm293_vm2, %v2917_v44  ;;  %3727 = vmatmul.msk.f32.vlgmr.msrb.gmra.mxu3 %vm293_vm2, %v2917_v44 }
0x140d   :  { %v2922_v46 = vpop.permute.xlu0 %2921 }
0x140e   :  { %3724 = vst.msk [vmem:[%s5483_s8 + $0x18] sm:$0xff] %vm456_vm3, %v2922_v46  ;;  %3726 = vmatmul.msk.f32.gmra.mxu2 %vm293_vm2, %v2922_v46  ;;  %3728 = vmatmul.msk.f32.gmra.mxu3 %vm293_vm2, %v2922_v46 }
0x1471   :  { %v2966_v50 = vpop.f32.mrf.mxu2  ;;  %v2989_v7 = vpop.f32.mrf.mxu3 }
0x1472   :  { %v2995_v29 = vadd.f32 %v2966_v50, %v1908_v48  ;;  %v2996_v2 = vadd.f32 %v2989_v7, %v1973_v33 }
0x1474   :  { %v3729_v51 = vmul.f32 -1.442695, %v2995_v29  ;;  %v3731_v14 = vmul.f32 -1.442695, %v2996_v2 }
0x1476   :  { %4072 = vpow2.f32 %v3729_v51 }
0x147c   :  { %v4073_v53 = vpop.eup %4072 }
0x147d   :  { %v3005_v54 = vadd.f32 1.0, %v4073_v53 }
0x147f   :  { %4074 = vrcp.f32 %v3005_v54  ;;  %v3018_v19 = vand.u32 2147483648, %v3005_v54  ;;  %v3016_v56 = vand.u32 2147483647, %v3005_v54  ;;  %vm3012_vm15 = vweird.f32 %v3005_v54 }
0x1480   :  { %4076 = vtanh.f32 %v2996_v2 }
0x1481   :  { %v3019_v34 = vor.u32 1.1754944e-38, %v3018_v19  ;;  %vm3017_vm4 = vcmp.eq.f32.partialorder %v3016_v56, 8.507059e+37 }
0x1485   :  { %v4075_v0 = vpop.eup %4074 }
0x1486   :  { %v3008_v55 = vmul.f32 %v4075_v0, %v3005_v54  ;;  %vm3013_vm14 = vweird.f32 %v4075_v0  ;;  %v4077_v38 = vpop.eup %4076 }
0x1487   :  { %vm3014_vm1 = vmor %vm3012_vm15, %vm3013_vm14 }
0x1488   :  { %v3009_v37 = vsub.f32 1.0, %v3008_v55 }
0x148a   :  { %v3010_v4 = vmul.f32 %v4075_v0, %v3009_v37 }
0x148c   :  { %v3011_v30 = vadd.f32 %v4075_v0, %v3010_v4 }
0x148e   :  { %v3015_v52 = vsel %vm3014_vm1, %v4075_v0, %v3011_v30 }
0x148f   :  { %v3020_v21 = vsel %vm3017_vm4, %v3019_v34, %v3015_v52 }
0x1490   :  { %v3079_v58 = vmul.f32 %v4077_v38, %v3020_v21  ;;  %v3077_v44 = vmul.f32 %v3020_v21, %v5253_v39  ;;  %v1913_v21 = vpop.f32.mrf.mxu0 }
0x1491   :  { %v2969_v18 = vpop.f32.mrf.mxu2  ;;  %v2992_v12 = vpop.f32.mrf.mxu3 }
0x1492   :  { %v2997_v59 = vadd.f32 %v2969_v18, %v1911_v57  ;;  %3083 = vrot.lane.b32.xlu1 %v3079_v58, %s4145_s3  ;;  %v2998_v13 = vadd.f32 %v2992_v12, %v1976_v3  ;;  %v1914_v57 = vadd.f32 %v1913_v21, %v4952_v40 }
0x1494   :  { %v3730_v61 = vmul.f32 -1.442695, %v2997_v59  ;;  %v3732_v6 = vmul.f32 -1.442695, %v2998_v13 }
0x1496   :  { %4078 = vpow2.f32 %v3730_v61 }
0x1498   :  { %v1916_v61 = vpop.f32.mrf.mxu0 }
0x149c   :  { %v4079_v63 = vpop.eup %4078 }
0x149d   :  { %v3006_v8 = vadd.f32 1.0, %v4079_v63  ;;  %v1917_v63 = vadd.f32 %v1916_v61, %v4952_v40 }
0x149f   :  { %4080 = vrcp.f32 %v3006_v8  ;;  %v3033_v41 = vand.u32 2147483648, %v3006_v8  ;;  %v3031_v16 = vand.u32 2147483647, %v3006_v8  ;;  %vm3027_vm6 = vweird.f32 %v3006_v8 }
0x14a0   :  { %4082 = vtanh.f32 %v2998_v13  ;;  %v1978_v13 = vpop.f32.mrf.mxu1 }
0x14a1   :  { %v3034_v22 = vor.u32 1.1754944e-38, %v3033_v41  ;;  %vm3032_vm8 = vcmp.eq.f32.partialorder %v3031_v16, 8.507059e+37  ;;  %4084 = vpow2.f32 %v3731_v14 }
0x14a2   :  { %4086 = vpow2.f32 %v3732_v6 }
0x14a5   :  { %v4081_v10 = vpop.eup %4080 }
0x14a6   :  { %v3023_v11 = vmul.f32 %v4081_v10, %v3006_v8  ;;  %vm3028_vm5 = vweird.f32 %v4081_v10  ;;  %v4083_v26 = vpop.eup %4082 }
0x14a7   :  { %vm3029_vm7 = vmor %vm3027_vm6, %vm3028_vm5  ;;  %v4085_v28 = vpop.eup %4084 }
0x14a8   :  { %v3024_v9 = vsub.f32 1.0, %v3023_v11  ;;  %v3045_v32 = vadd.f32 1.0, %v4085_v28  ;;  %v4087_v25 = vpop.eup %4086 }
0x14a9   :  { %v3046_v35 = vadd.f32 1.0, %v4087_v25 }
0x14aa   :  { %v3025_v15 = vmul.f32 %v4081_v10, %v3024_v9  ;;  %4088 = vrcp.f32 %v3045_v32  ;;  %v3058_v29 = vand.u32 2147483648, %v3045_v32  ;;  %vm3052_vm10 = vweird.f32 %v3045_v32 }
0x14ab   :  { %4090 = vrcp.f32 %v3046_v35  ;;  %v3056_v51 = vand.u32 2147483647, %v3045_v32  ;;  %v3073_v19 = vand.u32 2147483648, %v3046_v35  ;;  %vm3067_vm14 = vweird.f32 %v3046_v35 }
0x14ac   :  { %v3026_v45 = vadd.f32 %v4081_v10, %v3025_v15  ;;  %v3059_v7 = vor.u32 1.1754944e-38, %v3058_v29  ;;  %v3071_v4 = vand.u32 2147483647, %v3046_v35  ;;  %v1979_v9 = vadd.f32 %v1978_v13, %v4956_v17  ;;  %v3301_v13 = vld [vmem:[%s5481_s5 + $0x60] sm:$0xff] }
0x14ad   :  { %vm3057_vm12 = vcmp.eq.f32.partialorder %v3056_v51, 8.507059e+37 }
0x14ae   :  { %v3030_v24 = vsel %vm3029_vm7, %v4081_v10, %v3026_v45  ;;  %vm3072_vm1 = vcmp.eq.f32.partialorder %v3071_v4, 8.507059e+37 }
0x14af   :  { %v3035_v20 = vsel %vm3032_vm8, %v3034_v22, %v3030_v24  ;;  %v1981_v24 = vpop.f32.mrf.mxu1 }
0x14b0   :  { %v3080_v23 = vmul.f32 %v4083_v26, %v3035_v20  ;;  %v4089_v36 = vpop.eup %4088  ;;  %v3078_v60 = vmul.f32 %v3035_v20, %v5257_v27  ;;  %v3074_v27 = vor.u32 1.1754944e-38, %v3073_v19  ;;  %v1982_v28 = vadd.f32 %v1981_v24, %v4956_v17  ;;  %v3298_v24 = vld [vmem:[%s5481_s5 + $0x48] sm:$0xff] }
0x14b1   :  { %v3048_v1 = vmul.f32 %v4089_v36, %v3045_v32  ;;  %v4091_v42 = vpop.eup %4090  ;;  %vm3053_vm9 = vweird.f32 %v4089_v36 }
0x14b2   :  { %3085 = vrot.lane.b32.xlu2 %v3080_v23, %s4145_s3  ;;  %v3063_v43 = vmul.f32 %v4091_v42, %v3046_v35  ;;  %vm3054_vm11 = vmor %vm3052_vm10, %vm3053_vm9  ;;  %vm3068_vm13 = vweird.f32 %v4091_v42 }
0x14b3   :  { %v3049_v62 = vsub.f32 1.0, %v3048_v1  ;;  %vm3069_vm15 = vmor %vm3067_vm14, %vm3068_vm13 }
0x14b4   :  { %v3064_v50 = vsub.f32 1.0, %v3063_v43 }
0x14b5   :  { %v3050_v31 = vmul.f32 %v4089_v36, %v3049_v62 }
0x14b6   :  { %v3065_v54 = vmul.f32 %v4091_v42, %v3064_v50 }
0x14b7   :  { %v3051_v48 = vadd.f32 %v4089_v36, %v3050_v31 }
0x14b8   :  { %v3066_v37 = vadd.f32 %v4091_v42, %v3065_v54 }
0x14b9   :  { %v3055_v53 = vsel %vm3054_vm11, %v4089_v36, %v3051_v48 }
0x14ba   :  { %v3060_v2 = vsel %vm3057_vm12, %v3059_v7, %v3055_v53  ;;  %v3070_v56 = vsel %vm3069_vm15, %v4091_v42, %v3066_v37 }
0x14bb   :  { %v3075_v49 = vsel %vm3072_vm1, %v3074_v27, %v3070_v56 }
0x1504   :  { %v3084_v46 = vpop.permute.xlu1 %3083 }
0x1505   :  { %v5281_v47 = vadd.f32 %v3084_v46, %v3077_v44 }
0x1507   :  { %4092 = vtanh.f32 %v5281_v47 }
0x150c   :  { %v3086_v33 = vpop.permute.xlu2 %3085 }
0x150d   :  { %v4093_v39 = vpop.eup %4092  ;;  %v5285_v0 = vadd.f32 %v3086_v33, %v3078_v60 }
0x150e   :  { %v3093_v55 = vmul.f32 %v4093_v39, %v3060_v2 }
0x150f   :  { %4094 = vtanh.f32 %v5285_v0 }
0x1510   :  { %3096 = vrot.lane.b32.xlu0 %v3093_v55, %s4145_s3 }
0x1515   :  { %v4095_v30 = vpop.eup %4094 }
0x1516   :  { %v3094_v34 = vmul.f32 %v4095_v30, %v3075_v49 }
0x1518   :  { %3101 = vrot.lane.b32.xlu1 %v3094_v34, %s4145_s3 }
0x1582   :  { %v3097_v52 = vpop.permute.xlu0 %3096 }
0x1583   :  { %3733 = vst.msk [vmem:[%s5483_s8 + $0x28] sm:$0xff] %vm59_vm0, %v3097_v52  ;;  %3735 = vmatmul.msk.f32.vlgmr.msra.gmra.mxu2 %vm293_vm2, %v3097_v52  ;;  %3737 = vmatmul.msk.f32.vlgmr.msra.gmra.mxu3 %vm293_vm2, %v3097_v52 }
0x158a   :  { %v3102_v38 = vpop.permute.xlu1 %3101 }
0x158b   :  { %3734 = vst.msk [vmem:[%s5483_s8 + $0x10] sm:$0xff] %vm456_vm3, %v3102_v38  ;;  %3736 = vmatmul.msk.f32.gmra.mxu2 %vm293_vm2, %v3102_v38  ;;  %3738 = vmatmul.msk.f32.gmra.mxu3 %vm293_vm2, %v3102_v38 }
0x1606   :  { %v3146_v58 = vpop.f32.mrf.mxu2  ;;  %v3169_v11 = vpop.f32.mrf.mxu3 }
0x1607   :  { %v3175_v18 = vadd.f32 %v3146_v58, %v1914_v57  ;;  %v3176_v16 = vadd.f32 %v3169_v11, %v1979_v9  ;;  %v3302_v11 = vld [vmem:[%s5481_s5 + $0x68] sm:$0xff] }
0x1609   :  { %v3739_v59 = vmul.f32 -1.442695, %v3175_v18  ;;  %v3741_v33 = vmul.f32 -1.442695, %v3176_v16 }
0x160b   :  { %4096 = vpow2.f32 %v3739_v59 }
0x160e   :  { %v3149_v8 = vpop.f32.mrf.mxu2  ;;  %v3172_v23 = vpop.f32.mrf.mxu3 }
0x160f   :  { %v3177_v5 = vadd.f32 %v3149_v8, %v1917_v63  ;;  %v3178_v35 = vadd.f32 %v3172_v23, %v1982_v28  ;;  %v4146_v63 = vmov 0   ;;  %v3296_v23 = vld [vmem:[%s5481_s5 + $0x38] sm:$0xff]  ;;  %v3293_v28 = vld [vmem:[%s5481_s5 + $0x20] sm:$0xff] }
0x1610   :  { %3758 = vset.pattern.permute.xlu2 %v4146_v63  ;;  %3759 = vset.pattern.permute.xlu0 %v4146_v63 }
0x1611   :  { %v4097_v12 = vpop.eup %4096  ;;  %v3740_v3 = vmul.f32 -1.442695, %v3177_v5  ;;  %v3742_v4 = vmul.f32 -1.442695, %v3178_v35  ;;  %3757 = vset.pattern.permute.xlu1 %v4146_v63 }
0x1612   :  { %v3185_v10 = vadd.f32 1.0, %v4097_v12 }
0x1613   :  { %4098 = vpow2.f32 %v3740_v3  ;;  %v3303_v3 = vld [vmem:[%s5481_s5 + $0x70] sm:$0xff] }
0x1614   :  { %4100 = vrcp.f32 %v3185_v10  ;;  %v3198_v20 = vand.u32 2147483648, %v3185_v10  ;;  %v3196_v6 = vand.u32 2147483647, %v3185_v10  ;;  %vm3192_vm5 = vweird.f32 %v3185_v10  ;;  %3317 = vmatpush.msrb.mxu2 %v3303_v3 }
0x1616   :  { %v3199_v36 = vor.u32 1.1754944e-38, %v3198_v20  ;;  %vm3197_vm7 = vcmp.eq.f32.partialorder %v3196_v6, 8.507059e+37  ;;  %3318 = vmatpush.msrb.mxu2 %v3301_v13 }
0x1619   :  { %v4099_v41 = vpop.eup %4098 }
0x161a   :  { %v4101_v15 = vpop.eup %4100  ;;  %v3186_v45 = vadd.f32 1.0, %v4099_v41  ;;  %v3299_v41 = vld [vmem:[%s5481_s5 + $0x50] sm:$0xff] }
0x161b   :  { %v3188_v22 = vmul.f32 %v4101_v15, %v3185_v10  ;;  %vm3193_vm4 = vweird.f32 %v4101_v15  ;;  %v3304_v10 = vld [vmem:[%s5481_s5 + $0x78] sm:$0xff]  ;;  %3319 = vmatpush.msrb.mxu2 %v3299_v41 }
0x161c   :  { %4102 = vrcp.f32 %v3186_v45  ;;  %vm3194_vm6 = vmor %vm3192_vm5, %vm3193_vm4  ;;  %v3213_v46 = vand.u32 2147483648, %v3186_v45  ;;  %v3211_v50 = vand.u32 2147483647, %v3186_v45  ;;  %vm3207_vm9 = vweird.f32 %v3186_v45  ;;  %3340 = vmatpush.msrb.mxu3 %v3304_v10 }
0x161d   :  { %v3189_v26 = vsub.f32 1.0, %v3188_v22  ;;  %4104 = vtanh.f32 %v3176_v16  ;;  %v3297_v22 = vld [vmem:[%s5481_s5 + $0x40] sm:$0xff] }
0x161e   :  { %4106 = vtanh.f32 %v3178_v35  ;;  %v3214_v51 = vor.u32 1.1754944e-38, %v3213_v46  ;;  %vm3212_vm11 = vcmp.eq.f32.partialorder %v3211_v50, 8.507059e+37  ;;  %3341 = vmatpush.msrb.mxu3 %v3302_v11  ;;  %3320 = vmatpush.msrb.mxu2 %v3297_v22  ;;  %v3291_v35 = vld [vmem:[%s5481_s5 + $0x10] sm:$0xff]  ;;  %v3474_v46 = vld [vmem:[%s5484_s7 + $0x8] sm:$0xff] }
0x161f   :  { %v3190_v14 = vmul.f32 %v4101_v15, %v3189_v26  ;;  %4108 = vpow2.f32 %v3741_v33 }
0x1621   :  { %v3191_v32 = vadd.f32 %v4101_v15, %v3190_v14 }
0x1622   :  { %v4103_v25 = vpop.eup %4102 }
0x1623   :  { %v3203_v1 = vmul.f32 %v4103_v25, %v3186_v45  ;;  %v3195_v62 = vsel %vm3194_vm6, %v4101_v15, %v3191_v32  ;;  %v4105_v42 = vpop.eup %4104  ;;  %vm3208_vm8 = vweird.f32 %v4103_v25  ;;  %v3300_v15 = vld [vmem:[%s5481_s5 + $0x58] sm:$0xff]  ;;  %v3294_v32 = vld [vmem:[%s5481_s5 + $0x28] sm:$0xff] }
0x1624   :  { %v3200_v31 = vsel %vm3197_vm7, %v3199_v36, %v3195_v62  ;;  %vm3209_vm10 = vmor %vm3207_vm9, %vm3208_vm8  ;;  %v4107_v54 = vpop.eup %4106  ;;  %3342 = vmatpush.msrb.mxu3 %v3300_v15  ;;  %v3292_v36 = vld [vmem:[%s5481_s5 + $0x18] sm:$0xff]  ;;  %v3289_v62 = vld [vmem:[%s5481_s5] sm:$0xff] }
0x1625   :  { %v3259_v43 = vmul.f32 %v4105_v42, %v3200_v31  ;;  %v3204_v44 = vsub.f32 1.0, %v3203_v1  ;;  %v4109_v39 = vpop.eup %4108  ;;  %v3257_v27 = vmul.f32 %v3200_v31, %v5281_v47  ;;  %v3290_v42 = vld [vmem:[%s5481_s5 + $0x8] sm:$0xff] }
0x1626   :  { %v3225_v2 = vadd.f32 1.0, %v4109_v39  ;;  %3343 = vmatpush.msrb.mxu3 %v3298_v24  ;;  %v1919_v39 = vpop.f32.mrf.mxu0 }
0x1627   :  { %3263 = vrot.lane.b32.xlu2 %v3259_v43, %s4145_s3  ;;  %v3205_v48 = vmul.f32 %v4103_v25, %v3204_v44 }
0x1628   :  { %4110 = vrcp.f32 %v3225_v2  ;;  %v3238_v52 = vand.u32 2147483648, %v3225_v2  ;;  %vm3232_vm13 = vweird.f32 %v3225_v2  ;;  %v3236_v38 = vand.u32 2147483647, %v3225_v2  ;;  %3344 = vmatpush.msrb.mxu3 %v3296_v23 }
0x1629   :  { %v3206_v29 = vadd.f32 %v4103_v25, %v3205_v48  ;;  %4112 = vpow2.f32 %v3742_v4  ;;  %v3477_v48 = vld [vmem:[%s5484_s7 + $0x20] sm:$0xff] }
0x162a   :  { %v3239_v58 = vor.u32 1.1754944e-38, %v3238_v52  ;;  %vm3237_vm15 = vcmp.eq.f32.partialorder %v3236_v38, 8.507059e+37  ;;  %3345 = vmatpush.msrb.mxu3 %v3294_v32 }
0x162b   :  { %v3210_v53 = vsel %vm3209_vm10, %v4103_v25, %v3206_v29 }
0x162c   :  { %v3215_v60 = vsel %vm3212_vm11, %v3214_v51, %v3210_v53  ;;  %3346 = vmatpush.msrb.mxu3 %v3292_v36  ;;  %v3475_v36 = vld [vmem:[%s5484_s7 + $0x10] sm:$0xff] }
0x162d   :  { %v3260_v7 = vmul.f32 %v4107_v54, %v3215_v60  ;;  %v3258_v16 = vmul.f32 %v3215_v60, %v5285_v0  ;;  %v3295_v0 = vld [vmem:[%s5481_s5 + $0x30] sm:$0xff]  ;;  %v3469_v60 = vld [vmem:[%s5483_s8 + $0x20] sm:$0xff] }
0x162e   :  { %v4111_v55 = vpop.eup %4110  ;;  %3321 = vmatpush.msrb.mxu2 %v3295_v0  ;;  %3347 = vmatpush.msrb.mxu3 %v3290_v42  ;;  %v1922_v4 = vpop.f32.mrf.mxu0  ;;  %v3476_v42 = vld [vmem:[%s5484_s7 + $0x18] sm:$0xff] }
0x162f   :  { %3265 = vrot.lane.b32.xlu0 %v3260_v7, %s4145_s3  ;;  %v3228_v37 = vmul.f32 %v4111_v55, %v3225_v2  ;;  %vm3233_vm12 = vweird.f32 %v4111_v55  ;;  %v4113_v21 = vpop.eup %4112  ;;  %v1920_v2 = vadd.f32 %v1919_v39, %v4952_v40 }
0x1630   :  { %vm3234_vm14 = vmor %vm3232_vm13, %vm3233_vm12  ;;  %v3226_v59 = vadd.f32 1.0, %v4113_v21  ;;  %3322 = vmatpush.msrb.mxu2 %v3293_v28  ;;  %v1984_v21 = vpop.f32.mrf.mxu1 }
0x1631   :  { %v3229_v19 = vsub.f32 1.0, %v3228_v37 }
0x1632   :  { %v3253_v14 = vand.u32 2147483648, %v3226_v59  ;;  %vm3247_vm4 = vweird.f32 %v3226_v59  ;;  %v3251_v6 = vand.u32 2147483647, %v3226_v59  ;;  %3323 = vmatpush.msrb.mxu2 %v3291_v35 }
0x1633   :  { %v3230_v56 = vmul.f32 %v4111_v55, %v3229_v19 }
0x1634   :  { %v3254_v1 = vor.u32 1.1754944e-38, %v3253_v14  ;;  %vm3252_vm6 = vcmp.eq.f32.partialorder %v3251_v6, 8.507059e+37  ;;  %3324 = vmatpush.msrb.mxu2 %v3289_v62  ;;  %v3473_v62 = vld [vmem:[%s5484_s7] sm:$0xff] }
0x1635   :  { %v3231_v34 = vadd.f32 %v4111_v55, %v3230_v56  ;;  %v1923_v56 = vadd.f32 %v1922_v4, %v4952_v40 }
0x1637   :  { %v3235_v57 = vsel %vm3234_vm14, %v4111_v55, %v3231_v34 }
0x1638   :  { %v3240_v61 = vsel %vm3237_vm15, %v3239_v58, %v3235_v57  ;;  %v1985_v58 = vadd.f32 %v1984_v21, %v4956_v17 }
0x1681   :  { %v3264_v30 = vpop.permute.xlu2 %3263 }
0x1682   :  { %v5309_v49 = vadd.f32 %v3264_v30, %v3257_v27 }
0x1684   :  { %4114 = vtanh.f32 %v5309_v49 }
0x1685   :  { %4116 = vrcp.f32 %v3226_v59 }
0x168a   :  { %v4115_v18 = vpop.eup %4114 }
0x168b   :  { %v3273_v47 = vmul.f32 %v4115_v18, %v3240_v61  ;;  %v4117_v8 = vpop.eup %4116 }
0x168c   :  { %v3243_v5 = vmul.f32 %v4117_v8, %v3226_v59  ;;  %vm3248_vm1 = vweird.f32 %v4117_v8 }
0x168d   :  { %3276 = vrot.lane.b32.xlu1 %v3273_v47, %s4145_s3  ;;  %vm3249_vm5 = vmor %vm3247_vm4, %vm3248_vm1 }
0x168e   :  { %v3244_v12 = vsub.f32 1.0, %v3243_v5 }
0x1690   :  { %v3245_v9 = vmul.f32 %v4117_v8, %v3244_v12 }
0x1692   :  { %v3246_v20 = vadd.f32 %v4117_v8, %v3245_v9 }
0x1694   :  { %v3250_v25 = vsel %vm3249_vm5, %v4117_v8, %v3246_v20  ;;  %v1987_v8 = vpop.f32.mrf.mxu1 }
0x1695   :  { %v3255_v43 = vsel %vm3252_vm6, %v3254_v1, %v3250_v25  ;;  %v1988_v13 = vadd.f32 %v1987_v8, %v4956_v17 }
0x16a1   :  { %v3266_v45 = vpop.permute.xlu0 %3265 }
0x16a2   :  { %v5338_v26 = vadd.f32 %v3266_v45, %v3258_v16 }
0x16a4   :  { %4118 = vtanh.f32 %v5338_v26 }
0x16aa   :  { %v4119_v31 = vpop.eup %4118 }
0x16ab   :  { %v3274_v44 = vmul.f32 %v4119_v31, %v3255_v43  ;;  %v3478_v31 = vld [vmem:[%s5484_s7 + $0x28] sm:$0xff] }
0x16ad   :  { %3281 = vrot.lane.b32.xlu2 %v3274_v44, %s4145_s3 }
0x16b5   :  { %3488 = vperm.xlu2 %3758, %v3474_v46  }
0x16bd   :  { %3503 = vperm.xlu2 %3758, %v3477_v48  }
0x16ff   :  { %v3277_v50 = vpop.permute.xlu1 %3276 }
0x1700   :  { %3743 = vst.msk [vmem:[%s5483_s8 + $0x30] sm:$0xff] %vm59_vm0, %v3277_v50  ;;  %3745 = vmatmul.msk.f32.vlgmr.msrb.gmra.mxu2 %vm293_vm2, %v3277_v50  ;;  %3747 = vmatmul.msk.f32.vlgmr.msrb.gmra.mxu3 %vm293_vm2, %v3277_v50 }
0x1707   :  { %v3282_v29 = vpop.permute.xlu2 %3281 }
0x1708   :  { %3744 = vst.msk [vmem:[%s5483_s8 + $0x8] sm:$0xff] %vm456_vm3, %v3282_v29  ;;  %3746 = vmatmul.msk.f32.gmra.mxu2 %vm293_vm2, %v3282_v29  ;;  %3748 = vmatmul.msk.f32.gmra.mxu3 %vm293_vm2, %v3282_v29 }
0x170f   :  { %v3489_v51 = vpop.permute.xlu2 %3488  ;;  %v3466_v53 = vld [vmem:[%s5483_s8 + $0x8] sm:$0xff] }
0x1710   :  { %v3522_v54 = vmul.f32 %v3489_v51, %v3466_v53 }
0x1712   :  { %3530 = vst.msk [vmem:[%s5483_s8 + $0x8] sm:$0xff] %vm293_vm2, %v3522_v54 }
0x1717   :  { %v3504_v7 = vpop.permute.xlu2 %3503 }
0x1718   :  { %v3525_v33 = vmul.f32 %v3504_v7, %v3469_v60 }
0x171a   :  { %3533 = vst.msk [vmem:[%s5483_s8 + $0x20] sm:$0xff] %vm293_vm2, %v3525_v33 }
0x1783   :  { %v3326_v55 = vpop.f32.mrf.mxu2  ;;  %v3349_v57 = vpop.f32.mrf.mxu3 }
0x1784   :  { %v3355_v37 = vadd.f32 %v3326_v55, %v1920_v2  ;;  %v3356_v61 = vadd.f32 %v3349_v57, %v1985_v58 }
0x1786   :  { %v3749_v19 = vmul.f32 -1.442695, %v3355_v37  ;;  %v3751_v43 = vmul.f32 -1.442695, %v3356_v61 }
0x1788   :  { %4120 = vpow2.f32 %v3749_v19 }
0x178b   :  { %v3329_v27 = vpop.f32.mrf.mxu2  ;;  %v3352_v12 = vpop.f32.mrf.mxu3 }
0x178c   :  { %v3357_v30 = vadd.f32 %v3329_v27, %v1923_v56  ;;  %v3358_v41 = vadd.f32 %v3352_v12, %v1988_v13 }
0x178e   :  { %v4121_v34 = vpop.eup %4120  ;;  %v3750_v52 = vmul.f32 -1.442695, %v3357_v30  ;;  %v3752_v44 = vmul.f32 -1.442695, %v3358_v41 }
0x178f   :  { %v3365_v38 = vadd.f32 1.0, %v4121_v34 }
0x1790   :  { %4122 = vpow2.f32 %v3750_v52 }
0x1791   :  { %4124 = vrcp.f32 %v3365_v38  ;;  %v3378_v40 = vand.u32 2147483648, %v3365_v38  ;;  %v3376_v10 = vand.u32 2147483647, %v3365_v38  ;;  %vm3372_vm8 = vweird.f32 %v3365_v38 }
0x1793   :  { %v3379_v15 = vor.u32 1.1754944e-38, %v3378_v40  ;;  %vm3377_vm10 = vcmp.eq.f32.partialorder %v3376_v10, 8.507059e+37  ;;  %v3479_v10 = vld [vmem:[%s5484_s7 + $0x30] sm:$0xff] }
0x1796   :  { %v4123_v18 = vpop.eup %4122 }
0x1797   :  { %v4125_v59 = vpop.eup %4124  ;;  %v3366_v47 = vadd.f32 1.0, %v4123_v18 }
0x1798   :  { %v3368_v63 = vmul.f32 %v4125_v59, %v3365_v38  ;;  %vm3373_vm7 = vweird.f32 %v4125_v59 }
0x1799   :  { %4126 = vrcp.f32 %v3366_v47  ;;  %vm3374_vm9 = vmor %vm3372_vm8, %vm3373_vm7  ;;  %v3393_v23 = vand.u32 2147483648, %v3366_v47  ;;  %v3391_v17 = vand.u32 2147483647, %v3366_v47  ;;  %vm3387_vm12 = vweird.f32 %v3366_v47 }
0x179a   :  { %v3369_v5 = vsub.f32 1.0, %v3368_v63  ;;  %4128 = vtanh.f32 %v3356_v61 }
0x179b   :  { %4130 = vtanh.f32 %v3358_v41  ;;  %v3394_v28 = vor.u32 1.1754944e-38, %v3393_v23  ;;  %vm3392_vm14 = vcmp.eq.f32.partialorder %v3391_v17, 8.507059e+37 }
0x179c   :  { %v3370_v3 = vmul.f32 %v4125_v59, %v3369_v5  ;;  %4132 = vpow2.f32 %v3751_v43 }
0x179d   :  { %4134 = vpow2.f32 %v3752_v44 }
0x179e   :  { %v3371_v11 = vadd.f32 %v4125_v59, %v3370_v3 }
0x179f   :  { %v4127_v9 = vpop.eup %4126 }
0x17a0   :  { %v3383_v16 = vmul.f32 %v4127_v9, %v3366_v47  ;;  %v3375_v45 = vsel %vm3374_vm9, %v4125_v59, %v3371_v11  ;;  %v4129_v22 = vpop.eup %4128  ;;  %vm3388_vm11 = vweird.f32 %v4127_v9  ;;  %v3468_v11 = vld [vmem:[%s5483_s8 + $0x18] sm:$0xff] }
0x17a1   :  { %v3380_v24 = vsel %vm3377_vm10, %v3379_v15, %v3375_v45  ;;  %vm3389_vm13 = vmor %vm3387_vm12, %vm3388_vm11  ;;  %v4131_v25 = vpop.eup %4130  ;;  %v3480_v15 = vld [vmem:[%s5484_s7 + $0x38] sm:$0xff] }
0x17a2   :  { %v3439_v20 = vmul.f32 %v4129_v22, %v3380_v24  ;;  %v3384_v0 = vsub.f32 1.0, %v3383_v16  ;;  %v4133_v46 = vpop.eup %4132  ;;  %v3437_v39 = vmul.f32 %v3380_v24, %v5309_v49  ;;  %v3467_v49 = vld [vmem:[%s5483_s8 + $0x10] sm:$0xff]  ;;  %v3470_v16 = vld [vmem:[%s5483_s8 + $0x28] sm:$0xff] }
0x17a3   :  { %v3405_v48 = vadd.f32 1.0, %v4133_v46  ;;  %v4135_v50 = vpop.eup %4134 }
0x17a4   :  { %3443 = vrot.lane.b32.xlu0 %v3439_v20, %s4145_s3  ;;  %v3385_v14 = vmul.f32 %v4127_v9, %v3384_v0  ;;  %v3406_v29 = vadd.f32 1.0, %v4135_v50  ;;  %v3471_v20 = vld [vmem:[%s5483_s8 + $0x30] sm:$0xff] }
0x17a5   :  { %4136 = vrcp.f32 %v3405_v48  ;;  %v3418_v4 = vand.u32 2147483648, %v3405_v48  ;;  %vm3412_vm1 = vweird.f32 %v3405_v48  ;;  %v3416_v56 = vand.u32 2147483647, %v3405_v48 }
0x17a6   :  { %v3386_v6 = vadd.f32 %v4127_v9, %v3385_v14  ;;  %4138 = vrcp.f32 %v3406_v29  ;;  %vm3427_vm7 = vweird.f32 %v3406_v29  ;;  %v3431_v63 = vand.u32 2147483647, %v3406_v29 }
0x17a7   :  { %v3419_v52 = vor.u32 1.1754944e-38, %v3418_v4  ;;  %vm3417_vm5 = vcmp.eq.f32.partialorder %v3416_v56, 8.507059e+37 }
0x17a8   :  { %v3390_v32 = vsel %vm3389_vm13, %v4127_v9, %v3386_v6  ;;  %vm3432_vm9 = vcmp.eq.f32.partialorder %v3431_v63, 8.507059e+37 }
0x17a9   :  { %v3395_v35 = vsel %vm3392_vm14, %v3394_v28, %v3390_v32 }
0x17aa   :  { %v3440_v1 = vmul.f32 %v4131_v25, %v3395_v35  ;;  %v3438_v34 = vmul.f32 %v3395_v35, %v5338_v26  ;;  %v3433_v26 = vand.u32 2147483648, %v3406_v29 }
0x17ab   :  { %v4137_v51 = vpop.eup %4136 }
0x17ac   :  { %3445 = vrot.lane.b32.xlu1 %v3440_v1, %s4145_s3  ;;  %3493 = vperm.xlu0 %3759, %v3475_v36   ;;  %v3408_v53 = vmul.f32 %v4137_v51, %v3405_v48  ;;  %v4139_v60 = vpop.eup %4138  ;;  %vm3413_vm15 = vweird.f32 %v4137_v51  ;;  %v3434_v5 = vor.u32 1.1754944e-38, %v3433_v26 }
0x17ad   :  { %v3423_v33 = vmul.f32 %v4139_v60, %v3406_v29  ;;  %vm3414_vm4 = vmor %vm3412_vm1, %vm3413_vm15  ;;  %vm3428_vm6 = vweird.f32 %v4139_v60 }
0x17ae   :  { %v3409_v54 = vsub.f32 1.0, %v3408_v53  ;;  %vm3429_vm8 = vmor %vm3427_vm7, %vm3428_vm6 }
0x17af   :  { %v3424_v19 = vsub.f32 1.0, %v3423_v33 }
0x17b0   :  { %v3410_v7 = vmul.f32 %v4137_v51, %v3409_v54 }
0x17b1   :  { %v3425_v30 = vmul.f32 %v4139_v60, %v3424_v19 }
0x17b2   :  { %v3411_v37 = vadd.f32 %v4137_v51, %v3410_v7 }
0x17b3   :  { %v3426_v47 = vadd.f32 %v4139_v60, %v3425_v30 }
0x17b4   :  { %3483 = vperm.xlu1 %3757, %v3473_v62   ;;  %v3415_v27 = vsel %vm3414_vm4, %v4137_v51, %v3411_v37 }
0x17b5   :  { %v3420_v59 = vsel %vm3417_vm5, %v3419_v52, %v3415_v27  ;;  %v3430_v8 = vsel %vm3429_vm8, %v4139_v60, %v3426_v47 }
0x17b6   :  { %v3435_v3 = vsel %vm3432_vm9, %v3434_v5, %v3430_v8 }
0x17bc   :  { %3498 = vperm.xlu1 %3757, %v3476_v42  }
0x17c4   :  { %3508 = vperm.xlu1 %3757, %v3478_v31  }
0x1816   :  { %v3444_v2 = vpop.permute.xlu0 %3443 }
0x1817   :  { %v3449_v55 = vadd.f32 %v3444_v2, %v3437_v39 }
0x1819   :  { %4140 = vtanh.f32 %v3449_v55 }
0x181e   :  { %v3446_v38 = vpop.permute.xlu1 %3445  ;;  %v3494_v21 = vpop.permute.xlu0 %3493 }
0x181f   :  { %v4141_v57 = vpop.eup %4140  ;;  %v3450_v58 = vadd.f32 %v3446_v38, %v3438_v34  ;;  %v3523_v18 = vmul.f32 %v3494_v21, %v3467_v49 }
0x1820   :  { %v3453_v61 = vmul.f32 %v4141_v57, %v3420_v59 }
0x1821   :  { %4142 = vtanh.f32 %v3450_v58  ;;  %3531 = vst.msk [vmem:[%s5483_s8 + $0x10] sm:$0xff] %vm293_vm2, %v3523_v18 }
0x1822   :  { %3456 = vrot.lane.b32.xlu2 %v3453_v61, %s4145_s3 }
0x1826   :  { %v3484_v40 = vpop.permute.xlu1 %3483 }
0x1827   :  { %v4143_v12 = vpop.eup %4142 }
0x1828   :  { %v3454_v13 = vmul.f32 %v4143_v12, %v3435_v3 }
0x182a   :  { %3461 = vrot.lane.b32.xlu0 %v3454_v13, %s4145_s3  ;;  %3513 = vperm.xlu2 %3758, %v3479_v10  }
0x182e   :  { %v3499_v9 = vpop.permute.xlu1 %3498 }
0x182f   :  { %v3524_v41 = vmul.f32 %v3499_v9, %v3468_v11 }
0x1831   :  { %3532 = vst.msk [vmem:[%s5483_s8 + $0x18] sm:$0xff] %vm293_vm2, %v3524_v41 }
0x1832   :  { %3518 = vperm.xlu0 %3759, %v3480_v15  }
0x1836   :  { %v3509_v45 = vpop.permute.xlu1 %3508 }
0x1837   :  { %v3526_v22 = vmul.f32 %v3509_v45, %v3470_v16 }
0x1839   :  { %3534 = vst.msk [vmem:[%s5483_s8 + $0x28] sm:$0xff] %vm293_vm2, %v3526_v22 }
0x187c   :  { %v3457_v24 = vpop.permute.xlu2 %3456 }
0x187d   :  { %3753 = vst.msk [vmem:[%s5483_s8 + $0x38] sm:$0xff] %vm59_vm0, %v3457_v24 }
0x1884   :  { %v3514_v0 = vpop.permute.xlu2 %3513  ;;  %v3472_v28 = vld [vmem:[%s5483_s8 + $0x38] sm:$0xff] }
0x1885   :  { %v3527_v23 = vmul.f32 %v3514_v0, %v3471_v20 }
0x1887   :  { %3535 = vst.msk [vmem:[%s5483_s8 + $0x30] sm:$0xff] %vm293_vm2, %v3527_v23 }
0x189c   :  { %v3462_v14 = vpop.permute.xlu0 %3461 }
0x189d   :  { %3464 = vst.msk [vmem:[%s5483_s8] sm:$0xff] %vm456_vm3, %v3462_v14 }
0x18a4   :  { %v3465_v17 = vld [vmem:[%s5483_s8] sm:$0xff]  ;;  %v3519_v6 = vpop.permute.xlu0 %3518 }
0x18a5   :  { %v3521_v32 = vmul.f32 %v3484_v40, %v3465_v17  ;;  %v3528_v25 = vmul.f32 %v3519_v6, %v3472_v28 }
0x18a7   :  { %3529 = vst.msk [vmem:[%s5483_s8] sm:$0xff] %vm293_vm2, %v3521_v32 }
0x18a8   :  { %3536 = vst.msk [vmem:[%s5483_s8 + $0x38] sm:$0xff] %vm293_vm2, %v3528_v25 }

</bundles_post_ra>
